<compile_context>
chip_gen: v7x
topology: tpu7x:2x2x1
jax: 0.10.0
libtpu: 0.0.40
codegen_flags: <defaults>
</compile_context>

<pallas_src>
import functools

import jax
import jax.numpy as jnp
from jax.experimental import pallas as pl
from jax.experimental.pallas import tpu as pltpu

LABEL_NUMBER = 4   # synthetic choice for num_classes

_CIN = 5           # range-view channels fed to the backbone
_CIN_PAD = 8       # conv1 input channels padded to a full sublane group
_C1 = 64           # conv1 output channels
_C2 = 128          # conv2 / DLA output channels


# ----------------------------------------------------------------------------
# Fused kernel: conv1 + conv2 + heads + box-corner geometry, one row tile.
# ----------------------------------------------------------------------------
def _lasernet_fused_kernel(aux_ref, w1_ref, b1_ref, w2_ref, b2_ref,
                           wh_ref, bh_ref, out_ref, h1ext_ref,
                           *, wp, pp, ext, ncls):
    """One (batch, row-tile) grid step.

    aux_ref   : (1, 1, 12, pp + 2*ext) channel-major, flattened padded pixels.
                rows 0:8  = range-view channels (5 real + 3 zero pad)
                rows 8:10 = (x, y) coordinates, row 10 = azimuth,
                row 11    = valid-pixel mask (1 inside the true image).
    w1_ref    : (64, 72)    conv1 weight, tap-major im2col layout, transposed.
    w2_ref    : (128, 576)  conv2 weight, tap-major im2col layout, transposed.
    wh_ref    : (ncls+7, 128) fused head weight [classes | bb_params | log_std].
    out_ref   : (1, 1, ncls+9, pp) packed lane-dense output:
                rows 0:ncls = class logits, ncls:ncls+8 = corners,
                row ncls+8 = log_std.
    h1ext_ref : (64, pp + 2*ext) VMEM scratch: conv1 output with zero-filled
                extension so conv2's 9 taps are plain lane-offset windows.
    """
    offs = [dyy * wp + dxx for dyy in (-1, 0, 1) for dxx in (-1, 0, 1)]

    # ---- conv1 + ReLU: one im2col matmul (K = 9 * 8) ------------------------
    patch1 = jnp.concatenate(
        [aux_ref[0, 0, 0:_CIN_PAD, ext + o: ext + o + pp] for o in offs],
        axis=0)                                                    # (72, pp)
    h1 = jnp.dot(w1_ref[...], patch1, preferred_element_type=jnp.float32)
    h1 = jnp.maximum(h1 + b1_ref[...], 0.0)                        # (64, pp)

    geo = aux_ref[0, 0, _CIN_PAD:_CIN_PAD + 4, ext: ext + pp]      # (4, pp)
    mask = geo[3:4, :]                                             # valid mask

    # zero-padded conv1 feature map placed into the extended scratch buffer
    zeros_e = jnp.zeros((_C1, ext), jnp.float32)
    h1ext_ref[:, 0:ext] = zeros_e
    h1ext_ref[:, ext + pp: ext + pp + ext] = zeros_e
    h1ext_ref[:, ext: ext + pp] = h1 * mask

    # ---- conv2 + ReLU: one im2col matmul (K = 9 * 64) ------------------------
    patch2 = jnp.concatenate(
        [h1ext_ref[:, ext + o: ext + o + pp] for o in offs], axis=0)  # (576, pp)
    feat = jnp.dot(w2_ref[...], patch2, preferred_element_type=jnp.float32)
    feat = jnp.maximum(feat + b2_ref[...], 0.0)                    # (128, pp)

    # ---- fused 1x1 heads: single matmul -------------------------------------
    ht = jnp.dot(wh_ref[...], feat,
                 preferred_element_type=jnp.float32) + bh_ref[...]  # (ncls+7, pp)

    # ---- box-corner geometry, lane-major (pixels on the 128-lane axis) ------
    px, py, ang = geo[0:1, :], geo[1:2, :], geo[2:3, :]
    dx = ht[ncls + 0: ncls + 1, :]
    dy = ht[ncls + 1: ncls + 2, :]
    wx = ht[ncls + 2: ncls + 3, :]
    wy = ht[ncls + 3: ncls + 4, :]
    ln = ht[ncls + 4: ncls + 5, :]
    wd = ht[ncls + 5: ncls + 6, :]

    cos_a = jnp.cos(ang)
    sin_a = jnp.sin(ang)
    # box center: rotate the predicted offset by the azimuth angle
    cx = px + dx * cos_a - dy * sin_a
    cy = py + dx * sin_a + dy * cos_a
    # heading = azimuth + atan2(wy, wx), via angle addition (no atan2 in-kernel)
    inv_norm = jax.lax.rsqrt(wx * wx + wy * wy + 1e-8)
    cos_o = wx * inv_norm
    sin_o = wy * inv_norm
    cos_t = cos_a * cos_o - sin_a * sin_o
    sin_t = sin_a * cos_o + cos_a * sin_o

    hl = 0.5 * ln
    hw = 0.5 * wd
    rows = []
    for su, sv in ((1.0, 1.0), (1.0, -1.0), (-1.0, -1.0), (-1.0, 1.0)):
        u = su * hl
        v = sv * hw
        rows.append(cx + u * cos_t - v * sin_t)
        rows.append(cy + u * sin_t + v * cos_t)
    corners = jnp.concatenate(rows, axis=0)                        # (8, pp)

    out_ref[0, 0, 0:ncls, :] = ht[0:ncls, :]
    out_ref[0, 0, ncls: ncls + 8, :] = corners
    out_ref[0, 0, ncls + 8: ncls + 9, :] = ht[ncls + 6: ncls + 7, :]


def _fused_forward(aux_tiles, w1t, b1, w2t, b2, wht, bh, *, wp, pp, ext, ncls):
    n, n_tiles = aux_tiles.shape[0], aux_tiles.shape[1]
    pext = pp + 2 * ext
    kernel = functools.partial(_lasernet_fused_kernel,
                               wp=wp, pp=pp, ext=ext, ncls=ncls)
    return pl.pallas_call(
        kernel,
        out_shape=jax.ShapeDtypeStruct((n, n_tiles, ncls + 9, pp), jnp.float32),
        grid=(n, n_tiles),
        in_specs=[
            pl.BlockSpec((1, 1, 12, pext), lambda i, j: (i, j, 0, 0)),
            pl.BlockSpec((_C1, 9 * _CIN_PAD), lambda i, j: (0, 0)),
            pl.BlockSpec((_C1, 1), lambda i, j: (0, 0)),
            pl.BlockSpec((_C2, 9 * _C1), lambda i, j: (0, 0)),
            pl.BlockSpec((_C2, 1), lambda i, j: (0, 0)),
            pl.BlockSpec((ncls + 7, _C2), lambda i, j: (0, 0)),
            pl.BlockSpec((ncls + 7, 1), lambda i, j: (0, 0)),
        ],
        out_specs=pl.BlockSpec((1, 1, ncls + 9, pp), lambda i, j: (i, j, 0, 0)),
        scratch_shapes=[pltpu.VMEM((_C1, pext), jnp.float32)],
        compiler_params=pltpu.CompilerParams(
            dimension_semantics=("parallel", "parallel"),
            # Raise for fat row tiles at production range-view sizes
            # (v6e: 128 MiB physical / 32 MiB scoped default; v7x: 64/32).
            vmem_limit_bytes=32 * 1024 * 1024),
    )(aux_tiles, w1t, b1, w2t, b2, wht, bh)


# ----------------------------------------------------------------------------
# Parameter init (deterministic, synthetic) + full forward wrapper.
# ----------------------------------------------------------------------------
def init_params(key, num_classes=LABEL_NUMBER):
    ks = jax.random.split(key, 10)

    def w_init(k, shape, fan_in):
        return jax.random.normal(k, shape, jnp.float32) / jnp.sqrt(fan_in)

    return {
        # simplified DLA backbone: 5 -> 64 -> 128
        "w1": w_init(ks[0], (3, 3, _CIN, _C1), 3 * 3 * _CIN),
        "b1": jnp.zeros((1, _C1), jnp.float32),
        "w2": w_init(ks[1], (3, 3, _C1, _C2), 3 * 3 * _C1),
        "b2": jnp.zeros((1, _C2), jnp.float32),
        # heads (1x1 convs)
        "wc": w_init(ks[2], (_C2, num_classes), _C2),
        "bc": jnp.zeros((1, num_classes), jnp.float32),
        "wb": w_init(ks[3], (_C2, 6), _C2),
        "bb": jnp.zeros((1, 6), jnp.float32),
        "wl": w_init(ks[4], (_C2, 1), _C2),
        "bl": jnp.zeros((1, 1), jnp.float32),
    }


@functools.partial(jax.jit, static_argnames=("row_tile",))
def lasernet_forward(x_nchw, params, row_tile=4):
    """x_nchw: (N, 7, H, W) with channels (x, y, z, intensity, azimuth, ...)."""
    n, _, h, w = x_nchw.shape
    ncls = params["wc"].shape[-1]

    x = jnp.transpose(x_nchw, (0, 2, 3, 1))                  # NHWC
    rv = x[..., 2:7]                                         # (N,H,W,5)
    coords = x[..., 0:2]                                     # (N,H,W,2)
    ang = x[..., 4:5]                                        # (N,H,W,1) azimuth
    valid = jnp.ones((n, h, w, 1), jnp.float32)
    zpad = jnp.zeros((n, h, w, _CIN_PAD - _CIN), jnp.float32)
    aux = jnp.concatenate([rv, zpad, coords, ang, valid], axis=-1)  # (N,H,W,12)

    # --- overlapped row tiles (2-row halo for the two stacked 3x3 convs) -----
    tr = min(int(row_tile), h)
    n_tiles = -(-h // tr)
    h_round = n_tiles * tr
    wp, trh = w + 2, tr + 4
    pp = trh * wp
    ext = wp + 1                        # lane-shift slack for the 9 conv taps
    aux_p = jnp.pad(aux, ((0, 0), (2, 2 + h_round - h), (1, 1), (0, 0)))
    tiles = jnp.stack(
        [aux_p[:, t * tr: t * tr + trh] for t in range(n_tiles)], axis=1)
    # channel-major, flattened pixels, zero extension on both ends (glue)
    tiles = jnp.transpose(tiles, (0, 1, 4, 2, 3)).reshape(n, n_tiles, 12, pp)
    tiles = jnp.pad(tiles, ((0, 0), (0, 0), (0, 0), (ext, ext)))

    # --- repack weights for the lane-major im2col kernel (glue, done once) ---
    w1p = jnp.pad(params["w1"], ((0, 0), (0, 0), (0, _CIN_PAD - _CIN), (0, 0)))
    w1t = w1p.reshape(9 * _CIN_PAD, _C1).T                   # (64, 72)
    w2t = params["w2"].reshape(9 * _C1, _C2).T               # (128, 576)
    b1 = params["b1"].reshape(_C1, 1)
    b2 = params["b2"].reshape(_C2, 1)
    wht = jnp.concatenate([params["wc"], params["wb"], params["wl"]], axis=1).T
    bh = jnp.concatenate([params["bc"], params["bb"], params["bl"]],
                         axis=1).reshape(-1, 1)              # (ncls+7, 1)

    packed = _fused_forward(tiles, w1t, b1, w2t, b2, wht, bh,
                            wp=wp, pp=pp, ext=ext, ncls=ncls)

    # --- unpack the lane-dense output slab (glue) ----------------------------
    packed = packed.reshape(n, n_tiles, ncls + 9, trh, wp)
    packed = packed[:, :, :, 2: 2 + tr, 1: 1 + w]            # valid interior
    packed = jnp.transpose(packed, (0, 2, 1, 3, 4)).reshape(
        n, ncls + 9, h_round, w)[:, :, :h, :]
    class_preds = packed[:, 0:ncls]                          # (N, ncls, H, W)
    bb_corners = packed[:, ncls: ncls + 8]                   # (N, 8, H, W)
    log_stds = packed[:, ncls + 8]                           # (N, H, W)
    return class_preds, bb_corners, log_stds


# ----------------------------------------------------------------------------
# Pure-JAX reference (for a numerical sanity check only).
# ----------------------------------------------------------------------------
def _reference_forward(x_nchw, params):
    x = jnp.transpose(x_nchw, (0, 2, 3, 1))
    rv, coords, ang = x[..., 2:7], x[..., 0:2], x[..., 4]

    def conv3x3(inp, wgt, bias):
        _, hh, ww, _ = inp.shape
        xp = jnp.pad(inp, ((0, 0), (1, 1), (1, 1), (0, 0)))
        out = 0.0
        for ky in range(3):
            for kx in range(3):
                out = out + jnp.einsum('nhwc,ck->nhwk',
                                       xp[:, ky:ky + hh, kx:kx + ww, :],
                                       wgt[ky, kx])
        return jnp.maximum(out + bias.reshape(1, 1, 1, -1), 0.0)

    h1 = conv3x3(rv, params["w1"], params["b1"])
    feat = conv3x3(h1, params["w2"], params["b2"])
    cls = jnp.einsum('nhwc,ck->nhwk', feat, params["wc"]) + params["bc"][0]
    bbp = jnp.einsum('nhwc,ck->nhwk', feat, params["wb"]) + params["bb"][0]
    lsd = jnp.einsum('nhwc,ck->nhwk', feat, params["wl"]) + params["bl"][0]

    dx, dy = bbp[..., 0], bbp[..., 1]
    wx, wy = bbp[..., 2], bbp[..., 3]
    ln, wd = bbp[..., 4], bbp[..., 5]
    px, py = coords[..., 0], coords[..., 1]
    cos_a, sin_a = jnp.cos(ang), jnp.sin(ang)
    cx = px + dx * cos_a - dy * sin_a
    cy = py + dx * sin_a + dy * cos_a
    inv = jax.lax.rsqrt(wx * wx + wy * wy + 1e-8)
    cos_o, sin_o = wx * inv, wy * inv
    cos_t = cos_a * cos_o - sin_a * sin_o
    sin_t = sin_a * cos_o + cos_a * sin_o
    hl, hw = 0.5 * ln, 0.5 * wd
    corners = []
    for su, sv in ((1.0, 1.0), (1.0, -1.0), (-1.0, -1.0), (-1.0, 1.0)):
        u, v = su * hl, sv * hw
        corners.append(cx + u * cos_t - v * sin_t)
        corners.append(cy + u * sin_t + v * cos_t)
    corners = jnp.stack(corners, axis=1)                     # (N, 8, H, W)
    return jnp.transpose(cls, (0, 3, 1, 2)), corners, lsd[..., 0]


if __name__ == "__main__":
    key = jax.random.PRNGKey(0)
    k_x, k_p = jax.random.split(key)

    N, C, H, W = 2, 7, 8, 16
    x = jax.random.normal(k_x, (N, C, H, W), jnp.float32)
    params = init_params(k_p, num_classes=LABEL_NUMBER)

    class_preds, bb_corners, log_stds = jax.block_until_ready(
        lasernet_forward(x, params))

    assert class_preds.shape == (N, LABEL_NUMBER, H, W)
    assert bb_corners.shape == (N, 8, H, W)
    assert log_stds.shape == (N, H, W)

    cls_r, cor_r, lsd_r = _reference_forward(x, params)
    for got, ref in ((class_preds, cls_r), (bb_corners, cor_r),
                     (log_stds, lsd_r)):
        assert jnp.all(jnp.isfinite(got))
        err = float(jnp.max(jnp.abs(got - ref)))
        assert err < 5e-2, err
    print("KERNEL_OK")
</pallas_src>

<mosaic_0001>
module attributes {stable_mosaic.version = 11 : i64} {
  func.func @_lasernet_fused_kernel(%arg0: i32, %arg1: i32, %arg2: memref<1x1x12x182xf32, #tpu.memory_space<vmem>>, %arg3: memref<64x72xf32, #tpu.memory_space<vmem>>, %arg4: memref<64x1xf32, #tpu.memory_space<vmem>>, %arg5: memref<128x576xf32, #tpu.memory_space<vmem>>, %arg6: memref<128x1xf32, #tpu.memory_space<vmem>>, %arg7: memref<11x128xf32, #tpu.memory_space<vmem>>, %arg8: memref<11x1xf32, #tpu.memory_space<vmem>>, %arg9: memref<1x1x13x144xf32, #tpu.memory_space<vmem>>, %arg10: memref<64x182xf32, #tpu.memory_space<vmem>>) attributes {dimension_semantics = [#tpu.dimension_semantics<parallel>, #tpu.dimension_semantics<parallel>], iteration_bounds = array<i64: 2, 2>, scalar_prefetch = 0 : i64, scratch_operands = 1 : i64, tpu.core_type = #tpu.core_type<tc>, window_params = [{transform_indices = @transform_0, window_bounds = array<i64: 1, 1, 12, 182>}, {pipeline_mode = #tpu.pipeline_mode<synchronous>, transform_indices = @transform_1, window_bounds = array<i64: 64, 72>}, {pipeline_mode = #tpu.pipeline_mode<synchronous>, transform_indices = @transform_2, window_bounds = array<i64: 64, 1>}, {pipeline_mode = #tpu.pipeline_mode<synchronous>, transform_indices = @transform_3, window_bounds = array<i64: 128, 576>}, {pipeline_mode = #tpu.pipeline_mode<synchronous>, transform_indices = @transform_4, window_bounds = array<i64: 128, 1>}, {pipeline_mode = #tpu.pipeline_mode<synchronous>, transform_indices = @transform_5, window_bounds = array<i64: 11, 128>}, {pipeline_mode = #tpu.pipeline_mode<synchronous>, transform_indices = @transform_6, window_bounds = array<i64: 11, 1>}, {transform_indices = @transform_7, window_bounds = array<i64: 1, 1, 13, 144>}]} {
    %c0 = arith.constant 0 : index
    %c0_0 = arith.constant 0 : index
    %c0_1 = arith.constant 0 : index
    %c0_2 = arith.constant 0 : index
    %0 = vector.load %arg2[%c0, %c0_0, %c0_1, %c0_2] : memref<1x1x12x182xf32, #tpu.memory_space<vmem>>, vector<1x1x8x144xf32>
    %1 = vector.shape_cast %0 : vector<1x1x8x144xf32> to vector<8x144xf32>
    %c0_3 = arith.constant 0 : index
    %c0_4 = arith.constant 0 : index
    %c0_5 = arith.constant 0 : index
    %c1 = arith.constant 1 : index
    %2 = vector.load %arg2[%c0_3, %c0_4, %c0_5, %c1] : memref<1x1x12x182xf32, #tpu.memory_space<vmem>>, vector<1x1x8x144xf32>
    %3 = vector.shape_cast %2 : vector<1x1x8x144xf32> to vector<8x144xf32>
    %c0_6 = arith.constant 0 : index
    %c0_7 = arith.constant 0 : index
    %c0_8 = arith.constant 0 : index
    %c2 = arith.constant 2 : index
    %4 = vector.load %arg2[%c0_6, %c0_7, %c0_8, %c2] : memref<1x1x12x182xf32, #tpu.memory_space<vmem>>, vector<1x1x8x144xf32>
    %5 = vector.shape_cast %4 : vector<1x1x8x144xf32> to vector<8x144xf32>
    %c0_9 = arith.constant 0 : index
    %c0_10 = arith.constant 0 : index
    %c0_11 = arith.constant 0 : index
    %c18 = arith.constant 18 : index
    %6 = vector.load %arg2[%c0_9, %c0_10, %c0_11, %c18] : memref<1x1x12x182xf32, #tpu.memory_space<vmem>>, vector<1x1x8x144xf32>
    %7 = vector.shape_cast %6 : vector<1x1x8x144xf32> to vector<8x144xf32>
    %c0_12 = arith.constant 0 : index
    %c0_13 = arith.constant 0 : index
    %c0_14 = arith.constant 0 : index
    %c19 = arith.constant 19 : index
    %8 = vector.load %arg2[%c0_12, %c0_13, %c0_14, %c19] : memref<1x1x12x182xf32, #tpu.memory_space<vmem>>, vector<1x1x8x144xf32>
    %9 = vector.shape_cast %8 : vector<1x1x8x144xf32> to vector<8x144xf32>
    %c0_15 = arith.constant 0 : index
    %c0_16 = arith.constant 0 : index
    %c0_17 = arith.constant 0 : index
    %c20 = arith.constant 20 : index
    %10 = vector.load %arg2[%c0_15, %c0_16, %c0_17, %c20] : memref<1x1x12x182xf32, #tpu.memory_space<vmem>>, vector<1x1x8x144xf32>
    %11 = vector.shape_cast %10 : vector<1x1x8x144xf32> to vector<8x144xf32>
    %c0_18 = arith.constant 0 : index
    %c0_19 = arith.constant 0 : index
    %c0_20 = arith.constant 0 : index
    %c36 = arith.constant 36 : index
    %12 = vector.load %arg2[%c0_18, %c0_19, %c0_20, %c36] : memref<1x1x12x182xf32, #tpu.memory_space<vmem>>, vector<1x1x8x144xf32>
    %13 = vector.shape_cast %12 : vector<1x1x8x144xf32> to vector<8x144xf32>
    %c0_21 = arith.constant 0 : index
    %c0_22 = arith.constant 0 : index
    %c0_23 = arith.constant 0 : index
    %c37 = arith.constant 37 : index
    %14 = vector.load %arg2[%c0_21, %c0_22, %c0_23, %c37] : memref<1x1x12x182xf32, #tpu.memory_space<vmem>>, vector<1x1x8x144xf32>
    %15 = vector.shape_cast %14 : vector<1x1x8x144xf32> to vector<8x144xf32>
    %c0_24 = arith.constant 0 : index
    %c0_25 = arith.constant 0 : index
    %c0_26 = arith.constant 0 : index
    %c38 = arith.constant 38 : index
    %16 = vector.load %arg2[%c0_24, %c0_25, %c0_26, %c38] : memref<1x1x12x182xf32, #tpu.memory_space<vmem>>, vector<1x1x8x144xf32>
    %17 = vector.shape_cast %16 : vector<1x1x8x144xf32> to vector<8x144xf32>
    %18 = tpu.concatenate %1, %3, %5, %7, %9, %11, %13, %15, %17 in 0 : vector<8x144xf32>, vector<8x144xf32>, vector<8x144xf32>, vector<8x144xf32>, vector<8x144xf32>, vector<8x144xf32>, vector<8x144xf32>, vector<8x144xf32>, vector<8x144xf32> -> vector<72x144xf32>
    %c0_27 = arith.constant 0 : index
    %c0_28 = arith.constant 0 : index
    %19 = vector.load %arg3[%c0_27, %c0_28] : memref<64x72xf32, #tpu.memory_space<vmem>>, vector<64x72xf32>
    %cst = arith.constant dense<0.000000e+00> : vector<64x144xf32>
    %20 = tpu.matmul %19, %18, %cst {dimension_numbers = #tpu.dot_dimension_numbers<[1], [0], [0], [1], [0, 0, 1, 1], [], []>} : vector<64x72xf32>, vector<72x144xf32>, vector<64x144xf32> -> vector<64x144xf32>
    %c0_29 = arith.constant 0 : index
    %c0_30 = arith.constant 0 : index
    %21 = vector.load %arg4[%c0_29, %c0_30] : memref<64x1xf32, #tpu.memory_space<vmem>>, vector<64x1xf32>
    %22 = vector.broadcast %21 : vector<64x1xf32> to vector<64x144xf32>
    %23 = arith.addf %20, %22 : vector<64x144xf32>
    %cst_31 = arith.constant 0.000000e+00 : f32
    %24 = vector.broadcast %cst_31 : f32 to vector<64x144xf32>
    %25 = arith.maximumf %23, %24 : vector<64x144xf32>
    %c0_32 = arith.constant 0 : index
    %c0_33 = arith.constant 0 : index
    %c8 = arith.constant 8 : index
    %c19_34 = arith.constant 19 : index
    %26 = vector.load %arg2[%c0_32, %c0_33, %c8, %c19_34] : memref<1x1x12x182xf32, #tpu.memory_space<vmem>>, vector<1x1x4x144xf32>
    %27 = vector.shape_cast %26 : vector<1x1x4x144xf32> to vector<4x144xf32>
    %28 = vector.extract_strided_slice %27 {offsets = [3, 0], sizes = [1, 144], strides = [1, 1]} : vector<4x144xf32> to vector<1x144xf32>
    %cst_35 = arith.constant 0.000000e+00 : f32
    %29 = vector.broadcast %cst_35 : f32 to vector<64x19xf32>
    %c0_36 = arith.constant 0 : index
    %c0_37 = arith.constant 0 : index
    %30 = vector.load %arg10[%c0_36, %c0_37] : memref<64x182xf32, #tpu.memory_space<vmem>>, vector<64x19xf32>
    tpu.vector_store %arg10[%c0_36, %c0_37], %29 {strides = array<i32>} : memref<64x182xf32, #tpu.memory_space<vmem>>, vector<64x19xf32>,
    %c0_38 = arith.constant 0 : index
    %c163 = arith.constant 163 : index
    %31 = vector.load %arg10[%c0_38, %c163] : memref<64x182xf32, #tpu.memory_space<vmem>>, vector<64x19xf32>
    tpu.vector_store %arg10[%c0_38, %c163], %29 {strides = array<i32>} : memref<64x182xf32, #tpu.memory_space<vmem>>, vector<64x19xf32>,
    %32 = vector.broadcast %28 : vector<1x144xf32> to vector<64x144xf32>
    %33 = arith.mulf %25, %32 : vector<64x144xf32>
    %c0_39 = arith.constant 0 : index
    %c19_40 = arith.constant 19 : index
    %34 = vector.load %arg10[%c0_39, %c19_40] : memref<64x182xf32, #tpu.memory_space<vmem>>, vector<64x144xf32>
    tpu.vector_store %arg10[%c0_39, %c19_40], %33 {strides = array<i32>} : memref<64x182xf32, #tpu.memory_space<vmem>>, vector<64x144xf32>,
    %c0_41 = arith.constant 0 : index
    %c0_42 = arith.constant 0 : index
    %35 = vector.load %arg10[%c0_41, %c0_42] : memref<64x182xf32, #tpu.memory_space<vmem>>, vector<64x144xf32>
    %c0_43 = arith.constant 0 : index
    %c1_44 = arith.constant 1 : index
    %36 = vector.load %arg10[%c0_43, %c1_44] : memref<64x182xf32, #tpu.memory_space<vmem>>, vector<64x144xf32>
    %c0_45 = arith.constant 0 : index
    %c2_46 = arith.constant 2 : index
    %37 = vector.load %arg10[%c0_45, %c2_46] : memref<64x182xf32, #tpu.memory_space<vmem>>, vector<64x144xf32>
    %c0_47 = arith.constant 0 : index
    %c18_48 = arith.constant 18 : index
    %38 = vector.load %arg10[%c0_47, %c18_48] : memref<64x182xf32, #tpu.memory_space<vmem>>, vector<64x144xf32>
    %c0_49 = arith.constant 0 : index
    %c19_50 = arith.constant 19 : index
    %39 = vector.load %arg10[%c0_49, %c19_50] : memref<64x182xf32, #tpu.memory_space<vmem>>, vector<64x144xf32>
    %c0_51 = arith.constant 0 : index
    %c20_52 = arith.constant 20 : index
    %40 = vector.load %arg10[%c0_51, %c20_52] : memref<64x182xf32, #tpu.memory_space<vmem>>, vector<64x144xf32>
    %c0_53 = arith.constant 0 : index
    %c36_54 = arith.constant 36 : index
    %41 = vector.load %arg10[%c0_53, %c36_54] : memref<64x182xf32, #tpu.memory_space<vmem>>, vector<64x144xf32>
    %c0_55 = arith.constant 0 : index
    %c37_56 = arith.constant 37 : index
    %42 = vector.load %arg10[%c0_55, %c37_56] : memref<64x182xf32, #tpu.memory_space<vmem>>, vector<64x144xf32>
    %c0_57 = arith.constant 0 : index
    %c38_58 = arith.constant 38 : index
    %43 = vector.load %arg10[%c0_57, %c38_58] : memref<64x182xf32, #tpu.memory_space<vmem>>, vector<64x144xf32>
    %44 = tpu.concatenate %35, %36, %37, %38, %39, %40, %41, %42, %43 in 0 : vector<64x144xf32>, vector<64x144xf32>, vector<64x144xf32>, vector<64x144xf32>, vector<64x144xf32>, vector<64x144xf32>, vector<64x144xf32>, vector<64x144xf32>, vector<64x144xf32> -> vector<576x144xf32>
    %c0_59 = arith.constant 0 : index
    %c0_60 = arith.constant 0 : index
    %45 = vector.load %arg5[%c0_59, %c0_60] : memref<128x576xf32, #tpu.memory_space<vmem>>, vector<128x576xf32>
    %cst_61 = arith.constant dense<0.000000e+00> : vector<128x144xf32>
    %46 = tpu.matmul %45, %44, %cst_61 {dimension_numbers = #tpu.dot_dimension_numbers<[1], [0], [0], [1], [0, 0, 1, 1], [], []>} : vector<128x576xf32>, vector<576x144xf32>, vector<128x144xf32> -> vector<128x144xf32>
    %c0_62 = arith.constant 0 : index
    %c0_63 = arith.constant 0 : index
    %47 = vector.load %arg6[%c0_62, %c0_63] : memref<128x1xf32, #tpu.memory_space<vmem>>, vector<128x1xf32>
    %48 = vector.broadcast %47 : vector<128x1xf32> to vector<128x144xf32>
    %49 = arith.addf %46, %48 : vector<128x144xf32>
    %cst_64 = arith.constant 0.000000e+00 : f32
    %50 = vector.broadcast %cst_64 : f32 to vector<128x144xf32>
    %51 = arith.maximumf %49, %50 : vector<128x144xf32>
    %c0_65 = arith.constant 0 : index
    %c0_66 = arith.constant 0 : index
    %52 = vector.load %arg7[%c0_65, %c0_66] : memref<11x128xf32, #tpu.memory_space<vmem>>, vector<11x128xf32>
    %cst_67 = arith.constant dense<0.000000e+00> : vector<11x144xf32>
    %53 = tpu.matmul %52, %51, %cst_67 {dimension_numbers = #tpu.dot_dimension_numbers<[1], [0], [0], [1], [0, 0, 1, 1], [], []>} : vector<11x128xf32>, vector<128x144xf32>, vector<11x144xf32> -> vector<11x144xf32>
    %c0_68 = arith.constant 0 : index
    %c0_69 = arith.constant 0 : index
    %54 = vector.load %arg8[%c0_68, %c0_69] : memref<11x1xf32, #tpu.memory_space<vmem>>, vector<11x1xf32>
    %55 = vector.broadcast %54 : vector<11x1xf32> to vector<11x144xf32>
    %56 = arith.addf %53, %55 : vector<11x144xf32>
    %57 = vector.extract_strided_slice %27 {offsets = [0, 0], sizes = [1, 144], strides = [1, 1]} : vector<4x144xf32> to vector<1x144xf32>
    %58 = vector.extract_strided_slice %27 {offsets = [1, 0], sizes = [1, 144], strides = [1, 1]} : vector<4x144xf32> to vector<1x144xf32>
    %59 = vector.extract_strided_slice %27 {offsets = [2, 0], sizes = [1, 144], strides = [1, 1]} : vector<4x144xf32> to vector<1x144xf32>
    %60 = vector.extract_strided_slice %56 {offsets = [4, 0], sizes = [1, 144], strides = [1, 1]} : vector<11x144xf32> to vector<1x144xf32>
    %61 = vector.extract_strided_slice %56 {offsets = [5, 0], sizes = [1, 144], strides = [1, 1]} : vector<11x144xf32> to vector<1x144xf32>
    %62 = vector.extract_strided_slice %56 {offsets = [6, 0], sizes = [1, 144], strides = [1, 1]} : vector<11x144xf32> to vector<1x144xf32>
    %63 = vector.extract_strided_slice %56 {offsets = [7, 0], sizes = [1, 144], strides = [1, 1]} : vector<11x144xf32> to vector<1x144xf32>
    %64 = vector.extract_strided_slice %56 {offsets = [8, 0], sizes = [1, 144], strides = [1, 1]} : vector<11x144xf32> to vector<1x144xf32>
    %65 = vector.extract_strided_slice %56 {offsets = [9, 0], sizes = [1, 144], strides = [1, 1]} : vector<11x144xf32> to vector<1x144xf32>
    %66 = math.cos %59 : vector<1x144xf32>
    %67 = math.sin %59 : vector<1x144xf32>
    %68 = arith.mulf %60, %66 : vector<1x144xf32>
    %69 = arith.addf %57, %68 : vector<1x144xf32>
    %70 = arith.mulf %61, %67 : vector<1x144xf32>
    %71 = arith.subf %69, %70 : vector<1x144xf32>
    %72 = arith.mulf %60, %67 : vector<1x144xf32>
    %73 = arith.addf %58, %72 : vector<1x144xf32>
    %74 = arith.mulf %61, %66 : vector<1x144xf32>
    %75 = arith.addf %73, %74 : vector<1x144xf32>
    %76 = arith.mulf %62, %62 : vector<1x144xf32>
    %77 = arith.mulf %63, %63 : vector<1x144xf32>
    %78 = arith.addf %76, %77 : vector<1x144xf32>
    %cst_70 = arith.constant 9.99999993E-9 : f32
    %79 = vector.broadcast %cst_70 : f32 to vector<1x144xf32>
    %80 = arith.addf %78, %79 : vector<1x144xf32>
    %81 = math.rsqrt %80 : vector<1x144xf32>
    %82 = arith.mulf %62, %81 : vector<1x144xf32>
    %83 = arith.mulf %63, %81 : vector<1x144xf32>
    %84 = arith.mulf %66, %82 : vector<1x144xf32>
    %85 = arith.mulf %67, %83 : vector<1x144xf32>
    %86 = arith.subf %84, %85 : vector<1x144xf32>
    %87 = arith.mulf %67, %82 : vector<1x144xf32>
    %88 = arith.mulf %66, %83 : vector<1x144xf32>
    %89 = arith.addf %87, %88 : vector<1x144xf32>
    %cst_71 = arith.constant 5.000000e-01 : f32
    %90 = vector.broadcast %cst_71 : f32 to vector<1x144xf32>
    %91 = arith.mulf %90, %64 : vector<1x144xf32>
    %cst_72 = arith.constant 5.000000e-01 : f32
    %92 = vector.broadcast %cst_72 : f32 to vector<1x144xf32>
    %93 = arith.mulf %92, %65 : vector<1x144xf32>
    %cst_73 = arith.constant 1.000000e+00 : f32
    %94 = vector.broadcast %cst_73 : f32 to vector<1x144xf32>
    %95 = arith.mulf %94, %91 : vector<1x144xf32>
    %cst_74 = arith.constant 1.000000e+00 : f32
    %96 = vector.broadcast %cst_74 : f32 to vector<1x144xf32>
    %97 = arith.mulf %96, %93 : vector<1x144xf32>
    %98 = arith.mulf %95, %86 : vector<1x144xf32>
    %99 = arith.addf %71, %98 : vector<1x144xf32>
    %100 = arith.mulf %97, %89 : vector<1x144xf32>
    %101 = arith.subf %99, %100 : vector<1x144xf32>
    %102 = arith.mulf %95, %89 : vector<1x144xf32>
    %103 = arith.addf %75, %102 : vector<1x144xf32>
    %104 = arith.mulf %97, %86 : vector<1x144xf32>
    %105 = arith.addf %103, %104 : vector<1x144xf32>
    %cst_75 = arith.constant 1.000000e+00 : f32
    %106 = vector.broadcast %cst_75 : f32 to vector<1x144xf32>
    %107 = arith.mulf %106, %91 : vector<1x144xf32>
    %cst_76 = arith.constant -1.000000e+00 : f32
    %108 = vector.broadcast %cst_76 : f32 to vector<1x144xf32>
    %109 = arith.mulf %108, %93 : vector<1x144xf32>
    %110 = arith.mulf %107, %86 : vector<1x144xf32>
    %111 = arith.addf %71, %110 : vector<1x144xf32>
    %112 = arith.mulf %109, %89 : vector<1x144xf32>
    %113 = arith.subf %111, %112 : vector<1x144xf32>
    %114 = arith.mulf %107, %89 : vector<1x144xf32>
    %115 = arith.addf %75, %114 : vector<1x144xf32>
    %116 = arith.mulf %109, %86 : vector<1x144xf32>
    %117 = arith.addf %115, %116 : vector<1x144xf32>
    %cst_77 = arith.constant -1.000000e+00 : f32
    %118 = vector.broadcast %cst_77 : f32 to vector<1x144xf32>
    %119 = arith.mulf %118, %91 : vector<1x144xf32>
    %cst_78 = arith.constant -1.000000e+00 : f32
    %120 = vector.broadcast %cst_78 : f32 to vector<1x144xf32>
    %121 = arith.mulf %120, %93 : vector<1x144xf32>
    %122 = arith.mulf %119, %86 : vector<1x144xf32>
    %123 = arith.addf %71, %122 : vector<1x144xf32>
    %124 = arith.mulf %121, %89 : vector<1x144xf32>
    %125 = arith.subf %123, %124 : vector<1x144xf32>
    %126 = arith.mulf %119, %89 : vector<1x144xf32>
    %127 = arith.addf %75, %126 : vector<1x144xf32>
    %128 = arith.mulf %121, %86 : vector<1x144xf32>
    %129 = arith.addf %127, %128 : vector<1x144xf32>
    %cst_79 = arith.constant -1.000000e+00 : f32
    %130 = vector.broadcast %cst_79 : f32 to vector<1x144xf32>
    %131 = arith.mulf %130, %91 : vector<1x144xf32>
    %cst_80 = arith.constant 1.000000e+00 : f32
    %132 = vector.broadcast %cst_80 : f32 to vector<1x144xf32>
    %133 = arith.mulf %132, %93 : vector<1x144xf32>
    %134 = arith.mulf %131, %86 : vector<1x144xf32>
    %135 = arith.addf %71, %134 : vector<1x144xf32>
    %136 = arith.mulf %133, %89 : vector<1x144xf32>
    %137 = arith.subf %135, %136 : vector<1x144xf32>
    %138 = arith.mulf %131, %89 : vector<1x144xf32>
    %139 = arith.addf %75, %138 : vector<1x144xf32>
    %140 = arith.mulf %133, %86 : vector<1x144xf32>
    %141 = arith.addf %139, %140 : vector<1x144xf32>
    %142 = tpu.concatenate %101, %105, %113, %117, %125, %129, %137, %141 in 0 : vector<1x144xf32>, vector<1x144xf32>, vector<1x144xf32>, vector<1x144xf32>, vector<1x144xf32>, vector<1x144xf32>, vector<1x144xf32>, vector<1x144xf32> -> vector<8x144xf32>
    %143 = vector.extract_strided_slice %56 {offsets = [0, 0], sizes = [4, 144], strides = [1, 1]} : vector<11x144xf32> to vector<4x144xf32>
    %c0_81 = arith.constant 0 : index
    %c0_82 = arith.constant 0 : index
    %c0_83 = arith.constant 0 : index
    %c0_84 = arith.constant 0 : index
    %144 = vector.load %arg9[%c0_81, %c0_82, %c0_83, %c0_84] : memref<1x1x13x144xf32, #tpu.memory_space<vmem>>, vector<1x1x4x144xf32>
    %145 = vector.shape_cast %144 : vector<1x1x4x144xf32> to vector<4x144xf32>
    %146 = vector.shape_cast %143 : vector<4x144xf32> to vector<1x1x4x144xf32>
    tpu.vector_store %arg9[%c0_81, %c0_82, %c0_83, %c0_84], %146 {strides = array<i32>} : memref<1x1x13x144xf32, #tpu.memory_space<vmem>>, vector<1x1x4x144xf32>,
    %c0_85 = arith.constant 0 : index
    %c0_86 = arith.constant 0 : index
    %c4 = arith.constant 4 : index
    %c0_87 = arith.constant 0 : index
    %147 = vector.load %arg9[%c0_85, %c0_86, %c4, %c0_87] : memref<1x1x13x144xf32, #tpu.memory_space<vmem>>, vector<1x1x8x144xf32>
    %148 = vector.shape_cast %147 : vector<1x1x8x144xf32> to vector<8x144xf32>
    %149 = vector.shape_cast %142 : vector<8x144xf32> to vector<1x1x8x144xf32>
    tpu.vector_store %arg9[%c0_85, %c0_86, %c4, %c0_87], %149 {strides = array<i32>} : memref<1x1x13x144xf32, #tpu.memory_space<vmem>>, vector<1x1x8x144xf32>,
    %150 = vector.extract_strided_slice %56 {offsets = [10, 0], sizes = [1, 144], strides = [1, 1]} : vector<11x144xf32> to vector<1x144xf32>
    %c0_88 = arith.constant 0 : index
    %c0_89 = arith.constant 0 : index
    %c12 = arith.constant 12 : index
    %c0_90 = arith.constant 0 : index
    %151 = vector.load %arg9[%c0_88, %c0_89, %c12, %c0_90] : memref<1x1x13x144xf32, #tpu.memory_space<vmem>>, vector<1x1x1x144xf32>
    %152 = vector.shape_cast %151 : vector<1x1x1x144xf32> to vector<1x144xf32>
    %153 = vector.shape_cast %150 : vector<1x144xf32> to vector<1x1x1x144xf32>
    tpu.vector_store %arg9[%c0_88, %c0_89, %c12, %c0_90], %153 {strides = array<i32>} : memref<1x1x13x144xf32, #tpu.memory_space<vmem>>, vector<1x1x1x144xf32>,
    return
  }
  func.func @transform_0(%arg0: i32, %arg1: i32) -> (i32, i32, i32, i32) {
    %c0_i32 = arith.constant 0 : i32
    %c0_i32_0 = arith.constant 0 : i32
    %c0_i32_1 = arith.constant 0 : i32
    return %arg0, %arg1, %c0_i32, %c0_i32_0 : i32, i32, i32, i32
  }
  func.func @transform_1(%arg0: i32, %arg1: i32) -> (i32, i32) {
    %c0_i32 = arith.constant 0 : i32
    %c0_i32_0 = arith.constant 0 : i32
    %c0_i32_1 = arith.constant 0 : i32
    return %c0_i32, %c0_i32_0 : i32, i32
  }
  func.func @transform_2(%arg0: i32, %arg1: i32) -> (i32, i32) {
    %c0_i32 = arith.constant 0 : i32
    %c0_i32_0 = arith.constant 0 : i32
    %c0_i32_1 = arith.constant 0 : i32
    return %c0_i32, %c0_i32_0 : i32, i32
  }
  func.func @transform_3(%arg0: i32, %arg1: i32) -> (i32, i32) {
    %c0_i32 = arith.constant 0 : i32
    %c0_i32_0 = arith.constant 0 : i32
    %c0_i32_1 = arith.constant 0 : i32
    return %c0_i32, %c0_i32_0 : i32, i32
  }
  func.func @transform_4(%arg0: i32, %arg1: i32) -> (i32, i32) {
    %c0_i32 = arith.constant 0 : i32
    %c0_i32_0 = arith.constant 0 : i32
    %c0_i32_1 = arith.constant 0 : i32
    return %c0_i32, %c0_i32_0 : i32, i32
  }
  func.func @transform_5(%arg0: i32, %arg1: i32) -> (i32, i32) {
    %c0_i32 = arith.constant 0 : i32
    %c0_i32_0 = arith.constant 0 : i32
    %c0_i32_1 = arith.constant 0 : i32
    return %c0_i32, %c0_i32_0 : i32, i32
  }
  func.func @transform_6(%arg0: i32, %arg1: i32) -> (i32, i32) {
    %c0_i32 = arith.constant 0 : i32
    %c0_i32_0 = arith.constant 0 : i32
    %c0_i32_1 = arith.constant 0 : i32
    return %c0_i32, %c0_i32_0 : i32, i32
  }
  func.func @transform_7(%arg0: i32, %arg1: i32) -> (i32, i32, i32, i32) {
    %c0_i32 = arith.constant 0 : i32
    %c0_i32_0 = arith.constant 0 : i32
    %c0_i32_1 = arith.constant 0 : i32
    return %arg0, %arg1, %c0_i32, %c0_i32_0 : i32, i32, i32, i32
  }
}

</mosaic_0001>

<bundles_post_ra>
// kernel: lasernet_forward.1
= control target key start
LH: loop header
LB: loop body
LE: loop exit
PB: predicated region body
PF: predicated region fallthrough
CT: control target
= control target key end

     0   :  { %s3857_s24 = smov 0   ;;  %s3859_s25 = smov 0   ;;  %s4966_s0 = inlined_call_operand.vmem [shape: f32[2,2,12,182], index: 0, kind: input, shape index: {}]   ;;  %s4967_s1 = inlined_call_operand.vmem [shape: f32[64,72], index: 1, kind: input, shape index: {}]   ;;  %s4968_s2 = inlined_call_operand.vmem [shape: f32[64,1], index: 2, kind: input, shape index: {}]   ;;  %s4969_s3 = inlined_call_operand.vmem [shape: f32[128,576], index: 3, kind: input, shape index: {}]   ;;  %s4970_s4 = inlined_call_operand.vmem [shape: f32[128,1], index: 4, kind: input, shape index: {}]   ;;  %s4971_s5 = inlined_call_operand.vmem [shape: f32[11,128], index: 5, kind: input, shape index: {}]   ;;  %s4972_s6 = inlined_call_operand.vmem [shape: f32[11,1], index: 6, kind: input, shape index: {}]   ;;  %s4973_s7 = inlined_call_operand.vmem [shape: f32[2,2,13,144], index: 7, kind: output, shape index: {}]  }
   0x1   :  { %s3861_s26 = smov 0   ;;  %s3863_s27 = smov 0  }
   0x2   :  { %s3865_s28 = smov 0  }
   0x3 LB: > { %s26_s29 = sadd.s32 1, %s3789_s26  ;;  %s29_s30 = sadd.s32 1, %s3793_s27  ;;  %s3797_s28 = sphi %s3865_s28, %s17_s28   ;;  %s3793_s27 = sphi %s3863_s27, %s4981_s27   ;;  %s3789_s26 = sphi %s3861_s26, %s4980_s26   ;;  %s3785_s25 = sphi %s3859_s25, %s4979_s25   ;;  %s3781_s24 = sphi %s3857_s24, %s4978_s24  }
   0x4   : > { %p27_p0 = scmp.ge.s32.totalorder %s26_s29, 2  ;;  %p2984_p1 = scmp.ge.s32.totalorder %s3797_s28, 1 }
   0x5   : > { %p257_p2 = scmp.lt.s32.totalorder %s3797_s28, 5 }
   0x6   : > { %s4983_s29 = smov (%p27_p0, %s26_s29), 0  ;;  %s4985_s30 = smov (!%p27_p0, %s29_s30), %s3793_s27 }
   0x7   : > { %p258_p3 = pnand %p2984_p1, %p257_p2  ;;  %p31_p4 = scmp.ge.s32.totalorder %s4985_s30, 2 }
   0x8   : > { %p297_p5 = scmp.lt.s32.totalorder (!%p258_p3), %s3785_s25, 1  ;;  %p299_p6 = scmp.lt.s32.totalorder (!%p258_p3), %s3781_s24, 1  ;;  %v3805_v3 = vmov (!%p258_p3), 0.0   ;;  %v391_v4 = vld [vmem:[%s4968_s2] sm:$0xff] (!%p258_p3)  ;;  %v613_v5 = vlaneseq (!%p258_p3)  ;;  %v3808_v6 = vmov (!%p258_p3), 0   ;;  %v392_v7 = vld [vmem:[%s4968_s2 + $0x8] sm:$0xff] (!%p258_p3) }
   0x9   : > { %s4987_s30 = smov (%p31_p4, %s4985_s30), 0  ;;  %261 = sbr.rel (%p258_p3) target bundleno = 1811 (0x713), region = 48 }
   0xa   : > { %s3799_s15 = smov (!%p258_p3), 127   ;;  %s3800_s16 = smov (!%p258_p3), 110   ;;  %528 = vmatprep.mubr.f32.mxu0 (!%p258_p3), %v3805_v3  ;;  %3423 = vset.pattern.permute.xlu1 (!%p258_p3), %v3808_v6  ;;  %v3920_v8 = vshrl.u32 (!%p258_p3), %v613_v5, 7  ;;  %v393_v9 = vld [vmem:[%s4968_s2 + $0x10] sm:$0xff] (!%p258_p3)  ;;  %v395_v10 = vld [vmem:[%s4968_s2 + $0x20] sm:$0xff] (!%p258_p3)  ;;  %v394_v14 = vld [vmem:[%s4968_s2 + $0x18] sm:$0xff] (!%p258_p3) }
   0xb   : > { %s3801_s17 = smov (!%p258_p3), 126   ;;  %s3802_s18 = smov (!%p258_p3), 109   ;;  %3424 = vset.pattern.permute.xlu0 (!%p258_p3), %v3808_v6  ;;  %v396_v15 = vld [vmem:[%s4968_s2 + $0x28] sm:$0xff] (!%p258_p3)  ;;  %v397_v17 = vld [vmem:[%s4968_s2 + $0x30] sm:$0xff] (!%p258_p3)  ;;  %v398_v19 = vld [vmem:[%s4968_s2 + $0x38] sm:$0xff] (!%p258_p3)  ;;  %vm323_vm0 = vcmask (!%p258_p3), 1039360  }
   0xc   : > { %s3803_s19 = smov (!%p258_p3), 108   ;;  %s3804_s20 = smov (!%p258_p3), 92   ;;  %v615_v12 = vsub.s32 (!%p258_p3), 3, %v3920_v8  ;;  %vm339_vm1 = vcmask (!%p258_p3), 900096   ;;  %vm331_vm2 = vcmask (!%p258_p3), 1031168   ;;  %vm347_vm3 = vcmask (!%p258_p3), 891904  }
   0xd   : > { %s3806_s21 = smov (!%p258_p3), 91   ;;  %s3807_s22 = smov (!%p258_p3), 90   ;;  %vm355_vm4 = vcmask (!%p258_p3), 883712   ;;  %vm363_vm5 = vcmask (!%p258_p3), 752640   ;;  %vm371_vm6 = vcmask (!%p258_p3), 744448   ;;  %vm379_vm7 = vcmask (!%p258_p3), 736256  }
   0xe   : > { %v383_v59 = vld [vmem:[%s4967_s1] sm:$0xff] (!%p258_p3)  ;;  %vm439_vm8 = vcmask (!%p258_p3), 588800   ;;  %v384_v60 = vld [vmem:[%s4967_s1 + $0x8] sm:$0xff] (!%p258_p3)  ;;  %v385_v61 = vld [vmem:[%s4967_s1 + $0x10] sm:$0xff] (!%p258_p3)  ;;  %vm595_vm9 = vcmask (!%p258_p3), 154624   ;;  %vm604_vm10 = vcmask (!%p258_p3), 441624  }
   0xf   : > { %v386_v62 = vld [vmem:[%s4967_s1 + $0x18] sm:$0xff] (!%p258_p3)  ;;  %v387_v63 = vld [vmem:[%s4967_s1 + $0x20] sm:$0xff] (!%p258_p3)  ;;  %596 = vst.msk [vmem:[#allocation2] sm:$0xff] (!%p258_p3), %vm595_vm9, %v3805_v3  ;;  %597 = vst.msk [vmem:[#allocation2 + $0x10] sm:$0xff] (!%p258_p3), %vm595_vm9, %v3805_v3  ;;  %vm718_vm11 = vcmask (!%p258_p3), 1047704   ;;  %vm720_vm12 = vcmask (!%p258_p3), 285696  }
  0x10   : > { %s4989_s25 = smov (!%p297_p5, %s3785_s25), 1  ;;  %s4991_s24 = smov (!%p299_p6, %s3781_s24), 1  ;;  %598 = vst.msk [vmem:[#allocation2 + $0x20] sm:$0xff] %vm595_vm9, %v3805_v3  ;;  %599 = vst.msk [vmem:[#allocation2 + $0x30] sm:$0xff] %vm595_vm9, %v3805_v3  ;;  %vm1392_vm13 = vcmask 523264  }
  0x11   : > { %s2986_s8 = sshll.u32 %s4989_s25, 3  ;;  %s2985_s9 = sshll.u32 %s4991_s24, 2  ;;  %600 = vst.msk [vmem:[#allocation2 + $0x40] sm:$0xff] %vm595_vm9, %v3805_v3  ;;  %601 = vst.msk [vmem:[#allocation2 + $0x50] sm:$0xff] %vm595_vm9, %v3805_v3 }
  0x12   : > { %s3887_s10 = sadd.s32 %s2986_s8, %s2985_s9  ;;  %602 = vst.msk [vmem:[#allocation2 + $0x60] sm:$0xff] %vm595_vm9, %v3805_v3  ;;  %603 = vst.msk [vmem:[#allocation2 + $0x70] sm:$0xff] %vm595_vm9, %v3805_v3  ;;  %s3809_s9 = smov 19  }
  0x13   : > { %s2987_s11 = sshll.u32 %s3887_s10, 3  ;;  %605 = vst.msk [vmem:[#allocation2 + $0x8] sm:$0xff] %vm604_vm10, %v3805_v3  ;;  %606 = vst.msk [vmem:[#allocation2 + $0x18] sm:$0xff] %vm604_vm10, %v3805_v3 }
  0x14   : > { %s3895_s14 = scalar_lea.vmem %s4966_s0, %s2987_s11  ;;  %607 = vst.msk [vmem:[#allocation2 + $0x28] sm:$0xff] %vm604_vm10, %v3805_v3  ;;  %608 = vst.msk [vmem:[#allocation2 + $0x38] sm:$0xff] %vm604_vm10, %v3805_v3 }
  0x15   : > { %v3898_v0 = vld [vmem:[%s3895_s14] sm:$0xff]  ;;  %v316_v1 = vld [vmem:[%s3895_s14 + $0x8] sm:$0xff]  ;;  %v593_v11 = vld [vmem:[%s3895_s14 + $0x10] sm:$0xf]  ;;  %609 = vst.msk [vmem:[#allocation2 + $0x48] sm:$0xff] %vm604_vm10, %v3805_v3 }
  0x16   : > { %v3388_v2 = vpack.i.bf16 %v316_v1, %v3898_v0  ;;  %v616_v13 = vrot.slane %v593_v11, %v615_v12  ;;  %v594_v16 = vld [vmem:[%s3895_s14 + $0x18] sm:$0xf]  ;;  %610 = vst.msk [vmem:[#allocation2 + $0x58] sm:$0xff] %vm604_vm10, %v3805_v3  ;;  %611 = vst.msk [vmem:[#allocation2 + $0x68] sm:$0xff] %vm604_vm10, %v3805_v3 }
  0x17   : > { %v620_v18 = vrot.slane %v594_v16, %v615_v12  ;;  %612 = vst.msk [vmem:[#allocation2 + $0x78] sm:$0xff] %vm604_vm10, %v3805_v3 }
  0x18   : > { %3389 = vrot.lane.b32.xlu0 %v3388_v2, %s3799_s15  ;;  %3399 = vrot.lane.b32.xlu1 %v3388_v2, %s3800_s16 }
  0x1c   : > { %3394 = vrot.lane.b32.xlu0 %v3388_v2, %s3801_s17  ;;  %3404 = vrot.lane.b32.xlu1 %v3388_v2, %s3802_s18 }
  0x20   : > { %3409 = vrot.lane.b32.xlu0 %v3388_v2, %s3803_s19  ;;  %3414 = vrot.lane.b32.xlu1 %v3388_v2, %s3804_s20 }
  0x24   : > { %3419 = vrot.lane.b32.xlu0 %v3388_v2, %s3806_s21  ;;  %375 = vrot.lane.b32.xlu1 %v3898_v0, %s3807_s22  ;;  %v390_v2 = vld [vmem:[%s4967_s1 + $0x38] sm:$0xff] }
  0x28   : > { %377 = vrot.lane.b32.xlu0 %v316_v1, %s3807_s22  ;;  %401 = vperm.xlu1 %3423, %v391_v4  }
  0x2c   : > { %406 = vperm.xlu0 %3424, %v392_v7   ;;  %411 = vperm.xlu1 %3423, %v393_v9  }
  0x30   : > { %421 = vperm.xlu0 %3424, %v395_v10   ;;  %416 = vperm.xlu1 %3423, %v394_v14  }
  0x34   : > { %623 = vrot.lane.b32.xlu0 %v616_v13, %s3802_s18  ;;  %426 = vperm.xlu1 %3423, %v396_v15  }
  0x38   : > { %431 = vperm.xlu0 %3424, %v397_v17   ;;  %625 = vrot.lane.b32.xlu1 %v620_v18, %s3802_s18 }
  0x3c   : > { %436 = vperm.xlu1 %3423, %v398_v19  }
  0x8a   : > { %v3390_v20 = vpop.permute.xlu0 %3389  ;;  %v3400_v21 = vpop.permute.xlu1 %3399 }
  0x8b   : > { %v3391_v22 = vunpack.i.l.bf16 %v3390_v20  ;;  %v3402_v23 = vunpack.i.h.bf16 %v3400_v21  ;;  %v3401_v24 = vunpack.i.l.bf16 %v3400_v21  ;;  %v3392_v25 = vunpack.i.h.bf16 %v3390_v20 }
  0x8d   : > { %v3034_v26 = vpack.c.bf16 %v3392_v25, %v316_v1  ;;  %v324_v27 = vsel %vm323_vm0, %v3391_v22, %v3392_v25  ;;  %v340_v31 = vsel %vm339_vm1, %v3401_v24, %v3402_v23  ;;  %v389_v1 = vld [vmem:[%s4967_s1 + $0x30] sm:$0xff] }
  0x8e   : > { %v3395_v28 = vpop.permute.xlu0 %3394  ;;  %v3036_v29 = vpack.c.bf16 %v324_v27, %v3898_v0  ;;  %v3405_v30 = vpop.permute.xlu1 %3404  ;;  %v388_v0 = vld [vmem:[%s4967_s1 + $0x28] sm:$0xff] }
  0x8f   : > { %v3397_v32 = vunpack.i.h.bf16 %v3395_v28  ;;  %v3396_v33 = vunpack.i.l.bf16 %v3395_v28  ;;  %3035 = vmatprep.subr.bf16.mxu0 %v3034_v26  ;;  %v3407_v34 = vunpack.i.h.bf16 %v3405_v30  ;;  %v3406_v35 = vunpack.i.l.bf16 %v3405_v30 }
  0x90   : > { %3037 = vmatpush1.bf16.msra.mxu0 %v3036_v29 }
  0x91   : > { %v3038_v36 = vpack.c.bf16 %v3402_v23, %v3397_v32  ;;  %v332_v37 = vsel %vm331_vm2, %v3396_v33, %v3397_v32  ;;  %v348_v41 = vsel %vm347_vm3, %v3406_v35, %v3407_v34 }
  0x92   : > { %v3410_v38 = vpop.permute.xlu0 %3409  ;;  %v3040_v39 = vpack.c.bf16 %v340_v31, %v332_v37  ;;  %v3415_v40 = vpop.permute.xlu1 %3414 }
  0x93   : > { %v3412_v42 = vunpack.i.h.bf16 %v3410_v38  ;;  %v3411_v43 = vunpack.i.l.bf16 %v3410_v38  ;;  %3039 = vmatprep.subr.bf16.mxu0 %v3038_v36  ;;  %v3417_v44 = vunpack.i.h.bf16 %v3415_v40  ;;  %v3416_v45 = vunpack.i.l.bf16 %v3415_v40 }
  0x94   : > { %3041 = vmatpush1.bf16.msra.mxu0 %v3040_v39 }
  0x95   : > { %v3042_v46 = vpack.c.bf16 %v3412_v42, %v3407_v34  ;;  %v356_v47 = vsel %vm355_vm4, %v3411_v43, %v3412_v42  ;;  %v364_v52 = vsel %vm363_vm5, %v3416_v45, %v3417_v44 }
  0x96   : > { %v3420_v48 = vpop.permute.xlu0 %3419  ;;  %v3044_v49 = vpack.c.bf16 %v356_v47, %v348_v41  ;;  %v376_v56 = vpop.permute.xlu1 %375 }
  0x97   : > { %v3422_v50 = vunpack.i.h.bf16 %v3420_v48  ;;  %v3421_v51 = vunpack.i.l.bf16 %v3420_v48  ;;  %3043 = vmatprep.subr.bf16.mxu0 %v3042_v46 }
  0x98   : > { %3045 = vmatpush1.bf16.msra.mxu0 %v3044_v49 }
  0x99   : > { %v3046_v53 = vpack.c.bf16 %v3422_v50, %v3417_v44  ;;  %v372_v54 = vsel %vm371_vm6, %v3421_v51, %v3422_v50 }
  0x9a   : > { %v3048_v55 = vpack.c.bf16 %v372_v54, %v364_v52  ;;  %v378_v57 = vpop.permute.xlu0 %377 }
  0x9b   : > { %3047 = vmatprep.subr.bf16.mxu0 %v3046_v53  ;;  %v380_v58 = vsel %vm379_vm7, %v376_v56, %v378_v57 }
  0x9c   : > { %3049 = vmatpush1.bf16.msra.mxu0 %v3048_v55 }
  0x9d   : > { %480 = vmatprep.subr.mxu0 %v378_v57 }
  0xa0   : > { %481 = vmatpush1.msra.mxu0 %v380_v58 }
  0xa1   : > { %2991 = vmatmul.mubr.msk.f32.vlgmr.msra.gmra.mrb[0].mxu0 %vm439_vm8, %v383_v59 }
  0xa2   : > { %534 = vmatprep.mubr.f32.mxu0 %v3805_v3 }
  0xa5   : > { %2992 = vmatmul.mubr.msk.f32.gmra.mrb[2].mxu0 %vm439_vm8, %v384_v60 }
  0xa6   : > { %540 = vmatprep.mubr.f32.mxu0 %v3805_v3 }
  0xa7   : > { %v402_v4 = vpop.permute.xlu1 %401 }
  0xa9   : > { %2993 = vmatmul.mubr.msk.f32.gmra.mrb[4].mxu0 %vm439_vm8, %v385_v61 }
  0xaa   : > { %546 = vmatprep.mubr.f32.mxu0 %v3805_v3 }
  0xab   : > { %v412_v6 = vpop.permute.xlu1 %411  ;;  %v407_v7 = vpop.permute.xlu0 %406 }
  0xad   : > { %2994 = vmatmul.mubr.msk.f32.gmra.mrb[6].mxu0 %vm439_vm8, %v386_v62 }
  0xae   : > { %552 = vmatprep.mubr.f32.mxu0 %v3805_v3 }
  0xaf   : > { %v417_v9 = vpop.permute.xlu1 %416  ;;  %v422_v10 = vpop.permute.xlu0 %421 }
  0xb1   : > { %2995 = vmatmul.mubr.msk.f32.gmra.mrb[8].mxu0 %vm439_vm8, %v387_v63 }
  0xb2   : > { %558 = vmatprep.mubr.f32.mxu0 %v3805_v3 }
  0xb3   : > { %v4009_v11 = vpop.permute.xlu1 %426  ;;  %v624_v12 = vpop.permute.xlu0 %623 }
  0xb5   : > { %2996 = vmatmul.mubr.msk.f32.gmra.mrb[10].mxu0 %vm439_vm8, %v388_v0 }
  0xb6   : > { %564 = vmatprep.mubr.f32.mxu0 %v3805_v3 }
  0xb7   : > { %v4019_v14 = vpop.permute.xlu1 %625  ;;  %v432_v60 = vpop.permute.xlu0 %431 }
  0xb8   : > { %v4023_v17 = vsel %vm347_vm3, %v624_v12, %v4019_v14 }
  0xb9   : > { %2997 = vmatmul.mubr.msk.f32.gmra.mrb[12].mxu0 %vm439_vm8, %v389_v1 }
  0xba   : > { %570 = vmatprep.mubr.f32.mxu0 %v3805_v3 }
  0xbd   : > { %2998 = vmatmul.mubr.msk.f32.gmra.mrb[14].mxu0 %vm439_vm8, %v390_v2 }
 0x174   : > { %v530_v13 = vpop.f32.mrb[0].mxu0 }
 0x175   : > { %v531_v15 = vadd.f32 %v530_v13, %v402_v4  ;;  %v532_v16 = vpop.f32.mrb[1].mxu0 }
 0x176   : > { %v533_v18 = vadd.f32 %v532_v16, %v402_v4 }
 0x177   : > { %v577_v19 = vmax.f32 %v531_v15, 0.0 }
 0x178   : > { %v578_v20 = vmax.f32 %v533_v18, 0.0  ;;  %v536_v21 = vpop.f32.mrb[2].mxu0 }
 0x179   : > { %v630_v22 = vmul.f32 %v4023_v17, %v577_v19  ;;  %v537_v23 = vadd.f32 %v536_v21, %v407_v7  ;;  %v538_v24 = vpop.f32.mrb[3].mxu0 }
 0x17a   : > { %v631_v25 = vmul.f32 %v4019_v14, %v578_v20  ;;  %v539_v26 = vadd.f32 %v538_v24, %v407_v7  ;;  %v437_v7 = vpop.permute.xlu1 %436 }
 0x17b   : > { %v579_v27 = vmax.f32 %v537_v23, 0.0  ;;  %662 = vrot.lane.b32.xlu0 %v630_v22, %s3809_s9 }
 0x17c   : > { %v580_v28 = vmax.f32 %v539_v26, 0.0  ;;  %v542_v29 = vpop.f32.mrb[4].mxu0  ;;  %664 = vrot.lane.b32.xlu1 %v631_v25, %s3809_s9 }
 0x17d   : > { %v632_v30 = vmul.f32 %v4023_v17, %v579_v27  ;;  %v543_v31 = vadd.f32 %v542_v29, %v412_v6  ;;  %v544_v32 = vpop.f32.mrb[5].mxu0 }
 0x17e   : > { %v633_v33 = vmul.f32 %v4019_v14, %v580_v28  ;;  %v545_v34 = vadd.f32 %v544_v32, %v412_v6 }
 0x17f   : > { %v581_v35 = vmax.f32 %v543_v31, 0.0  ;;  %666 = vrot.lane.b32.xlu0 %v632_v30, %s3809_s9 }
 0x180   : > { %v582_v36 = vmax.f32 %v545_v34, 0.0  ;;  %v548_v37 = vpop.f32.mrb[6].mxu0  ;;  %668 = vrot.lane.b32.xlu1 %v633_v33, %s3809_s9 }
 0x181   : > { %v634_v38 = vmul.f32 %v4023_v17, %v581_v35  ;;  %v549_v39 = vadd.f32 %v548_v37, %v417_v9  ;;  %v550_v40 = vpop.f32.mrb[7].mxu0 }
 0x182   : > { %v635_v41 = vmul.f32 %v4019_v14, %v582_v36  ;;  %v551_v42 = vadd.f32 %v550_v40, %v417_v9 }
 0x183   : > { %v583_v43 = vmax.f32 %v549_v39, 0.0  ;;  %670 = vrot.lane.b32.xlu0 %v634_v38, %s3809_s9 }
 0x184   : > { %v584_v44 = vmax.f32 %v551_v42, 0.0  ;;  %v554_v45 = vpop.f32.mrb[8].mxu0  ;;  %672 = vrot.lane.b32.xlu1 %v635_v41, %s3809_s9 }
 0x185   : > { %v636_v46 = vmul.f32 %v4023_v17, %v583_v43  ;;  %v555_v47 = vadd.f32 %v554_v45, %v422_v10  ;;  %v556_v48 = vpop.f32.mrb[9].mxu0 }
 0x186   : > { %v637_v49 = vmul.f32 %v4019_v14, %v584_v44  ;;  %v557_v50 = vadd.f32 %v556_v48, %v422_v10 }
 0x187   : > { %v585_v51 = vmax.f32 %v555_v47, 0.0  ;;  %674 = vrot.lane.b32.xlu0 %v636_v46, %s3809_s9 }
 0x188   : > { %v586_v52 = vmax.f32 %v557_v50, 0.0  ;;  %v560_v53 = vpop.f32.mrb[10].mxu0  ;;  %676 = vrot.lane.b32.xlu1 %v637_v49, %s3809_s9 }
 0x189   : > { %v638_v54 = vmul.f32 %v4023_v17, %v585_v51  ;;  %v561_v55 = vadd.f32 %v560_v53, %v4009_v11  ;;  %v562_v56 = vpop.f32.mrb[11].mxu0 }
 0x18a   : > { %v639_v57 = vmul.f32 %v4019_v14, %v586_v52  ;;  %v563_v58 = vadd.f32 %v562_v56, %v4009_v11 }
 0x18b   : > { %v587_v59 = vmax.f32 %v561_v55, 0.0  ;;  %678 = vrot.lane.b32.xlu0 %v638_v54, %s3809_s9 }
 0x18c   : > { %v588_v61 = vmax.f32 %v563_v58, 0.0  ;;  %v566_v62 = vpop.f32.mrb[12].mxu0  ;;  %680 = vrot.lane.b32.xlu1 %v639_v57, %s3809_s9 }
 0x18d   : > { %v640_v63 = vmul.f32 %v4023_v17, %v587_v59  ;;  %v567_v0 = vadd.f32 %v566_v62, %v432_v60  ;;  %v568_v1 = vpop.f32.mrb[13].mxu0 }
 0x18e   : > { %v641_v2 = vmul.f32 %v4019_v14, %v588_v61  ;;  %v569_v4 = vadd.f32 %v568_v1, %v432_v60 }
 0x18f   : > { %v589_v6 = vmax.f32 %v567_v0, 0.0  ;;  %682 = vrot.lane.b32.xlu0 %v640_v63, %s3809_s9 }
 0x190   : > { %v590_v9 = vmax.f32 %v569_v4, 0.0  ;;  %v572_v10 = vpop.f32.mrb[14].mxu0  ;;  %684 = vrot.lane.b32.xlu1 %v641_v2, %s3809_s9 }
 0x191   : > { %v642_v11 = vmul.f32 %v4023_v17, %v589_v6  ;;  %v573_v12 = vadd.f32 %v572_v10, %v437_v7  ;;  %v574_v13 = vpop.f32.mrb[15].mxu0 }
 0x192   : > { %v643_v15 = vmul.f32 %v4019_v14, %v590_v9  ;;  %v575_v16 = vadd.f32 %v574_v13, %v437_v7 }
 0x193   : > { %v591_v18 = vmax.f32 %v573_v12, 0.0  ;;  %686 = vrot.lane.b32.xlu0 %v642_v11, %s3809_s9 }
 0x194   : > { %v592_v19 = vmax.f32 %v575_v16, 0.0  ;;  %688 = vrot.lane.b32.xlu1 %v643_v15, %s3809_s9  ;;  %v1219_v16 = vld [vmem:[%s4969_s3 + $0x18] sm:$0xff] }
 0x195   : > { %v644_v20 = vmul.f32 %v4023_v17, %v591_v18  ;;  %1666 = vmatprep.mubr.f32.mxu1 %v1219_v16 }
 0x196   : > { %v645_v21 = vmul.f32 %v4019_v14, %v592_v19 }
 0x197   : > { %690 = vrot.lane.b32.xlu0 %v644_v20, %s3809_s9 }
 0x198   : > { %692 = vrot.lane.b32.xlu1 %v645_v21, %s3809_s9 }
 0x1ed   : > { %v663_v22 = vpop.permute.xlu0 %662 }
 0x1ee   : > { %719 = vst.msk [vmem:[#allocation2] sm:$0xff] %vm718_vm11, %v663_v22  ;;  %v665_v23 = vpop.permute.xlu1 %664 }
 0x1ef   : > { %v694_v24 = vsel %vm595_vm9, %v663_v22, %v665_v23 }
 0x1f0   : > { %721 = vst.msk [vmem:[#allocation2 + $0x8] sm:$0xff] %vm720_vm12, %v694_v24 }
 0x1f1   : > { %v667_v25 = vpop.permute.xlu0 %666 }
 0x1f2   : > { %722 = vst.msk [vmem:[#allocation2 + $0x10] sm:$0xff] %vm718_vm11, %v667_v25  ;;  %v669_v17 = vpop.permute.xlu1 %668 }
 0x1f3   : > { %v695_v14 = vsel %vm595_vm9, %v667_v25, %v669_v17 }
 0x1f4   : > { %723 = vst.msk [vmem:[#allocation2 + $0x18] sm:$0xff] %vm720_vm12, %v695_v14 }
 0x1f5   : > { %v671_v26 = vpop.permute.xlu0 %670  ;;  %v736_v29 = vld [vmem:[#allocation2] sm:$0xff] }
 0x1f6   : > { %724 = vst.msk [vmem:[#allocation2 + $0x20] sm:$0xff] %vm718_vm11, %v671_v26  ;;  %v673_v27 = vpop.permute.xlu1 %672 }
 0x1f7   : > { %v696_v28 = vsel %vm595_vm9, %v671_v26, %v673_v27  ;;  %v737_v30 = vld [vmem:[#allocation2 + $0x8] sm:$0xff] }
 0x1f8   : > { %725 = vst.msk [vmem:[#allocation2 + $0x28] sm:$0xff] %vm720_vm12, %v696_v28  ;;  %v4068_v31 = vpack.i.bf16 %v737_v30, %v736_v29 }
 0x1f9   : > { %v675_v32 = vpop.permute.xlu0 %674  ;;  %v738_v34 = vld [vmem:[#allocation2 + $0x10] sm:$0xff] }
 0x1fa   : > { %726 = vst.msk [vmem:[#allocation2 + $0x30] sm:$0xff] %vm718_vm11, %v675_v32  ;;  %v677_v33 = vpop.permute.xlu1 %676  ;;  %3426 = vrot.lane.b32.xlu0 %v4068_v31, %s3802_s18  ;;  %v3052_v40 = vpack.c.bf16 %v738_v34, %v736_v29 }
 0x1fb   : > { %v697_v35 = vsel %vm595_vm9, %v675_v32, %v677_v33  ;;  %v739_v36 = vld [vmem:[#allocation2 + $0x18] sm:$0xff] }
 0x1fc   : > { %727 = vst.msk [vmem:[#allocation2 + $0x38] sm:$0xff] %vm720_vm12, %v697_v35  ;;  %v4075_v37 = vpack.i.bf16 %v739_v36, %v738_v34  ;;  %v3050_v38 = vpack.c.bf16 %v739_v36, %v737_v30 }
 0x1fd   : > { %v679_v39 = vpop.permute.xlu0 %678  ;;  %v740_v43 = vld [vmem:[#allocation2 + $0x20] sm:$0xff] }
 0x1fe   : > { %728 = vst.msk [vmem:[#allocation2 + $0x40] sm:$0xff] %vm718_vm11, %v679_v39  ;;  %v681_v41 = vpop.permute.xlu1 %680  ;;  %3431 = vrot.lane.b32.xlu1 %v4075_v37, %s3802_s18  ;;  %3051 = vmatprep.subr.bf16.mxu0 %v3050_v38 }
 0x1ff   : > { %v698_v42 = vsel %vm595_vm9, %v679_v39, %v681_v41  ;;  %3053 = vmatpush1.bf16.msra.mxu0 %v3052_v40  ;;  %v741_v44 = vld [vmem:[#allocation2 + $0x28] sm:$0xff] }
 0x200   : > { %729 = vst.msk [vmem:[#allocation2 + $0x48] sm:$0xff] %vm720_vm12, %v698_v42  ;;  %v4082_v45 = vpack.i.bf16 %v741_v44, %v740_v43 }
 0x201   : > { %v683_v46 = vpop.permute.xlu0 %682  ;;  %v742_v48 = vld [vmem:[#allocation2 + $0x30] sm:$0xff] }
 0x202   : > { %730 = vst.msk [vmem:[#allocation2 + $0x50] sm:$0xff] %vm718_vm11, %v683_v46  ;;  %v685_v47 = vpop.permute.xlu1 %684  ;;  %3436 = vrot.lane.b32.xlu0 %v4082_v45, %s3802_s18  ;;  %v3056_v54 = vpack.c.bf16 %v742_v48, %v740_v43 }
 0x203   : > { %v699_v49 = vsel %vm595_vm9, %v683_v46, %v685_v47  ;;  %v743_v50 = vld [vmem:[#allocation2 + $0x38] sm:$0xff] }
 0x204   : > { %731 = vst.msk [vmem:[#allocation2 + $0x58] sm:$0xff] %vm720_vm12, %v699_v49  ;;  %v4089_v51 = vpack.i.bf16 %v743_v50, %v742_v48  ;;  %v3054_v52 = vpack.c.bf16 %v743_v50, %v741_v44  ;;  %v1296_v44 = vld [vmem:[%s4970_s4] sm:$0xff] }
 0x205   : > { %v687_v53 = vpop.permute.xlu0 %686  ;;  %v744_v57 = vld [vmem:[#allocation2 + $0x40] sm:$0xff] }
 0x206   : > { %732 = vst.msk [vmem:[#allocation2 + $0x60] sm:$0xff] %vm718_vm11, %v687_v53  ;;  %v689_v55 = vpop.permute.xlu1 %688  ;;  %3441 = vrot.lane.b32.xlu1 %v4089_v51, %s3802_s18  ;;  %3055 = vmatprep.subr.bf16.mxu0 %v3054_v52  ;;  %v1297_v52 = vld [vmem:[%s4970_s4 + $0x8] sm:$0xff] }
 0x207   : > { %v700_v56 = vsel %vm595_vm9, %v687_v53, %v689_v55  ;;  %3057 = vmatpush1.bf16.msra.mxu0 %v3056_v54  ;;  %v745_v58 = vld [vmem:[#allocation2 + $0x48] sm:$0xff] }
 0x208   : > { %733 = vst.msk [vmem:[#allocation2 + $0x68] sm:$0xff] %vm720_vm12, %v700_v56  ;;  %v4096_v59 = vpack.i.bf16 %v745_v58, %v744_v57 }
 0x209   : > { %v691_v60 = vpop.permute.xlu0 %690  ;;  %v746_v62 = vld [vmem:[#allocation2 + $0x50] sm:$0xff] }
 0x20a   : > { %734 = vst.msk [vmem:[#allocation2 + $0x70] sm:$0xff] %vm718_vm11, %v691_v60  ;;  %v693_v61 = vpop.permute.xlu1 %692  ;;  %3446 = vrot.lane.b32.xlu0 %v4096_v59, %s3802_s18  ;;  %v3060_v4 = vpack.c.bf16 %v746_v62, %v744_v57 }
 0x20b   : > { %v701_v63 = vsel %vm595_vm9, %v691_v60, %v693_v61  ;;  %v747_v0 = vld [vmem:[#allocation2 + $0x58] sm:$0xff]  ;;  %v1300_v61 = vld [vmem:[%s4970_s4 + $0x20] sm:$0xff] }
 0x20c   : > { %735 = vst.msk [vmem:[#allocation2 + $0x78] sm:$0xff] %vm720_vm12, %v701_v63  ;;  %v4103_v1 = vpack.i.bf16 %v747_v0, %v746_v62  ;;  %v3058_v2 = vpack.c.bf16 %v747_v0, %v745_v58  ;;  %v1299_v62 = vld [vmem:[%s4970_s4 + $0x18] sm:$0xff] }
 0x20d   : > { %v748_v6 = vld [vmem:[#allocation2 + $0x60] sm:$0xff] }
 0x20e   : > { %3451 = vrot.lane.b32.xlu1 %v4103_v1, %s3802_s18  ;;  %3059 = vmatprep.subr.bf16.mxu0 %v3058_v2 }
 0x20f   : > { %3061 = vmatpush1.bf16.msra.mxu0 %v3060_v4  ;;  %v749_v7 = vld [vmem:[#allocation2 + $0x68] sm:$0xff] }
 0x210   : > { %v4107_v9 = vpack.i.bf16 %v749_v7, %v748_v6 }
 0x211   : > { %v750_v10 = vld [vmem:[#allocation2 + $0x70] sm:$0xff] }
 0x212   : > { %3456 = vrot.lane.b32.xlu0 %v4107_v9, %s3802_s18  ;;  %v3064_v15 = vpack.c.bf16 %v750_v10, %v748_v6 }
 0x213   : > { %v751_v11 = vld [vmem:[#allocation2 + $0x78] sm:$0xff] }
 0x214   : > { %v4111_v12 = vpack.i.bf16 %v751_v11, %v750_v10  ;;  %v3062_v13 = vpack.c.bf16 %v751_v11, %v749_v7  ;;  %v1302_v11 = vld [vmem:[%s4970_s4 + $0x30] sm:$0xff] }
 0x216   : > { %3461 = vrot.lane.b32.xlu0 %v4068_v31, %s3803_s19  ;;  %3466 = vrot.lane.b32.xlu1 %v4111_v12, %s3802_s18 }
 0x217   : > { %3063 = vmatprep.subr.bf16.mxu0 %v3062_v13 }
 0x218   : > { %3065 = vmatpush1.bf16.msra.mxu0 %v3064_v15 }
 0x21a   : > { %3476 = vrot.lane.b32.xlu0 %v4082_v45, %s3803_s19  ;;  %3471 = vrot.lane.b32.xlu1 %v4075_v37, %s3803_s19 }
 0x21e   : > { %3486 = vrot.lane.b32.xlu0 %v4096_v59, %s3803_s19  ;;  %3481 = vrot.lane.b32.xlu1 %v4089_v51, %s3803_s19 }
 0x222   : > { %3496 = vrot.lane.b32.xlu0 %v4107_v9, %s3803_s19  ;;  %3491 = vrot.lane.b32.xlu1 %v4103_v1, %s3803_s19 }
 0x226   : > { %3501 = vrot.lane.b32.xlu0 %v4068_v31, %s3804_s20  ;;  %3506 = vrot.lane.b32.xlu1 %v4111_v12, %s3803_s19 }
 0x22a   : > { %3516 = vrot.lane.b32.xlu0 %v4082_v45, %s3804_s20  ;;  %3511 = vrot.lane.b32.xlu1 %v4075_v37, %s3804_s20 }
 0x22e   : > { %3526 = vrot.lane.b32.xlu0 %v4096_v59, %s3804_s20  ;;  %3521 = vrot.lane.b32.xlu1 %v4089_v51, %s3804_s20 }
 0x232   : > { %3536 = vrot.lane.b32.xlu0 %v4107_v9, %s3804_s20  ;;  %3531 = vrot.lane.b32.xlu1 %v4103_v1, %s3804_s20 }
 0x236   : > { %3541 = vrot.lane.b32.xlu0 %v4068_v31, %s3806_s21  ;;  %3546 = vrot.lane.b32.xlu1 %v4111_v12, %s3804_s20  ;;  %s4784_s20 = scalar_lea.vmem %s4973_s7, %s2987_s11 }
 0x23a   : > { %3556 = vrot.lane.b32.xlu0 %v4082_v45, %s3806_s21  ;;  %3551 = vrot.lane.b32.xlu1 %v4075_v37, %s3806_s21 }
 0x23e   : > { %3566 = vrot.lane.b32.xlu0 %v4096_v59, %s3806_s21  ;;  %3561 = vrot.lane.b32.xlu1 %v4089_v51, %s3806_s21 }
 0x242   : > { %3576 = vrot.lane.b32.xlu0 %v4107_v9, %s3806_s21  ;;  %3571 = vrot.lane.b32.xlu1 %v4103_v1, %s3806_s21 }
 0x246   : > { %3581 = vrot.lane.b32.xlu0 %v4068_v31, %s3799_s15  ;;  %3586 = vrot.lane.b32.xlu1 %v4111_v12, %s3806_s21 }
 0x24a   : > { %3596 = vrot.lane.b32.xlu0 %v4082_v45, %s3799_s15  ;;  %3591 = vrot.lane.b32.xlu1 %v4075_v37, %s3799_s15 }
 0x24e   : > { %3606 = vrot.lane.b32.xlu0 %v4096_v59, %s3799_s15  ;;  %3601 = vrot.lane.b32.xlu1 %v4089_v51, %s3799_s15 }
 0x252   : > { %3616 = vrot.lane.b32.xlu0 %v4107_v9, %s3799_s15  ;;  %3611 = vrot.lane.b32.xlu1 %v4103_v1, %s3799_s15 }
 0x256   : > { %3621 = vrot.lane.b32.xlu0 %v4068_v31, %s3801_s17  ;;  %3626 = vrot.lane.b32.xlu1 %v4075_v37, %s3801_s17 }
 0x25a   : > { %3631 = vrot.lane.b32.xlu0 %v4082_v45, %s3801_s17  ;;  %3636 = vrot.lane.b32.xlu1 %v4089_v51, %s3801_s17 }
 0x25e   : > { %3641 = vrot.lane.b32.xlu0 %v4096_v59, %s3801_s17  ;;  %3646 = vrot.lane.b32.xlu1 %v4103_v1, %s3801_s17 }
 0x262   : > { %3651 = vrot.lane.b32.xlu0 %v4107_v9, %s3801_s17  ;;  %3661 = vrot.lane.b32.xlu1 %v4111_v12, %s3799_s15 }
 0x266   : > { %3656 = vrot.lane.b32.xlu0 %v4068_v31, %s3800_s16  ;;  %3666 = vrot.lane.b32.xlu1 %v4075_v37, %s3800_s16 }
 0x26a   : > { %3671 = vrot.lane.b32.xlu0 %v4068_v31, %s3807_s22  ;;  %3676 = vrot.lane.b32.xlu1 %v4075_v37, %s3807_s22  ;;  %v1217_v37 = vld [vmem:[%s4969_s3 + $0x8] sm:$0xff] }
 0x26b   : > { %1505 = vmatprep.mubr.f32.mxu0 %v1217_v37 }
 0x26c   : > { %v3427_v18 = vpop.permute.xlu0 %3426 }
 0x26d   : > { %v3428_v19 = vunpack.i.l.bf16 %v3427_v18  ;;  %v3429_v20 = vunpack.i.h.bf16 %v3427_v18 }
 0x26e   : > { %3681 = vrot.lane.b32.xlu0 %v4082_v45, %s3800_s16  ;;  %3686 = vrot.lane.b32.xlu1 %v4089_v51, %s3800_s16 }
 0x26f   : > { %v968_v25 = vsel %vm347_vm3, %v3428_v19, %v3429_v20 }
 0x270   : > { %v3432_v21 = vpop.permute.xlu1 %3431 }
 0x271   : > { %v3433_v22 = vunpack.i.l.bf16 %v3432_v21  ;;  %v3434_v23 = vunpack.i.h.bf16 %v3432_v21 }
 0x272   : > { %3691 = vrot.lane.b32.xlu0 %v4082_v45, %s3807_s22  ;;  %3696 = vrot.lane.b32.xlu1 %v4111_v12, %s3801_s17 }
 0x273   : > { %v3114_v24 = vpack.c.bf16 %v3434_v23, %v3429_v20  ;;  %v969_v17 = vsel %vm347_vm3, %v3433_v22, %v3434_v23 }
 0x274   : > { %v3437_v14 = vpop.permute.xlu0 %3436  ;;  %v3116_v26 = vpack.c.bf16 %v969_v17, %v968_v25  ;;  %v1304_v17 = vld [vmem:[%s4970_s4 + $0x40] sm:$0xff] }
 0x275   : > { %3115 = vmatprep.subr.bf16.mxu1 %v3114_v24  ;;  %v3439_v27 = vunpack.i.h.bf16 %v3437_v14  ;;  %v3438_v28 = vunpack.i.l.bf16 %v3437_v14  ;;  %v1303_v14 = vld [vmem:[%s4970_s4 + $0x38] sm:$0xff] }
 0x276   : > { %3706 = vrot.lane.b32.xlu0 %v4096_v59, %s3800_s16  ;;  %3701 = vrot.lane.b32.xlu1 %v4089_v51, %s3807_s22  ;;  %v1298_v51 = vld [vmem:[%s4970_s4 + $0x10] sm:$0xff] }
 0x277   : > { %3117 = vmatpush1.bf16.msra.mxu1 %v3116_v26  ;;  %v970_v33 = vsel %vm347_vm3, %v3438_v28, %v3439_v27 }
 0x278   : > { %v3442_v29 = vpop.permute.xlu1 %3441 }
 0x279   : > { %v3444_v30 = vunpack.i.h.bf16 %v3442_v29  ;;  %v3443_v31 = vunpack.i.l.bf16 %v3442_v29 }
 0x27a   : > { %3716 = vrot.lane.b32.xlu0 %v4096_v59, %s3807_s22  ;;  %3711 = vrot.lane.b32.xlu1 %v4103_v1, %s3800_s16 }
 0x27b   : > { %v3118_v32 = vpack.c.bf16 %v3444_v30, %v3439_v27  ;;  %v971_v34 = vsel %vm347_vm3, %v3443_v31, %v3444_v30 }
 0x27c   : > { %v3447_v35 = vpop.permute.xlu0 %3446  ;;  %v3120_v36 = vpack.c.bf16 %v971_v34, %v970_v33 }
 0x27d   : > { %3119 = vmatprep.subr.bf16.mxu1 %v3118_v32  ;;  %v3449_v38 = vunpack.i.h.bf16 %v3447_v35  ;;  %v3448_v39 = vunpack.i.l.bf16 %v3447_v35  ;;  %v1306_v35 = vld [vmem:[%s4970_s4 + $0x50] sm:$0xff] }
 0x27e   : > { %3726 = vrot.lane.b32.xlu0 %v4107_v9, %s3800_s16  ;;  %3721 = vrot.lane.b32.xlu1 %v4103_v1, %s3807_s22 }
 0x27f   : > { %3121 = vmatpush1.bf16.msra.mxu1 %v3120_v36  ;;  %v972_v45 = vsel %vm347_vm3, %v3448_v39, %v3449_v38  ;;  %v1305_v36 = vld [vmem:[%s4970_s4 + $0x48] sm:$0xff] }
 0x280   : > { %v3452_v40 = vpop.permute.xlu1 %3451 }
 0x281   : > { %v3454_v41 = vunpack.i.h.bf16 %v3452_v40  ;;  %v3453_v42 = vunpack.i.l.bf16 %v3452_v40 }
 0x282   : > { %3731 = vrot.lane.b32.xlu0 %v4107_v9, %s3807_s22  ;;  %3736 = vrot.lane.b32.xlu1 %v4111_v12, %s3800_s16 }
 0x283   : > { %v3122_v43 = vpack.c.bf16 %v3454_v41, %v3449_v38  ;;  %v973_v46 = vsel %vm347_vm3, %v3453_v42, %v3454_v41 }
 0x284   : > { %v3457_v47 = vpop.permute.xlu0 %3456  ;;  %v3124_v48 = vpack.c.bf16 %v973_v46, %v972_v45 }
 0x285   : > { %3123 = vmatprep.subr.bf16.mxu1 %v3122_v43  ;;  %v3459_v49 = vunpack.i.h.bf16 %v3457_v47  ;;  %v3458_v50 = vunpack.i.l.bf16 %v3457_v47 }
 0x286   : > { %1314 = vperm.xlu0 %3424, %v1296_v44   ;;  %3741 = vrot.lane.b32.xlu1 %v4111_v12, %s3807_s22  ;;  %v1301_v12 = vld [vmem:[%s4970_s4 + $0x28] sm:$0xff] }
 0x287   : > { %3125 = vmatpush1.bf16.msra.mxu1 %v3124_v48  ;;  %v974_v57 = vsel %vm347_vm3, %v3458_v50, %v3459_v49  ;;  %v1308_v48 = vld [vmem:[%s4970_s4 + $0x60] sm:$0xff] }
 0x288   : > { %v3467_v53 = vpop.permute.xlu1 %3466  ;;  %v3462_v54 = vpop.permute.xlu0 %3461 }
 0x289   : > { %v3469_v55 = vunpack.i.h.bf16 %v3467_v53  ;;  %v3468_v56 = vunpack.i.l.bf16 %v3467_v53  ;;  %v3464_v58 = vunpack.i.h.bf16 %v3462_v54  ;;  %v3463_v59 = vunpack.i.l.bf16 %v3462_v54 }
 0x28a   : > { %1324 = vperm.xlu0 %3424, %v1298_v51   ;;  %1319 = vperm.xlu1 %3423, %v1297_v52  }
 0x28b   : > { %v3126_v60 = vpack.c.bf16 %v3469_v55, %v3459_v49  ;;  %v975_v63 = vsel %vm347_vm3, %v3468_v56, %v3469_v55  ;;  %v1024_v13 = vsel %vm355_vm4, %v3463_v59, %v3464_v58  ;;  %v1307_v49 = vld [vmem:[%s4970_s4 + $0x58] sm:$0xff]  ;;  %v1310_v59 = vld [vmem:[%s4970_s4 + $0x70] sm:$0xff] }
 0x28c   : > { %v3472_v0 = vpop.permute.xlu1 %3471  ;;  %v3477_v1 = vpop.permute.xlu0 %3476  ;;  %v3128_v2 = vpack.c.bf16 %v975_v63, %v974_v57 }
 0x28d   : > { %v3474_v4 = vunpack.i.h.bf16 %v3472_v0  ;;  %v3473_v6 = vunpack.i.l.bf16 %v3472_v0  ;;  %3127 = vmatprep.subr.bf16.mxu1 %v3126_v60  ;;  %v3479_v7 = vunpack.i.h.bf16 %v3477_v1  ;;  %v3478_v9 = vunpack.i.l.bf16 %v3477_v1  ;;  %v1309_v60 = vld [vmem:[%s4970_s4 + $0x68] sm:$0xff] }
 0x28e   : > { %1334 = vperm.xlu0 %3424, %v1300_v61   ;;  %1329 = vperm.xlu1 %3423, %v1299_v62  }
 0x28f   : > { %3129 = vmatpush1.bf16.msra.mxu1 %v3128_v2  ;;  %v3130_v10 = vpack.c.bf16 %v3474_v4, %v3464_v58  ;;  %v1025_v15 = vsel %vm355_vm4, %v3473_v6, %v3474_v4  ;;  %v1026_v22 = vsel %vm355_vm4, %v3478_v9, %v3479_v7 }
 0x290   : > { %v3482_v16 = vpop.permute.xlu1 %3481  ;;  %v3487_v18 = vpop.permute.xlu0 %3486  ;;  %v3132_v19 = vpack.c.bf16 %v1025_v15, %v1024_v13 }
 0x291   : > { %v3484_v20 = vunpack.i.h.bf16 %v3482_v16  ;;  %v3483_v21 = vunpack.i.l.bf16 %v3482_v16  ;;  %3131 = vmatprep.subr.bf16.mxu1 %v3130_v10  ;;  %v3489_v23 = vunpack.i.h.bf16 %v3487_v18  ;;  %v3488_v24 = vunpack.i.l.bf16 %v3487_v18 }
 0x292   : > { %1344 = vperm.xlu0 %3424, %v1302_v11   ;;  %1339 = vperm.xlu1 %3423, %v1301_v12   ;;  %v1958_v11 = vld [vmem:[%s4972_s6] sm:$0xff]  ;;  %v1311_v12 = vld [vmem:[%s4970_s4 + $0x78] sm:$0xff] }
 0x293   : > { %3133 = vmatpush1.bf16.msra.mxu1 %v3132_v19  ;;  %v3134_v25 = vpack.c.bf16 %v3484_v20, %v3479_v7  ;;  %v1027_v26 = vsel %vm355_vm4, %v3483_v21, %v3484_v20  ;;  %v1028_v37 = vsel %vm355_vm4, %v3488_v24, %v3489_v23 }
 0x294   : > { %v3492_v27 = vpop.permute.xlu1 %3491  ;;  %v3497_v28 = vpop.permute.xlu0 %3496  ;;  %v3136_v29 = vpack.c.bf16 %v1027_v26, %v1026_v22 }
 0x295   : > { %v3494_v30 = vunpack.i.h.bf16 %v3492_v27  ;;  %v3493_v31 = vunpack.i.l.bf16 %v3492_v27  ;;  %3135 = vmatprep.subr.bf16.mxu1 %v3134_v25  ;;  %v3499_v32 = vunpack.i.h.bf16 %v3497_v28  ;;  %v3498_v33 = vunpack.i.l.bf16 %v3497_v28 }
 0x296   : > { %1354 = vperm.xlu0 %3424, %v1304_v17   ;;  %1349 = vperm.xlu1 %3423, %v1303_v14  }
 0x297   : > { %3137 = vmatpush1.bf16.msra.mxu1 %v3136_v29  ;;  %v3138_v34 = vpack.c.bf16 %v3494_v30, %v3489_v23  ;;  %v1029_v38 = vsel %vm355_vm4, %v3493_v31, %v3494_v30  ;;  %v1030_v44 = vsel %vm355_vm4, %v3498_v33, %v3499_v32 }
 0x298   : > { %v3507_v39 = vpop.permute.xlu1 %3506  ;;  %v3502_v40 = vpop.permute.xlu0 %3501  ;;  %v3140_v41 = vpack.c.bf16 %v1029_v38, %v1028_v37 }
 0x299   : > { %v3509_v42 = vunpack.i.h.bf16 %v3507_v39  ;;  %v3508_v43 = vunpack.i.l.bf16 %v3507_v39  ;;  %3139 = vmatprep.subr.bf16.mxu1 %v3138_v34  ;;  %v3504_v45 = vunpack.i.h.bf16 %v3502_v40  ;;  %v3503_v46 = vunpack.i.l.bf16 %v3502_v40 }
 0x29a   : > { %1364 = vperm.xlu0 %3424, %v1306_v35   ;;  %1359 = vperm.xlu1 %3423, %v1305_v36  }
 0x29b   : > { %3141 = vmatpush1.bf16.msra.mxu1 %v3140_v41  ;;  %v3142_v47 = vpack.c.bf16 %v3509_v42, %v3499_v32  ;;  %v1031_v50 = vsel %vm355_vm4, %v3508_v43, %v3509_v42  ;;  %v1080_v61 = vsel %vm363_vm5, %v3503_v46, %v3504_v45 }
 0x29c   : > { %v3512_v51 = vpop.permute.xlu1 %3511  ;;  %v3517_v52 = vpop.permute.xlu0 %3516  ;;  %v3144_v53 = vpack.c.bf16 %v1031_v50, %v1030_v44 }
 0x29d   : > { %v3514_v54 = vunpack.i.h.bf16 %v3512_v51  ;;  %v3513_v55 = vunpack.i.l.bf16 %v3512_v51  ;;  %3143 = vmatprep.subr.bf16.mxu1 %v3142_v47  ;;  %v3519_v56 = vunpack.i.h.bf16 %v3517_v52  ;;  %v3518_v57 = vunpack.i.l.bf16 %v3517_v52 }
 0x29e   : > { %1374 = vperm.xlu0 %3424, %v1308_v48   ;;  %1369 = vperm.xlu1 %3423, %v1307_v49  }
 0x29f   : > { %3145 = vmatpush1.bf16.msra.mxu1 %v3144_v53  ;;  %v3146_v58 = vpack.c.bf16 %v3514_v54, %v3504_v45  ;;  %v1081_v62 = vsel %vm363_vm5, %v3513_v55, %v3514_v54  ;;  %v1082_v6 = vsel %vm363_vm5, %v3518_v57, %v3519_v56 }
 0x2a0   : > { %v3522_v63 = vpop.permute.xlu1 %3521  ;;  %v3527_v0 = vpop.permute.xlu0 %3526  ;;  %v3148_v1 = vpack.c.bf16 %v1081_v62, %v1080_v61 }
 0x2a1   : > { %v3524_v2 = vunpack.i.h.bf16 %v3522_v63  ;;  %v3523_v4 = vunpack.i.l.bf16 %v3522_v63  ;;  %3147 = vmatprep.subr.bf16.mxu1 %v3146_v58  ;;  %v3529_v7 = vunpack.i.h.bf16 %v3527_v0  ;;  %v3528_v9 = vunpack.i.l.bf16 %v3527_v0 }
 0x2a2   : > { %1384 = vperm.xlu0 %3424, %v1310_v59   ;;  %1379 = vperm.xlu1 %3423, %v1309_v60  }
 0x2a3   : > { %3149 = vmatpush1.bf16.msra.mxu1 %v3148_v1  ;;  %v3150_v10 = vpack.c.bf16 %v3524_v2, %v3519_v56  ;;  %v1083_v13 = vsel %vm363_vm5, %v3523_v4, %v3524_v2  ;;  %v1084_v24 = vsel %vm363_vm5, %v3528_v9, %v3529_v7 }
 0x2a4   : > { %v3532_v15 = vpop.permute.xlu1 %3531  ;;  %v3537_v16 = vpop.permute.xlu0 %3536  ;;  %v3152_v18 = vpack.c.bf16 %v1083_v13, %v1082_v6 }
 0x2a5   : > { %v3534_v19 = vunpack.i.h.bf16 %v3532_v15  ;;  %v3533_v20 = vunpack.i.l.bf16 %v3532_v15  ;;  %3151 = vmatprep.subr.bf16.mxu1 %v3150_v10  ;;  %v3539_v21 = vunpack.i.h.bf16 %v3537_v16  ;;  %v3538_v22 = vunpack.i.l.bf16 %v3537_v16 }
 0x2a6   : > { %1962 = vperm.xlu0 %3424, %v1958_v11   ;;  %1389 = vperm.xlu1 %3423, %v1311_v12  }
 0x2a7   : > { %3153 = vmatpush1.bf16.msra.mxu1 %v3152_v18  ;;  %v3154_v23 = vpack.c.bf16 %v3534_v19, %v3529_v7  ;;  %v1085_v25 = vsel %vm363_vm5, %v3533_v20, %v3534_v19  ;;  %v1086_v29 = vsel %vm363_vm5, %v3538_v22, %v3539_v21 }
 0x2a8   : > { %v3547_v17 = vpop.permute.xlu1 %3546  ;;  %v3542_v14 = vpop.permute.xlu0 %3541  ;;  %v3156_v26 = vpack.c.bf16 %v1085_v25, %v1084_v24  ;;  %v1218_v25 = vld [vmem:[%s4969_s3 + $0x10] sm:$0xff] }
 0x2a9   : > { %v3549_v27 = vunpack.i.h.bf16 %v3547_v17  ;;  %v3548_v28 = vunpack.i.l.bf16 %v3547_v17  ;;  %3155 = vmatprep.subr.bf16.mxu1 %v3154_v23  ;;  %v3544_v30 = vunpack.i.h.bf16 %v3542_v14  ;;  %v3543_v31 = vunpack.i.l.bf16 %v3542_v14 }
 0x2ab   : > { %3157 = vmatpush1.bf16.msra.mxu1 %v3156_v26  ;;  %v3158_v32 = vpack.c.bf16 %v3549_v27, %v3539_v21  ;;  %v1087_v33 = vsel %vm363_vm5, %v3548_v28, %v3549_v27  ;;  %v1136_v42 = vsel %vm371_vm6, %v3543_v31, %v3544_v30  ;;  %v1224_v27 = vld [vmem:[%s4969_s3 + $0x40] sm:$0xff] }
 0x2ac   : > { %v3552_v34 = vpop.permute.xlu1 %3551  ;;  %v3557_v35 = vpop.permute.xlu0 %3556  ;;  %v3160_v36 = vpack.c.bf16 %v1087_v33, %v1086_v29 }
 0x2ad   : > { %v3554_v37 = vunpack.i.h.bf16 %v3552_v34  ;;  %v3553_v38 = vunpack.i.l.bf16 %v3552_v34  ;;  %3159 = vmatprep.subr.bf16.mxu1 %v3158_v32  ;;  %v3559_v39 = vunpack.i.h.bf16 %v3557_v35  ;;  %v3558_v40 = vunpack.i.l.bf16 %v3557_v35  ;;  %v1223_v35 = vld [vmem:[%s4969_s3 + $0x38] sm:$0xff] }
 0x2af   : > { %3161 = vmatpush1.bf16.msra.mxu1 %v3160_v36  ;;  %v3162_v41 = vpack.c.bf16 %v3554_v37, %v3544_v30  ;;  %v1137_v43 = vsel %vm371_vm6, %v3553_v38, %v3554_v37  ;;  %v1138_v49 = vsel %vm371_vm6, %v3558_v40, %v3559_v39 }
 0x2b0   : > { %v3562_v44 = vpop.permute.xlu1 %3561  ;;  %v3567_v45 = vpop.permute.xlu0 %3566  ;;  %v3164_v46 = vpack.c.bf16 %v1137_v43, %v1136_v42 }
 0x2b1   : > { %v3564_v47 = vunpack.i.h.bf16 %v3562_v44  ;;  %v3563_v48 = vunpack.i.l.bf16 %v3562_v44  ;;  %3163 = vmatprep.subr.bf16.mxu1 %v3162_v41  ;;  %v3569_v50 = vunpack.i.h.bf16 %v3567_v45  ;;  %v3568_v51 = vunpack.i.l.bf16 %v3567_v45  ;;  %v1228_v45 = vld [vmem:[%s4969_s3 + $0x60] sm:$0xff] }
 0x2b3   : > { %3165 = vmatpush1.bf16.msra.mxu1 %v3164_v46  ;;  %v3166_v52 = vpack.c.bf16 %v3564_v47, %v3559_v39  ;;  %v1139_v53 = vsel %vm371_vm6, %v3563_v48, %v3564_v47  ;;  %v1140_v62 = vsel %vm371_vm6, %v3568_v51, %v3569_v50  ;;  %v1229_v39 = vld [vmem:[%s4969_s3 + $0x68] sm:$0xff] }
 0x2b4   : > { %v3572_v54 = vpop.permute.xlu1 %3571  ;;  %v3577_v55 = vpop.permute.xlu0 %3576  ;;  %v3168_v56 = vpack.c.bf16 %v1139_v53, %v1138_v49  ;;  %v1234_v49 = vld [vmem:[%s4969_s3 + $0x90] sm:$0xff]  ;;  %v1239_v53 = vld [vmem:[%s4969_s3 + $0xb8] sm:$0xff] }
 0x2b5   : > { %v3574_v57 = vunpack.i.h.bf16 %v3572_v54  ;;  %v3573_v58 = vunpack.i.l.bf16 %v3572_v54  ;;  %3167 = vmatprep.subr.bf16.mxu1 %v3166_v52  ;;  %v3579_v59 = vunpack.i.h.bf16 %v3577_v55  ;;  %v3578_v60 = vunpack.i.l.bf16 %v3577_v55  ;;  %v1238_v54 = vld [vmem:[%s4969_s3 + $0xb0] sm:$0xff] }
 0x2b7   : > { %3169 = vmatpush1.bf16.msra.mxu1 %v3168_v56  ;;  %v3170_v61 = vpack.c.bf16 %v3574_v57, %v3569_v50  ;;  %v1141_v63 = vsel %vm371_vm6, %v3573_v58, %v3574_v57  ;;  %v1142_v7 = vsel %vm371_vm6, %v3578_v60, %v3579_v59  ;;  %v1233_v50 = vld [vmem:[%s4969_s3 + $0x88] sm:$0xff]  ;;  %v1244_v57 = vld [vmem:[%s4969_s3 + $0xe0] sm:$0xff] }
 0x2b8   : > { %v3587_v0 = vpop.permute.xlu1 %3586  ;;  %v3582_v1 = vpop.permute.xlu0 %3581  ;;  %v3172_v2 = vpack.c.bf16 %v1141_v63, %v1140_v62 }
 0x2b9   : > { %v3589_v4 = vunpack.i.h.bf16 %v3587_v0  ;;  %v3588_v6 = vunpack.i.l.bf16 %v3587_v0  ;;  %3171 = vmatprep.subr.bf16.mxu1 %v3170_v61  ;;  %v3584_v10 = vunpack.i.h.bf16 %v3582_v1  ;;  %v3583_v11 = vunpack.i.l.bf16 %v3582_v1  ;;  %v1243_v0 = vld [vmem:[%s4969_s3 + $0xd8] sm:$0xff] }
 0x2bb   : > { %v3174_v9 = vpack.c.bf16 %v3589_v4, %v3579_v59  ;;  %3173 = vmatpush1.bf16.msra.mxu1 %v3172_v2  ;;  %v1143_v12 = vsel %vm371_vm6, %v3588_v6, %v3589_v4  ;;  %v800_v22 = vsel %vm323_vm0, %v3583_v11, %v3584_v10  ;;  %v1249_v4 = vld [vmem:[%s4969_s3 + $0x108] sm:$0xff] }
 0x2bc   : > { %v3592_v13 = vpop.permute.xlu1 %3591  ;;  %v3597_v15 = vpop.permute.xlu0 %3596  ;;  %v3176_v16 = vpack.c.bf16 %v1143_v12, %v1142_v7 }
 0x2bd   : > { %v3594_v18 = vunpack.i.h.bf16 %v3592_v13  ;;  %v3593_v19 = vunpack.i.l.bf16 %v3592_v13  ;;  %3175 = vmatprep.subr.bf16.mxu1 %v3174_v9  ;;  %v3599_v20 = vunpack.i.h.bf16 %v3597_v15  ;;  %v3598_v21 = vunpack.i.l.bf16 %v3597_v15 }
 0x2bf   : > { %v801_v23 = vsel %vm323_vm0, %v3593_v19, %v3594_v18  ;;  %v3066_v24 = vpack.c.bf16 %v3594_v18, %v3584_v10  ;;  %3177 = vmatpush1.bf16.msra.mxu1 %v3176_v16  ;;  %v802_v30 = vsel %vm323_vm0, %v3598_v21, %v3599_v20 }
 0x2c0   : > { %v3068_v17 = vpack.c.bf16 %v801_v23, %v800_v22  ;;  %v3602_v14 = vpop.permute.xlu1 %3601  ;;  %v3607_v26 = vpop.permute.xlu0 %3606 }
 0x2c1   : > { %v3604_v28 = vunpack.i.h.bf16 %v3602_v14  ;;  %v3603_v29 = vunpack.i.l.bf16 %v3602_v14  ;;  %3067 = vmatprep.subr.bf16.mxu0 %v3066_v24  ;;  %v3609_v33 = vunpack.i.h.bf16 %v3607_v26  ;;  %v3608_v34 = vunpack.i.l.bf16 %v3607_v26  ;;  %v1254_v24 = vld [vmem:[%s4969_s3 + $0x130] sm:$0xff] }
 0x2c2   : > { %1667 = vmatmul.mubr.f32.vlgmr.msra.gmra.mrb[0].mxu1 %v1218_v25  ;;  %3069 = vmatpush1.bf16.msra.mxu0 %v3068_v17 }
 0x2c3   : > { %v803_v31 = vsel %vm323_vm0, %v3603_v29, %v3604_v28  ;;  %v3070_v32 = vpack.c.bf16 %v3604_v28, %v3599_v20  ;;  %1672 = vmatprep.mubr.f32.mxu1 %v1224_v27  ;;  %v804_v42 = vsel %vm323_vm0, %v3608_v34, %v3609_v33  ;;  %v1248_v20 = vld [vmem:[%s4969_s3 + $0x100] sm:$0xff]  ;;  %v1253_v28 = vld [vmem:[%s4969_s3 + $0x128] sm:$0xff] }
 0x2c4   : > { %v3072_v36 = vpack.c.bf16 %v803_v31, %v802_v30  ;;  %v3612_v37 = vpop.permute.xlu1 %3611  ;;  %v3617_v38 = vpop.permute.xlu0 %3616 }
 0x2c5   : > { %v3614_v40 = vunpack.i.h.bf16 %v3612_v37  ;;  %v3613_v41 = vunpack.i.l.bf16 %v3612_v37  ;;  %3071 = vmatprep.subr.bf16.mxu0 %v3070_v32  ;;  %v3619_v58 = vunpack.i.h.bf16 %v3617_v38  ;;  %v3618_v59 = vunpack.i.l.bf16 %v3617_v38 }
 0x2c6   : > { %1673 = vmatmul.mubr.f32.gmra.mrb[2].mxu1 %v1223_v35  ;;  %3073 = vmatpush1.bf16.msra.mxu0 %v3072_v36  ;;  %v1259_v35 = vld [vmem:[%s4969_s3 + $0x158] sm:$0xff] }
 0x2c7   : > { %v805_v43 = vsel %vm323_vm0, %v3613_v41, %v3614_v40  ;;  %v3074_v44 = vpack.c.bf16 %v3614_v40, %v3609_v33  ;;  %1678 = vmatprep.mubr.f32.mxu1 %v1229_v39  ;;  %v806_v6 = vsel %vm323_vm0, %v3618_v59, %v3619_v58 }
 0x2c8   : > { %v3076_v46 = vpack.c.bf16 %v805_v43, %v804_v42  ;;  %v3627_v47 = vpop.permute.xlu1 %3626  ;;  %v3622_v48 = vpop.permute.xlu0 %3621  ;;  %v1258_v43 = vld [vmem:[%s4969_s3 + $0x150] sm:$0xff] }
 0x2c9   : > { %3075 = vmatprep.subr.bf16.mxu0 %v3074_v44  ;;  %v3629_v60 = vunpack.i.h.bf16 %v3627_v47  ;;  %v3628_v61 = vunpack.i.l.bf16 %v3627_v47  ;;  %v3624_v62 = vunpack.i.h.bf16 %v3622_v48  ;;  %v3623_v63 = vunpack.i.l.bf16 %v3622_v48 }
 0x2ca   : > { %1679 = vmatmul.mubr.f32.gmra.mrb[4].mxu1 %v1228_v45  ;;  %3077 = vmatpush1.bf16.msra.mxu0 %v3076_v46 }
 0x2cb   : > { %1684 = vmatprep.mubr.f32.mxu1 %v1234_v49  ;;  %v857_v10 = vsel %vm331_vm2, %v3628_v61, %v3629_v60  ;;  %v856_v11 = vsel %vm331_vm2, %v3623_v63, %v3624_v62  ;;  %v3082_v25 = vpack.c.bf16 %v3629_v60, %v3624_v62  ;;  %v1269_v62 = vld [vmem:[%s4969_s3 + $0x1a8] sm:$0xff] }
 0x2cc   : > { %v3637_v51 = vpop.permute.xlu1 %3636  ;;  %v3632_v52 = vpop.permute.xlu0 %3631  ;;  %v3084_v17 = vpack.c.bf16 %v857_v10, %v856_v11  ;;  %v1268_v11 = vld [vmem:[%s4969_s3 + $0x1a0] sm:$0xff] }
 0x2cd   : > { %v3639_v12 = vunpack.i.h.bf16 %v3637_v51  ;;  %v3638_v13 = vunpack.i.l.bf16 %v3637_v51  ;;  %v3634_v15 = vunpack.i.h.bf16 %v3632_v52  ;;  %v3633_v16 = vunpack.i.l.bf16 %v3632_v52  ;;  %v1264_v52 = vld [vmem:[%s4969_s3 + $0x180] sm:$0xff] }
 0x2ce   : > { %1685 = vmatmul.mubr.f32.gmra.mrb[6].mxu1 %v1233_v50 }
 0x2cf   : > { %1690 = vmatprep.mubr.f32.mxu1 %v1239_v53  ;;  %v859_v14 = vsel %vm331_vm2, %v3638_v13, %v3639_v12  ;;  %v3086_v26 = vpack.c.bf16 %v3639_v12, %v3634_v15  ;;  %v858_v27 = vsel %vm331_vm2, %v3633_v16, %v3634_v15 }
 0x2d0   : > { %v4349_v55 = vpop.permute.xlu1 %3646  ;;  %v4351_v56 = vpop.permute.xlu0 %3641  ;;  %v3088_v44 = vpack.c.bf16 %v859_v14, %v858_v27 }
 0x2d1   : > { %v3649_v29 = vunpack.i.h.bf16 %v4349_v55  ;;  %v3648_v30 = vunpack.i.l.bf16 %v4349_v55  ;;  %v3644_v31 = vunpack.i.h.bf16 %v4351_v56  ;;  %v3643_v32 = vunpack.i.l.bf16 %v4351_v56 }
 0x2d2   : > { %1691 = vmatmul.mubr.f32.gmra.mrb[8].mxu1 %v1238_v54 }
 0x2d3   : > { %1696 = vmatprep.mubr.f32.mxu1 %v1244_v57  ;;  %v861_v48 = vsel %vm331_vm2, %v3648_v30, %v3649_v29  ;;  %v3090_v49 = vpack.c.bf16 %v3649_v29, %v3644_v31  ;;  %v860_v50 = vsel %vm331_vm2, %v3643_v32, %v3644_v31  ;;  %v1263_v57 = vld [vmem:[%s4969_s3 + $0x178] sm:$0xff] }
 0x2d4   : > { %v3662_v1 = vpop.permute.xlu1 %3661  ;;  %v4359_v2 = vpop.permute.xlu0 %3651 }
 0x2d5   : > { %v3664_v7 = vunpack.i.h.bf16 %v3662_v1  ;;  %v3663_v9 = vunpack.i.l.bf16 %v3662_v1  ;;  %v3654_v51 = vunpack.i.h.bf16 %v4359_v2  ;;  %v3653_v53 = vunpack.i.l.bf16 %v4359_v2 }
 0x2d6   : > { %1697 = vmatmul.mubr.f32.gmra.mrb[10].mxu1 %v1243_v0 }
 0x2d7   : > { %v807_v18 = vsel %vm323_vm0, %v3663_v9, %v3664_v7  ;;  %v3078_v19 = vpack.c.bf16 %v3664_v7, %v3619_v58  ;;  %1702 = vmatprep.mubr.f32.mxu1 %v1249_v4  ;;  %v3092_v58 = vpack.c.bf16 %v861_v48, %v860_v50  ;;  %v862_v1 = vsel %vm331_vm2, %v3653_v53, %v3654_v51 }
 0x2d8   : > { %v3080_v21 = vpack.c.bf16 %v807_v18, %v806_v6  ;;  %v4371_v22 = vpop.permute.xlu1 %3666  ;;  %v4373_v23 = vpop.permute.xlu0 %3656 }
 0x2d9   : > { %3079 = vmatprep.subr.bf16.mxu0 %v3078_v19  ;;  %v3669_v54 = vunpack.i.h.bf16 %v4371_v22  ;;  %v3668_v55 = vunpack.i.l.bf16 %v4371_v22  ;;  %v3659_v56 = vunpack.i.h.bf16 %v4373_v23  ;;  %v3658_v59 = vunpack.i.l.bf16 %v4373_v23 }
 0x2da   : > { %1703 = vmatmul.mubr.f32.gmra.mrb[12].mxu1 %v1248_v20  ;;  %3081 = vmatpush1.bf16.msra.mxu0 %v3080_v21  ;;  %v1274_v20 = vld [vmem:[%s4969_s3 + $0x1d0] sm:$0xff] }
 0x2db   : > { %3083 = vmatprep.subr.bf16.mxu0 %v3082_v25  ;;  %1708 = vmatprep.mubr.f32.mxu1 %v1254_v24  ;;  %v913_v2 = vsel %vm339_vm1, %v3668_v55, %v3669_v54  ;;  %v3098_v4 = vpack.c.bf16 %v3669_v54, %v3659_v56  ;;  %v912_v12 = vsel %vm339_vm1, %v3658_v59, %v3659_v56  ;;  %v1283_v56 = vld [vmem:[%s4969_s3 + $0x218] sm:$0xff] }
 0x2dc   : > { %v3677_v33 = vpop.permute.xlu1 %3676  ;;  %v3672_v34 = vpop.permute.xlu0 %3671  ;;  %v3100_v27 = vpack.c.bf16 %v913_v2, %v912_v12 }
 0x2dd   : > { %v3679_v36 = vunpack.i.h.bf16 %v3677_v33  ;;  %v3678_v37 = vunpack.i.l.bf16 %v3677_v33  ;;  %v3674_v38 = vunpack.i.h.bf16 %v3672_v34  ;;  %v3673_v39 = vunpack.i.l.bf16 %v3672_v34 }
 0x2de   : > { %1709 = vmatmul.mubr.f32.gmra.mrb[14].mxu1 %v1253_v28  ;;  %3085 = vmatpush1.bf16.msra.mxu0 %v3084_v17 }
 0x2df   : > { %v1193_v40 = vsel %vm379_vm7, %v3678_v37, %v3679_v36  ;;  %v3178_v41 = vpack.c.bf16 %v3679_v36, %v3674_v38  ;;  %v1192_v42 = vsel %vm379_vm7, %v3673_v39, %v3674_v38  ;;  %3087 = vmatprep.subr.bf16.mxu0 %v3086_v26  ;;  %1714 = vmatprep.mubr.f32.mxu1 %v1259_v35  ;;  %v1273_v26 = vld [vmem:[%s4969_s3 + $0x1c8] sm:$0xff]  ;;  %v1279_v36 = vld [vmem:[%s4969_s3 + $0x1f8] sm:$0xff] }
 0x2e0   : > { %v3180_v45 = vpack.c.bf16 %v1193_v40, %v1192_v42  ;;  %v3687_v46 = vpop.permute.xlu1 %3686  ;;  %v4395_v47 = vpop.permute.xlu0 %3681 }
 0x2e1   : > { %3179 = vmatprep.subr.bf16.mxu1 %v3178_v41  ;;  %v3689_v13 = vunpack.i.h.bf16 %v3687_v46  ;;  %v3688_v15 = vunpack.i.l.bf16 %v3687_v46  ;;  %v3684_v21 = vunpack.i.h.bf16 %v4395_v47  ;;  %v3683_v22 = vunpack.i.l.bf16 %v4395_v47  ;;  %v1278_v41 = vld [vmem:[%s4969_s3 + $0x1f0] sm:$0xff] }
 0x2e2   : > { %1715 = vmatmul.mubr.f32.gmra.mrb[16].mxu1 %v1258_v43  ;;  %3089 = vmatpush1.bf16.msra.mxu0 %v3088_v44 }
 0x2e3   : > { %3181 = vmatpush1.bf16.msra.mxu1 %v3180_v45  ;;  %3091 = vmatprep.subr.bf16.mxu0 %v3090_v49  ;;  %v915_v28 = vsel %vm339_vm1, %v3688_v15, %v3689_v13  ;;  %v3102_v32 = vpack.c.bf16 %v3689_v13, %v3684_v21  ;;  %v914_v33 = vsel %vm339_vm1, %v3683_v22, %v3684_v21  ;;  %v1284_v45 = vld [vmem:[%s4969_s3 + $0x220] sm:$0xff]  ;;  %v1222_v21 = vld [vmem:[%s4969_s3 + $0x30] sm:$0xff] }
 0x2e4   : > { %v3697_v60 = vpop.permute.xlu1 %3696  ;;  %v3692_v61 = vpop.permute.xlu0 %3691  ;;  %1720 = vmatprep.mubr.f32.mxu1 %v1264_v52  ;;  %v3104_v42 = vpack.c.bf16 %v915_v28, %v914_v33  ;;  %v1216_v15 = vld [vmem:[%s4969_s3] sm:$0xff]  ;;  %v1230_v28 = vld [vmem:[%s4969_s3 + $0x70] sm:$0xff]  ;;  %v1241_v33 = vld [vmem:[%s4969_s3 + $0xc8] sm:$0xff] }
 0x2e5   : > { %v3699_v63 = vunpack.i.h.bf16 %v3697_v60  ;;  %v3698_v0 = vunpack.i.l.bf16 %v3697_v60  ;;  %v3694_v9 = vunpack.i.h.bf16 %v3692_v61  ;;  %v3693_v10 = vunpack.i.l.bf16 %v3692_v61  ;;  %v1289_v61 = vld [vmem:[%s4969_s3 + $0x248] sm:$0xff] }
 0x2e6   : > { %1721 = vmatmul.mubr.f32.gmra.mrb[18].mxu1 %v1263_v57  ;;  %3093 = vmatpush1.bf16.msra.mxu0 %v3092_v58 }
 0x2e7   : > { %v863_v6 = vsel %vm331_vm2, %v3698_v0, %v3699_v63  ;;  %v3094_v7 = vpack.c.bf16 %v3699_v63, %v3654_v51  ;;  %1726 = vmatprep.mubr.f32.mxu1 %v1269_v62  ;;  %v1194_v25 = vsel %vm379_vm7, %v3693_v10, %v3694_v9 }
 0x2e8   : > { %v3096_v16 = vpack.c.bf16 %v863_v6, %v862_v1  ;;  %v3702_v18 = vpop.permute.xlu1 %3701  ;;  %v3707_v19 = vpop.permute.xlu0 %3706 }
 0x2e9   : > { %v3704_v23 = vunpack.i.h.bf16 %v3702_v18  ;;  %v3703_v24 = vunpack.i.l.bf16 %v3702_v18  ;;  %3095 = vmatprep.subr.bf16.mxu0 %v3094_v7  ;;  %v3709_v37 = vunpack.i.h.bf16 %v3707_v19  ;;  %v3708_v38 = vunpack.i.l.bf16 %v3707_v19  ;;  %v1288_v7 = vld [vmem:[%s4969_s3 + $0x240] sm:$0xff] }
 0x2ea   : > { %1727 = vmatmul.mubr.f32.gmra.mrb[20].mxu1 %v1268_v11  ;;  %3097 = vmatpush1.bf16.msra.mxu0 %v3096_v16  ;;  %v1294_v11 = vld [vmem:[%s4969_s3 + $0x270] sm:$0xff] }
 0x2eb   : > { %v1195_v17 = vsel %vm379_vm7, %v3703_v24, %v3704_v23  ;;  %v3182_v14 = vpack.c.bf16 %v3704_v23, %v3694_v9  ;;  %3099 = vmatprep.subr.bf16.mxu0 %v3098_v4  ;;  %1732 = vmatprep.mubr.f32.mxu1 %v1274_v20  ;;  %v916_v50 = vsel %vm339_vm1, %v3708_v38, %v3709_v37  ;;  %v1293_v20 = vld [vmem:[%s4969_s3 + $0x268] sm:$0xff]  ;;  %v1220_v24 = vld [vmem:[%s4969_s3 + $0x20] sm:$0xff] }
 0x2ec   : > { %v3184_v29 = vpack.c.bf16 %v1195_v17, %v1194_v25  ;;  %v3712_v30 = vpop.permute.xlu1 %3711  ;;  %v3717_v31 = vpop.permute.xlu0 %3716  ;;  %v1221_v23 = vld [vmem:[%s4969_s3 + $0x28] sm:$0xff]  ;;  %v1227_v25 = vld [vmem:[%s4969_s3 + $0x58] sm:$0xff]  ;;  %v1226_v17 = vld [vmem:[%s4969_s3 + $0x50] sm:$0xff] }
 0x2ed   : > { %v3714_v34 = vunpack.i.h.bf16 %v3712_v30  ;;  %v3713_v35 = vunpack.i.l.bf16 %v3712_v30  ;;  %3183 = vmatprep.subr.bf16.mxu1 %v3182_v14  ;;  %v3719_v39 = vunpack.i.h.bf16 %v3717_v31  ;;  %v3718_v40 = vunpack.i.l.bf16 %v3717_v31  ;;  %v1225_v14 = vld [vmem:[%s4969_s3 + $0x48] sm:$0xff]  ;;  %v1236_v30 = vld [vmem:[%s4969_s3 + $0xa0] sm:$0xff]  ;;  %v1235_v31 = vld [vmem:[%s4969_s3 + $0x98] sm:$0xff] }
 0x2ee   : > { %1733 = vmatmul.mubr.f32.gmra.mrb[22].mxu1 %v1273_v26  ;;  %3101 = vmatpush1.bf16.msra.mxu0 %v3100_v27  ;;  %v1232_v26 = vld [vmem:[%s4969_s3 + $0x80] sm:$0xff]  ;;  %v1231_v27 = vld [vmem:[%s4969_s3 + $0x78] sm:$0xff] }
 0x2ef   : > { %3185 = vmatpush1.bf16.msra.mxu1 %v3184_v29  ;;  %3103 = vmatprep.subr.bf16.mxu0 %v3102_v32  ;;  %v917_v46 = vsel %vm339_vm1, %v3713_v35, %v3714_v34  ;;  %v3106_v47 = vpack.c.bf16 %v3714_v34, %v3709_v37  ;;  %v1196_v53 = vsel %vm379_vm7, %v3718_v40, %v3719_v39  ;;  %v1237_v29 = vld [vmem:[%s4969_s3 + $0xa8] sm:$0xff]  ;;  %v1242_v32 = vld [vmem:[%s4969_s3 + $0xd0] sm:$0xff]  ;;  %v1240_v34 = vld [vmem:[%s4969_s3 + $0xc0] sm:$0xff] }
 0x2f0   : > { %v3722_v43 = vpop.permute.xlu1 %3721  ;;  %v3727_v44 = vpop.permute.xlu0 %3726  ;;  %1738 = vmatprep.mubr.f32.mxu1 %v1279_v36  ;;  %v3108_v57 = vpack.c.bf16 %v917_v46, %v916_v50  ;;  %v1247_v35 = vld [vmem:[%s4969_s3 + $0xf8] sm:$0xff]  ;;  %v1246_v36 = vld [vmem:[%s4969_s3 + $0xf0] sm:$0xff]  ;;  %v1245_v37 = vld [vmem:[%s4969_s3 + $0xe8] sm:$0xff] }
 0x2f1   : > { %v3724_v48 = vunpack.i.h.bf16 %v3722_v43  ;;  %v3723_v49 = vunpack.i.l.bf16 %v3722_v43  ;;  %v3729_v51 = vunpack.i.h.bf16 %v3727_v44  ;;  %v3728_v52 = vunpack.i.l.bf16 %v3727_v44  ;;  %v1252_v38 = vld [vmem:[%s4969_s3 + $0x120] sm:$0xff]  ;;  %v1250_v40 = vld [vmem:[%s4969_s3 + $0x110] sm:$0xff]  ;;  %v1255_v43 = vld [vmem:[%s4969_s3 + $0x138] sm:$0xff] }
 0x2f2   : > { %1739 = vmatmul.mubr.f32.gmra.mrb[24].mxu1 %v1278_v41  ;;  %3105 = vmatpush1.bf16.msra.mxu0 %v3104_v42  ;;  %v1257_v41 = vld [vmem:[%s4969_s3 + $0x148] sm:$0xff]  ;;  %v1256_v42 = vld [vmem:[%s4969_s3 + $0x140] sm:$0xff]  ;;  %v1262_v44 = vld [vmem:[%s4969_s3 + $0x170] sm:$0xff] }
 0x2f3   : > { %v1197_v54 = vsel %vm379_vm7, %v3723_v49, %v3724_v48  ;;  %v3186_v55 = vpack.c.bf16 %v3724_v48, %v3719_v39  ;;  %3107 = vmatprep.subr.bf16.mxu0 %v3106_v47  ;;  %1744 = vmatprep.mubr.f32.mxu1 %v1284_v45  ;;  %v918_v0 = vsel %vm339_vm1, %v3728_v52, %v3729_v51  ;;  %v1251_v39 = vld [vmem:[%s4969_s3 + $0x118] sm:$0xff]  ;;  %v1261_v45 = vld [vmem:[%s4969_s3 + $0x168] sm:$0xff]  ;;  %v1260_v46 = vld [vmem:[%s4969_s3 + $0x160] sm:$0xff] }
 0x2f4   : > { %v3188_v58 = vpack.c.bf16 %v1197_v54, %v1196_v53  ;;  %v3737_v59 = vpop.permute.xlu1 %3736  ;;  %v3732_v60 = vpop.permute.xlu0 %3731  ;;  %v1267_v47 = vld [vmem:[%s4969_s3 + $0x198] sm:$0xff]  ;;  %v1266_v48 = vld [vmem:[%s4969_s3 + $0x190] sm:$0xff]  ;;  %v1265_v49 = vld [vmem:[%s4969_s3 + $0x188] sm:$0xff] }
 0x2f5   : > { %v3739_v62 = vunpack.i.h.bf16 %v3737_v59  ;;  %v3738_v63 = vunpack.i.l.bf16 %v3737_v59  ;;  %3187 = vmatprep.subr.bf16.mxu1 %v3186_v55  ;;  %v3734_v4 = vunpack.i.h.bf16 %v3732_v60  ;;  %v3733_v6 = vunpack.i.l.bf16 %v3732_v60  ;;  %v1272_v50 = vld [vmem:[%s4969_s3 + $0x1c0] sm:$0xff]  ;;  %v1270_v52 = vld [vmem:[%s4969_s3 + $0x1b0] sm:$0xff]  ;;  %v1277_v53 = vld [vmem:[%s4969_s3 + $0x1e8] sm:$0xff] }
 0x2f6   : > { %1745 = vmatmul.mubr.f32.gmra.mrb[26].mxu1 %v1283_v56  ;;  %3109 = vmatpush1.bf16.msra.mxu0 %v3108_v57  ;;  %v1276_v54 = vld [vmem:[%s4969_s3 + $0x1e0] sm:$0xff]  ;;  %v1275_v55 = vld [vmem:[%s4969_s3 + $0x1d8] sm:$0xff]  ;;  %v1282_v56 = vld [vmem:[%s4969_s3 + $0x210] sm:$0xff] }
 0x2f7   : > { %v919_v1 = vsel %vm339_vm1, %v3738_v63, %v3739_v62  ;;  %v3110_v2 = vpack.c.bf16 %v3739_v62, %v3729_v51  ;;  %3189 = vmatpush1.bf16.msra.mxu1 %v3188_v58  ;;  %1750 = vmatprep.mubr.f32.mxu1 %v1289_v61  ;;  %v1198_v16 = vsel %vm379_vm7, %v3733_v6, %v3734_v4  ;;  %v1271_v51 = vld [vmem:[%s4969_s3 + $0x1b8] sm:$0xff]  ;;  %v1281_v57 = vld [vmem:[%s4969_s3 + $0x208] sm:$0xff]  ;;  %v1280_v58 = vld [vmem:[%s4969_s3 + $0x200] sm:$0xff] }
 0x2f8   : > { %v3112_v9 = vpack.c.bf16 %v919_v1, %v918_v0  ;;  %v3742_v10 = vpop.permute.xlu1 %3741  ;;  %v1287_v59 = vld [vmem:[%s4969_s3 + $0x238] sm:$0xff]  ;;  %v1286_v60 = vld [vmem:[%s4969_s3 + $0x230] sm:$0xff]  ;;  %v1285_v61 = vld [vmem:[%s4969_s3 + $0x228] sm:$0xff] }
 0x2f9   : > { %v3744_v12 = vunpack.i.h.bf16 %v3742_v10  ;;  %v3743_v13 = vunpack.i.l.bf16 %v3742_v10  ;;  %3111 = vmatprep.subr.bf16.mxu0 %v3110_v2  ;;  %v1292_v62 = vld [vmem:[%s4969_s3 + $0x260] sm:$0xff]  ;;  %v1291_v63 = vld [vmem:[%s4969_s3 + $0x258] sm:$0xff]  ;;  %v1290_v0 = vld [vmem:[%s4969_s3 + $0x250] sm:$0xff] }
 0x2fa   : > { %1751 = vmatmul.mubr.f32.gmra.mrb[28].mxu1 %v1288_v7  ;;  %3113 = vmatpush1.bf16.msra.mxu0 %v3112_v9  ;;  %v1295_v1 = vld [vmem:[%s4969_s3 + $0x278] sm:$0xff] }
 0x2fb   : > { %v1199_v18 = vsel %vm379_vm7, %v3743_v13, %v3744_v12  ;;  %v3190_v19 = vpack.c.bf16 %v3744_v12, %v3734_v4  ;;  %1756 = vmatprep.mubr.f32.mxu1 %v1294_v11 }
 0x2fc   : > { %v3192_v22 = vpack.c.bf16 %v1199_v18, %v1198_v16 }
 0x2fd   : > { %1506 = vmatmul.mubr.f32.vlgmr.msra.gmra.mrb[16].mxu0 %v1216_v15  ;;  %3191 = vmatprep.subr.bf16.mxu1 %v3190_v19 }
 0x2fe   : > { %1757 = vmatmul.mubr.f32.gmra.mrb[30].mxu1 %v1293_v20  ;;  %1511 = vmatprep.mubr.f32.mxu0 %v1222_v21 }
 0x2ff   : > { %3193 = vmatpush1.bf16.msra.mxu1 %v3192_v22  ;;  %1827 = vmatprep.mubr.f32.mxu1 %v3805_v3 }
 0x301   : > { %1512 = vmatmul.mubr.f32.gmra.mrb[18].mxu0 %v1221_v23 }
 0x302   : > { %2999 = vmatmul.mubr.msk.f32.vlgmr.msra.gmra.mrb[0].mxu1 %vm1392_vm13, %v1220_v24  ;;  %1517 = vmatprep.mubr.f32.mxu0 %v1227_v25 }
 0x303   : > { %1833 = vmatprep.mubr.f32.mxu1 %v3805_v3 }
 0x305   : > { %1518 = vmatmul.mubr.f32.gmra.mrb[20].mxu0 %v1226_v17  ;;  %v1315_v6 = vpop.permute.xlu0 %1314 }
 0x306   : > { %3000 = vmatmul.mubr.msk.f32.gmra.mrb[2].mxu1 %vm1392_vm13, %v1225_v14  ;;  %1523 = vmatprep.mubr.f32.mxu0 %v1232_v26 }
 0x307   : > { %1839 = vmatprep.mubr.f32.mxu1 %v3805_v3 }
 0x309   : > { %1524 = vmatmul.mubr.f32.gmra.mrb[22].mxu0 %v1231_v27  ;;  %v1320_v16 = vpop.permute.xlu1 %1319  ;;  %v1325_v17 = vpop.permute.xlu0 %1324 }
 0x30a   : > { %3001 = vmatmul.mubr.msk.f32.gmra.mrb[4].mxu1 %vm1392_vm13, %v1230_v28  ;;  %1529 = vmatprep.mubr.f32.mxu0 %v1237_v29 }
 0x30b   : > { %1845 = vmatprep.mubr.f32.mxu1 %v3805_v3 }
 0x30d   : > { %1530 = vmatmul.mubr.f32.gmra.mrb[24].mxu0 %v1236_v30 }
 0x30e   : > { %3002 = vmatmul.mubr.msk.f32.gmra.mrb[6].mxu1 %vm1392_vm13, %v1235_v31  ;;  %1535 = vmatprep.mubr.f32.mxu0 %v1242_v32 }
 0x30f   : > { %1851 = vmatprep.mubr.f32.mxu1 %v3805_v3 }
 0x311   : > { %1536 = vmatmul.mubr.f32.gmra.mrb[26].mxu0 %v1241_v33 }
 0x312   : > { %3003 = vmatmul.mubr.msk.f32.gmra.mrb[8].mxu1 %vm1392_vm13, %v1240_v34  ;;  %1541 = vmatprep.mubr.f32.mxu0 %v1247_v35 }
 0x313   : > { %1857 = vmatprep.mubr.f32.mxu1 %v3805_v3 }
 0x315   : > { %1542 = vmatmul.mubr.f32.gmra.mrb[28].mxu0 %v1246_v36 }
 0x316   : > { %3004 = vmatmul.mubr.msk.f32.gmra.mrb[10].mxu1 %vm1392_vm13, %v1245_v37  ;;  %1547 = vmatprep.mubr.f32.mxu0 %v1252_v38  ;;  %v1330_v38 = vpop.permute.xlu1 %1329 }
 0x317   : > { %1863 = vmatprep.mubr.f32.mxu1 %v3805_v3 }
 0x319   : > { %1548 = vmatmul.mubr.f32.gmra.mrb[30].mxu0 %v1251_v39 }
 0x31a   : > { %3005 = vmatmul.mubr.msk.f32.gmra.mrb[12].mxu1 %vm1392_vm13, %v1250_v40  ;;  %1553 = vmatprep.mubr.f32.mxu0 %v1257_v41 }
 0x31b   : > { %1869 = vmatprep.mubr.f32.mxu1 %v3805_v3 }
 0x31d   : > { %1554 = vmatmul.mubr.f32.gmra.mrb[32].mxu0 %v1256_v42 }
 0x31e   : > { %3006 = vmatmul.mubr.msk.f32.gmra.mrb[14].mxu1 %vm1392_vm13, %v1255_v43  ;;  %1559 = vmatprep.mubr.f32.mxu0 %v1262_v44 }
 0x31f   : > { %1875 = vmatprep.mubr.f32.mxu1 %v3805_v3 }
 0x321   : > { %1560 = vmatmul.mubr.f32.gmra.mrb[34].mxu0 %v1261_v45 }
 0x322   : > { %3007 = vmatmul.mubr.msk.f32.gmra.mrb[16].mxu1 %vm1392_vm13, %v1260_v46  ;;  %1565 = vmatprep.mubr.f32.mxu0 %v1267_v47 }
 0x323   : > { %1881 = vmatprep.mubr.f32.mxu1 %v3805_v3 }
 0x325   : > { %1566 = vmatmul.mubr.f32.gmra.mrb[36].mxu0 %v1266_v48  ;;  %v1335_v48 = vpop.permute.xlu0 %1334 }
 0x326   : > { %3008 = vmatmul.mubr.msk.f32.gmra.mrb[18].mxu1 %vm1392_vm13, %v1265_v49  ;;  %1571 = vmatprep.mubr.f32.mxu0 %v1272_v50 }
 0x327   : > { %1887 = vmatprep.mubr.f32.mxu1 %v3805_v3 }
 0x329   : > { %1572 = vmatmul.mubr.f32.gmra.mrb[38].mxu0 %v1271_v51 }
 0x32a   : > { %3009 = vmatmul.mubr.msk.f32.gmra.mrb[20].mxu1 %vm1392_vm13, %v1270_v52  ;;  %1577 = vmatprep.mubr.f32.mxu0 %v1277_v53 }
 0x32b   : > { %1893 = vmatprep.mubr.f32.mxu1 %v3805_v3 }
 0x32d   : > { %1578 = vmatmul.mubr.f32.gmra.mrb[40].mxu0 %v1276_v54 }
 0x32e   : > { %3010 = vmatmul.mubr.msk.f32.gmra.mrb[22].mxu1 %vm1392_vm13, %v1275_v55  ;;  %1583 = vmatprep.mubr.f32.mxu0 %v1282_v56 }
 0x32f   : > { %1899 = vmatprep.mubr.f32.mxu1 %v3805_v3 }
 0x331   : > { %1584 = vmatmul.mubr.f32.gmra.mrb[42].mxu0 %v1281_v57 }
 0x332   : > { %3011 = vmatmul.mubr.msk.f32.gmra.mrb[24].mxu1 %vm1392_vm13, %v1280_v58  ;;  %1589 = vmatprep.mubr.f32.mxu0 %v1287_v59 }
 0x333   : > { %1905 = vmatprep.mubr.f32.mxu1 %v3805_v3 }
 0x335   : > { %1590 = vmatmul.mubr.f32.gmra.mrb[44].mxu0 %v1286_v60 }
 0x336   : > { %3012 = vmatmul.mubr.msk.f32.gmra.mrb[26].mxu1 %vm1392_vm13, %v1285_v61  ;;  %1595 = vmatprep.mubr.f32.mxu0 %v1292_v62  ;;  %v1340_v62 = vpop.permute.xlu1 %1339 }
 0x337   : > { %1911 = vmatprep.mubr.f32.mxu1 %v3805_v3 }
 0x339   : > { %1596 = vmatmul.mubr.f32.gmra.mrb[46].mxu0 %v1291_v63 }
 0x33a   : > { %3013 = vmatmul.mubr.msk.f32.gmra.mrb[28].mxu1 %vm1392_vm13, %v1290_v0  ;;  %2034 = vmatprep.mubr.f32.mxu0 %v3805_v3 }
 0x33b   : > { %1917 = vmatprep.mubr.f32.mxu1 %v3805_v3 }
 0x33e   : > { %3014 = vmatmul.mubr.msk.f32.gmra.mrb[30].mxu1 %vm1392_vm13, %v1295_v1 }
 0x3d0   : > { %v1507_v2 = vpop.f32.mrb[16].mxu0 }
 0x3d1   : > { %v1509_v4 = vpop.f32.mrb[17].mxu0  ;;  %v1508_v7 = vadd.f32 %v1507_v2, %v1315_v6 }
 0x3d2   : > { %v1510_v10 = vadd.f32 %v1509_v4, %v1315_v6 }
 0x3d4   : > { %v1513_v9 = vpop.f32.mrb[18].mxu0 }
 0x3d5   : > { %v1829_v11 = vpop.f32.mrb[0].mxu1  ;;  %v1515_v12 = vpop.f32.mrb[19].mxu0  ;;  %v1514_v19 = vadd.f32 %v1513_v9, %v1320_v16 }
 0x3d6   : > { %v3227_v13 = vadd.f32 %v1829_v11, %v1508_v7  ;;  %v1831_v15 = vpop.f32.mrb[1].mxu1  ;;  %v1516_v21 = vadd.f32 %v1515_v12, %v1320_v16  ;;  %v1345_v11 = vpop.permute.xlu0 %1344 }
 0x3d7   : > { %v3229_v18 = vadd.f32 %v1831_v15, %v1510_v10 }
 0x3d8   : > { %v1519_v20 = vpop.f32.mrb[20].mxu0  ;;  %v1924_v26 = vmax.f32 %v3227_v13, 0.0 }
 0x3d9   : > { %v1835_v22 = vpop.f32.mrb[2].mxu1  ;;  %v1521_v23 = vpop.f32.mrb[21].mxu0  ;;  %v1520_v27 = vadd.f32 %v1519_v20, %v1325_v17  ;;  %v1925_v30 = vmax.f32 %v3229_v18, 0.0 }
 0x3da   : > { %v3231_v24 = vadd.f32 %v1835_v22, %v1514_v19  ;;  %v1837_v25 = vpop.f32.mrb[3].mxu1  ;;  %v1522_v31 = vadd.f32 %v1521_v23, %v1325_v17 }
 0x3db   : > { %v3233_v14 = vadd.f32 %v1837_v25, %v1516_v21 }
 0x3dc   : > { %v1926_v28 = vmax.f32 %v3231_v24, 0.0  ;;  %v1525_v29 = vpop.f32.mrb[22].mxu0 }
 0x3dd   : > { %v1927_v32 = vmax.f32 %v3233_v14, 0.0  ;;  %v1841_v33 = vpop.f32.mrb[4].mxu1  ;;  %v1527_v34 = vpop.f32.mrb[23].mxu0  ;;  %v1526_v41 = vadd.f32 %v1525_v29, %v1330_v38 }
 0x3de   : > { %v3196_v35 = vpack.c.bf16 %v1926_v28, %v1924_v26  ;;  %v3235_v36 = vadd.f32 %v1841_v33, %v1520_v27  ;;  %v1843_v37 = vpop.f32.mrb[5].mxu1  ;;  %v1528_v43 = vadd.f32 %v1527_v34, %v1330_v38  ;;  %v1350_v14 = vpop.permute.xlu1 %1349 }
 0x3df   : > { %v3194_v39 = vpack.c.bf16 %v1927_v32, %v1925_v30  ;;  %v3237_v40 = vadd.f32 %v1843_v37, %v1522_v31 }
 0x3e0   : > { %v1531_v42 = vpop.f32.mrb[24].mxu0  ;;  %v1928_v50 = vmax.f32 %v3235_v36, 0.0 }
 0x3e1   : > { %v1847_v44 = vpop.f32.mrb[6].mxu1  ;;  %3195 = vmatprep.subr.bf16.mxu0 %v3194_v39  ;;  %v1533_v45 = vpop.f32.mrb[25].mxu0  ;;  %v1532_v51 = vadd.f32 %v1531_v42, %v1335_v48  ;;  %v1929_v54 = vmax.f32 %v3237_v40, 0.0 }
 0x3e2   : > { %v3239_v46 = vadd.f32 %v1847_v44, %v1526_v41  ;;  %v1849_v47 = vpop.f32.mrb[7].mxu1  ;;  %3197 = vmatpush1.bf16.msra.mxu0 %v3196_v35  ;;  %v1534_v55 = vadd.f32 %v1533_v45, %v1335_v48  ;;  %v1355_v35 = vpop.permute.xlu0 %1354 }
 0x3e3   : > { %v3241_v49 = vadd.f32 %v1849_v47, %v1528_v43 }
 0x3e4   : > { %v1930_v52 = vmax.f32 %v3239_v46, 0.0  ;;  %v1537_v53 = vpop.f32.mrb[26].mxu0 }
 0x3e5   : > { %v1931_v56 = vmax.f32 %v3241_v49, 0.0  ;;  %v1853_v57 = vpop.f32.mrb[8].mxu1  ;;  %v1539_v58 = vpop.f32.mrb[27].mxu0  ;;  %v1538_v1 = vadd.f32 %v1537_v53, %v1340_v62 }
 0x3e6   : > { %v3200_v59 = vpack.c.bf16 %v1930_v52, %v1928_v50  ;;  %v3243_v60 = vadd.f32 %v1853_v57, %v1532_v51  ;;  %v1855_v61 = vpop.f32.mrb[9].mxu1  ;;  %v1540_v4 = vadd.f32 %v1539_v58, %v1340_v62  ;;  %v1360_v49 = vpop.permute.xlu1 %1359 }
 0x3e7   : > { %v3198_v63 = vpack.c.bf16 %v1931_v56, %v1929_v54  ;;  %v3245_v0 = vadd.f32 %v1855_v61, %v1534_v55 }
 0x3e8   : > { %v1543_v2 = vpop.f32.mrb[28].mxu0  ;;  %v1932_v13 = vmax.f32 %v3243_v60, 0.0 }
 0x3e9   : > { %v1859_v6 = vpop.f32.mrb[10].mxu1  ;;  %3199 = vmatprep.subr.bf16.mxu0 %v3198_v63  ;;  %v1545_v7 = vpop.f32.mrb[29].mxu0  ;;  %v1544_v15 = vadd.f32 %v1543_v2, %v1345_v11  ;;  %v1933_v19 = vmax.f32 %v3245_v0, 0.0 }
 0x3ea   : > { %v3247_v9 = vadd.f32 %v1859_v6, %v1538_v1  ;;  %v1861_v10 = vpop.f32.mrb[11].mxu1  ;;  %3201 = vmatpush1.bf16.msra.mxu0 %v3200_v59  ;;  %v1546_v20 = vadd.f32 %v1545_v7, %v1345_v11  ;;  %v1365_v59 = vpop.permute.xlu0 %1364 }
 0x3eb   : > { %v3249_v12 = vadd.f32 %v1861_v10, %v1540_v4 }
 0x3ec   : > { %v1934_v16 = vmax.f32 %v3247_v9, 0.0  ;;  %v1549_v18 = vpop.f32.mrb[30].mxu0 }
 0x3ed   : > { %v1935_v21 = vmax.f32 %v3249_v12, 0.0  ;;  %v1865_v22 = vpop.f32.mrb[12].mxu1  ;;  %v1551_v23 = vpop.f32.mrb[31].mxu0  ;;  %v1550_v28 = vadd.f32 %v1549_v18, %v1350_v14 }
 0x3ee   : > { %v3204_v24 = vpack.c.bf16 %v1934_v16, %v1932_v13  ;;  %v3251_v25 = vadd.f32 %v1865_v22, %v1544_v15  ;;  %v1867_v17 = vpop.f32.mrb[13].mxu1  ;;  %v1552_v30 = vadd.f32 %v1551_v23, %v1350_v14  ;;  %v1370_v12 = vpop.permute.xlu1 %1369 }
 0x3ef   : > { %v3202_v26 = vpack.c.bf16 %v1935_v21, %v1933_v19  ;;  %v3253_v27 = vadd.f32 %v1867_v17, %v1546_v20 }
 0x3f0   : > { %v1555_v29 = vpop.f32.mrb[32].mxu0  ;;  %v1936_v37 = vmax.f32 %v3251_v25, 0.0 }
 0x3f1   : > { %v1871_v31 = vpop.f32.mrb[14].mxu1  ;;  %3203 = vmatprep.subr.bf16.mxu0 %v3202_v26  ;;  %v1557_v32 = vpop.f32.mrb[33].mxu0  ;;  %v1556_v38 = vadd.f32 %v1555_v29, %v1355_v35  ;;  %v1937_v41 = vmax.f32 %v3253_v27, 0.0 }
 0x3f2   : > { %v3255_v33 = vadd.f32 %v1871_v31, %v1550_v28  ;;  %v1873_v34 = vpop.f32.mrb[15].mxu1  ;;  %3205 = vmatpush1.bf16.msra.mxu0 %v3204_v24  ;;  %v1558_v42 = vadd.f32 %v1557_v32, %v1355_v35  ;;  %v1375_v24 = vpop.permute.xlu0 %1374 }
 0x3f3   : > { %v3257_v36 = vadd.f32 %v1873_v34, %v1552_v30 }
 0x3f4   : > { %v1938_v39 = vmax.f32 %v3255_v33, 0.0  ;;  %v1561_v40 = vpop.f32.mrb[34].mxu0 }
 0x3f5   : > { %v1939_v43 = vmax.f32 %v3257_v36, 0.0  ;;  %v1877_v44 = vpop.f32.mrb[16].mxu1  ;;  %v1563_v45 = vpop.f32.mrb[35].mxu0  ;;  %v1562_v52 = vadd.f32 %v1561_v40, %v1360_v49 }
 0x3f6   : > { %v3208_v46 = vpack.c.bf16 %v1938_v39, %v1936_v37  ;;  %v3259_v47 = vadd.f32 %v1877_v44, %v1556_v38  ;;  %v1879_v48 = vpop.f32.mrb[17].mxu1  ;;  %v1564_v54 = vadd.f32 %v1563_v45, %v1360_v49  ;;  %v1380_v36 = vpop.permute.xlu1 %1379 }
 0x3f7   : > { %v3206_v50 = vpack.c.bf16 %v1939_v43, %v1937_v41  ;;  %v3261_v51 = vadd.f32 %v1879_v48, %v1558_v42 }
 0x3f8   : > { %v1567_v53 = vpop.f32.mrb[36].mxu0  ;;  %v1940_v61 = vmax.f32 %v3259_v47, 0.0 }
 0x3f9   : > { %v1883_v55 = vpop.f32.mrb[18].mxu1  ;;  %3207 = vmatprep.subr.bf16.mxu0 %v3206_v50  ;;  %v1569_v56 = vpop.f32.mrb[37].mxu0  ;;  %v1568_v62 = vadd.f32 %v1567_v53, %v1365_v59  ;;  %v1941_v1 = vmax.f32 %v3261_v51, 0.0 }
 0x3fa   : > { %v3263_v57 = vadd.f32 %v1883_v55, %v1562_v52  ;;  %v1885_v58 = vpop.f32.mrb[19].mxu1  ;;  %3209 = vmatpush1.bf16.msra.mxu0 %v3208_v46  ;;  %v1570_v2 = vadd.f32 %v1569_v56, %v1365_v59  ;;  %v1385_v46 = vpop.permute.xlu0 %1384 }
 0x3fb   : > { %v3265_v60 = vadd.f32 %v1885_v58, %v1564_v54 }
 0x3fc   : > { %v1942_v63 = vmax.f32 %v3263_v57, 0.0  ;;  %v1573_v0 = vpop.f32.mrb[38].mxu0 }
 0x3fd   : > { %v1943_v4 = vmax.f32 %v3265_v60, 0.0  ;;  %v1889_v6 = vpop.f32.mrb[20].mxu1  ;;  %v1575_v7 = vpop.f32.mrb[39].mxu0  ;;  %v1574_v16 = vadd.f32 %v1573_v0, %v1370_v12 }
 0x3fe   : > { %v3212_v9 = vpack.c.bf16 %v1942_v63, %v1940_v61  ;;  %v3267_v10 = vadd.f32 %v1889_v6, %v1568_v62  ;;  %v1891_v11 = vpop.f32.mrb[21].mxu1  ;;  %v1576_v19 = vadd.f32 %v1575_v7, %v1370_v12  ;;  %v1390_v60 = vpop.permute.xlu1 %1389 }
 0x3ff   : > { %v3210_v13 = vpack.c.bf16 %v1943_v4, %v1941_v1  ;;  %v3269_v15 = vadd.f32 %v1891_v11, %v1570_v2 }
 0x400   : > { %v1579_v18 = vpop.f32.mrb[40].mxu0  ;;  %v1944_v17 = vmax.f32 %v3267_v10, 0.0 }
 0x401   : > { %v1895_v20 = vpop.f32.mrb[22].mxu1  ;;  %3211 = vmatprep.subr.bf16.mxu0 %v3210_v13  ;;  %v1581_v21 = vpop.f32.mrb[41].mxu0  ;;  %v1580_v14 = vadd.f32 %v1579_v18, %v1375_v24  ;;  %v1945_v28 = vmax.f32 %v3269_v15, 0.0  ;;  %v1956_v15 = vld [vmem:[%s4971_s5] sm:$0xff]  ;;  %v4647_v18 = vld [vmem:[%s3895_s14 + $0x10] sm:$0xf] }
 0x402   : > { %v3271_v22 = vadd.f32 %v1895_v20, %v1574_v16  ;;  %v1897_v23 = vpop.f32.mrb[23].mxu1  ;;  %3213 = vmatpush1.bf16.msra.mxu0 %v3212_v9  ;;  %v1582_v29 = vadd.f32 %v1581_v21, %v1375_v24  ;;  %v1957_v16 = vld [vmem:[%s4971_s5 + $0x8] sm:$0x7]  ;;  %v4651_v20 = vld [vmem:[%s3895_s14 + $0x18] sm:$0xf] }
 0x403   : > { %v3273_v25 = vadd.f32 %v1897_v23, %v1576_v19  ;;  %v2050_v19 = vand.u32 2139095040, %v4647_v18  ;;  %v2153_v21 = vand.u32 2139095040, %v4651_v20 }
 0x404   : > { %v1946_v26 = vmax.f32 %v3271_v22, 0.0  ;;  %v1585_v27 = vpop.f32.mrb[42].mxu0 }
 0x405   : > { %v1947_v30 = vmax.f32 %v3273_v25, 0.0  ;;  %v1901_v31 = vpop.f32.mrb[24].mxu1  ;;  %v1587_v32 = vpop.f32.mrb[43].mxu0  ;;  %v1586_v39 = vadd.f32 %v1585_v27, %v1380_v36  ;;  %v2051_v22 = vshrl.u32 %v2050_v19, 23  ;;  %v2154_v23 = vshrl.u32 %v2153_v21, 23 }
 0x406   : > { %v3216_v33 = vpack.c.bf16 %v1946_v26, %v1944_v17  ;;  %v3275_v34 = vadd.f32 %v1901_v31, %v1580_v14  ;;  %v1903_v35 = vpop.f32.mrb[25].mxu1  ;;  %v1588_v41 = vadd.f32 %v1587_v32, %v1380_v36  ;;  %v3810_v31 = vmov 683565275  }
 0x407   : > { %v3214_v37 = vpack.c.bf16 %v1947_v30, %v1945_v28  ;;  %v3277_v38 = vadd.f32 %v1903_v35, %v1582_v29  ;;  %v3015_v24 = vadd.s32 4294967169, %v2051_v22  ;;  %v3019_v25 = vadd.s32 4294967169, %v2154_v23 }
 0x408   : > { %v1591_v40 = vpop.f32.mrb[44].mxu0  ;;  %v1948_v48 = vmax.f32 %v3275_v34, 0.0  ;;  %v2047_v30 = vand.u32 2147483647, %v4647_v18  ;;  %v3812_v36 = vmov 2131351028  }
 0x409   : > { %v1907_v42 = vpop.f32.mrb[26].mxu1  ;;  %3215 = vmatprep.subr.bf16.mxu0 %v3214_v37  ;;  %v1593_v43 = vpop.f32.mrb[45].mxu0  ;;  %v1592_v49 = vadd.f32 %v1591_v40, %v1385_v46  ;;  %v1949_v52 = vmax.f32 %v3277_v38, 0.0  ;;  %v2057_v17 = vadd.s32 1, %v3015_v24  ;;  %v2160_v14 = vadd.s32 1, %v3019_v25 }
 0x40a   : > { %v3279_v44 = vadd.f32 %v1907_v42, %v1586_v39  ;;  %v1909_v45 = vpop.f32.mrb[27].mxu1  ;;  %3217 = vmatpush1.bf16.msra.mxu0 %v3216_v33  ;;  %v1594_v53 = vadd.f32 %v1593_v43, %v1385_v46  ;;  %v3811_v33 = vmov 2475754826   ;;  %v3813_v39 = vmov 2102212464  }
 0x40b   : > { %v3281_v47 = vadd.f32 %v1909_v45, %v1588_v41  ;;  %vm2058_vm14 = vcmp.gt.s32.totalorder %v2057_v17, 0  ;;  %vm2161_vm15 = vcmp.gt.s32.totalorder %v2160_v14, 0  ;;  %v3814_v41 = vmov 920167782  }
 0x40c   : > { %v1950_v50 = vmax.f32 %v3279_v44, 0.0  ;;  %v1597_v51 = vpop.f32.mrb[46].mxu0  ;;  %v2162_v27 = vsel %vm2161_vm15, %v2160_v14, 0  ;;  %v3815_v45 = vmov 1326507024  }
 0x40d   : > { %v1951_v54 = vmax.f32 %v3281_v47, 0.0  ;;  %v1913_v55 = vpop.f32.mrb[28].mxu1  ;;  %v1599_v56 = vpop.f32.mrb[47].mxu0  ;;  %v1598_v63 = vadd.f32 %v1597_v51, %v1390_v60  ;;  %v2164_v28 = vand.u32 31, %v2162_v27  ;;  %vm4769_vm15 = vcmp.le.f32.partialorder %v2047_v30, 0.7853982 }
 0x40e   : > { %v3220_v57 = vpack.c.bf16 %v1950_v50, %v1948_v48  ;;  %v3283_v58 = vadd.f32 %v1913_v55, %v1592_v49  ;;  %v1915_v59 = vpop.f32.mrb[29].mxu1  ;;  %v1600_v0 = vadd.f32 %v1599_v56, %v1390_v60  ;;  %v4667_v49 = vshrl.u32 %v2162_v27, 5 }
 0x40f   : > { %v3218_v61 = vpack.c.bf16 %v1951_v54, %v1949_v52  ;;  %v3285_v62 = vadd.f32 %v1915_v59, %v1594_v53  ;;  %v4663_v43 = vsub.s32 32, %v2164_v28  ;;  %v2054_v50 = vand.u32 8388607, %v2047_v30 }
 0x410   : > { %v1952_v7 = vmax.f32 %v3283_v58, 0.0  ;;  %v2176_v54 = vshll.u32 %v3813_v39, %v2164_v28  ;;  %v2179_v58 = vshll.u32 %v3814_v41, %v2164_v28  ;;  %vm2185_vm4 = vcmp.lt.s32.totalorder %v4667_v49, 4 }
 0x411   : > { %v1919_v1 = vpop.f32.mrb[30].mxu1  ;;  %3219 = vmatprep.subr.bf16.mxu0 %v3218_v61  ;;  %v1953_v10 = vmax.f32 %v3285_v62, 0.0  ;;  %v2177_v55 = vshrl.u32 %v3814_v41, %v4663_v43  ;;  %v2180_v59 = vshrl.u32 %v3815_v45, %v4663_v43  ;;  %v2167_v61 = vshll.u32 %v3810_v31, %v2164_v28 }
 0x412   : > { %v3287_v2 = vadd.f32 %v1919_v1, %v1598_v63  ;;  %v1921_v4 = vpop.f32.mrb[31].mxu1  ;;  %3221 = vmatpush1.bf16.msra.mxu0 %v3220_v57  ;;  %v2150_v57 = vand.u32 2147483647, %v4651_v20  ;;  %v2168_v62 = vshrl.u32 %v3811_v33, %v4663_v43  ;;  %v2170_v63 = vshll.u32 %v3811_v33, %v2164_v28 }
 0x413   : > { %v3289_v6 = vadd.f32 %v1921_v4, %v1600_v0  ;;  %v2171_v0 = vshrl.u32 %v3812_v36, %v4663_v43  ;;  %v2173_v1 = vshll.u32 %v3812_v36, %v2164_v28  ;;  %v2055_v4 = vor.u32 8388608, %v2054_v50 }
 0x414   : > { %v1954_v9 = vmax.f32 %v3287_v2, 0.0  ;;  %v2174_v2 = vshrl.u32 %v3813_v39, %v4663_v43  ;;  %vm2182_vm6 = vcmp.lt.s32.totalorder %v4667_v49, 1  ;;  %vm2184_vm7 = vcmp.lt.s32.totalorder %v4667_v49, 3 }
 0x415   : > { %v1955_v11 = vmax.f32 %v3289_v6, 0.0  ;;  %v2172_v19 = vor.u32 %v2171_v0, %v2170_v63  ;;  %v2095_v24 = vshll.u32 %v2055_v4, 8  ;;  %vm2183_vm8 = vcmp.lt.s32.totalorder %v4667_v49, 2 }
 0x416   : > { %v3224_v12 = vpack.c.bf16 %v1954_v9, %v1952_v7  ;;  %v2178_v7 = vor.u32 %v2177_v55, %v2176_v54  ;;  %v2175_v21 = vor.u32 %v2174_v2, %v2173_v1 }
 0x417   : > { %v3222_v13 = vpack.c.bf16 %v1955_v11, %v1953_v10  ;;  %v2157_v10 = vand.u32 8388607, %v2150_v57  ;;  %v2181_v11 = vor.u32 %v2180_v59, %v2179_v58 }
 0x418   : > { %v2191_v23 = vsel %vm2185_vm4, %v2178_v7, 920167782  ;;  %v2194_v28 = vsel %vm2182_vm6, %v2172_v19, %v2175_v21 }
 0x419   : > { %3223 = vmatprep.subr.bf16.mxu0 %v3222_v13  ;;  %v2158_v25 = vor.u32 8388608, %v2157_v10  ;;  %v2192_v27 = vsel %vm2184_vm7, %v2175_v21, %v2191_v23 }
 0x41a   : > { %3225 = vmatpush1.bf16.msra.mxu0 %v3224_v12 }
 0x41d   : > { %2035 = vmatmul.mubr.f32.vlgmr.msra.gmra.mrb[48].mxu0 %v1956_v15 }
 0x41e   : > { %2040 = vmatprep.mubr.f32.mxu0 %v3805_v3  ;;  %v2059_v3 = vsel %vm2058_vm14, %v2057_v17, 0  ;;  %v2195_v17 = vsel %vm2185_vm4, %v2181_v11, 1326507024  ;;  %vm2049_vm14 = vcmp.lt.s32.totalorder %v4647_v18, 0 }
 0x41f   : > { %v2061_v26 = vand.u32 31, %v2059_v3  ;;  %v4660_v38 = vshrl.u32 %v2059_v3, 5 }
 0x421   : > { %2041 = vmatmul.mubr.f32.gmra.mrb[50].mxu0 %v1957_v16  ;;  %v4654_v29 = vsub.s32 32, %v2061_v26  ;;  %v2064_v32 = vshll.u32 %v3810_v31, %v2061_v26  ;;  %v2067_v35 = vshll.u32 %v3811_v33, %v2061_v26  ;;  %v2073_v40 = vshll.u32 %v3813_v39, %v2061_v26 }
 0x422   : > { %v2076_v44 = vshll.u32 %v3814_v41, %v2061_v26  ;;  %v2070_v47 = vshll.u32 %v3812_v36, %v2061_v26  ;;  %vm2082_vm0 = vcmp.lt.s32.totalorder %v4660_v38, 4  ;;  %vm2079_vm1 = vcmp.lt.s32.totalorder %v4660_v38, 1 }
 0x423   : > { %v2065_v34 = vshrl.u32 %v3811_v33, %v4654_v29  ;;  %v2068_v37 = vshrl.u32 %v3812_v36, %v4654_v29  ;;  %v2074_v42 = vshrl.u32 %v3814_v41, %v4654_v29  ;;  %v2077_v46 = vshrl.u32 %v3815_v45, %v4654_v29 }
 0x424   : > { %v2071_v48 = vshrl.u32 %v3813_v39, %v4654_v29  ;;  %vm2081_vm2 = vcmp.lt.s32.totalorder %v4660_v38, 3  ;;  %vm2080_vm5 = vcmp.lt.s32.totalorder %v4660_v38, 2  ;;  %v2169_v16 = vor.u32 %v2168_v62, %v2167_v61 }
 0x425   : > { %v2066_v51 = vor.u32 %v2065_v34, %v2064_v32  ;;  %v2069_v52 = vor.u32 %v2068_v37, %v2067_v35  ;;  %v2075_v53 = vor.u32 %v2074_v42, %v2073_v40  ;;  %v2078_v56 = vor.u32 %v2077_v46, %v2076_v44 }
 0x426   : > { %v2072_v60 = vor.u32 %v2071_v48, %v2070_v47  ;;  %v2190_v26 = vsel %vm2182_vm6, %v2169_v16, %v2172_v19  ;;  %v2196_v32 = vsel %vm2184_vm7, %v2178_v7, %v2195_v17  ;;  %v2198_v35 = vshll.u32 %v2158_v25, 8 }
 0x427   : > { %v2088_v6 = vsel %vm2082_vm0, %v2075_v53, 920167782  ;;  %v2092_v9 = vsel %vm2082_vm0, %v2078_v56, 1326507024  ;;  %v2087_v12 = vsel %vm2079_vm1, %v2066_v51, %v2069_v52  ;;  %v2063_v36 = vshrl.u32 %v3810_v31, %v4654_v29 }
 0x428   : > { %v2091_v13 = vsel %vm2079_vm1, %v2069_v52, %v2072_v60  ;;  %v2089_v15 = vsel %vm2081_vm2, %v2072_v60, %v2088_v6  ;;  %v2093_v22 = vsel %vm2081_vm2, %v2075_v53, %v2092_v9  ;;  %v2193_v40 = vsel %vm2183_vm8, %v2190_v26, %v2192_v27 }
 0x429   : > { %v2090_v14 = vsel %vm2080_vm5, %v2087_v12, %v2089_v15  ;;  %v2094_v3 = vsel %vm2080_vm5, %v2091_v13, %v2093_v22  ;;  %v2084_v41 = vsel %vm2082_vm0, %v2072_v60, 2102212464  ;;  %v2197_v42 = vsel %vm2183_vm8, %v2194_v28, %v2196_v32 }
 0x42a   : > { %v4716_v33 = vmul.u32.u64.low %v2095_v24, %v2090_v14  ;;  %v4717_v34 = vmul.u32.u64.high %v2095_v24, %v2090_v14, %v4716_v33  ;;  %v4721_v37 = vmul.u32.u64.low %v2095_v24, %v2094_v3  ;;  %v4722_v39 = vmul.u32.u64.high %v2095_v24, %v2094_v3, %v4721_v37 }
 0x42b   : > { %v2166_v44 = vshrl.u32 %v3810_v31, %v4663_v43  ;;  %v4732_v45 = vmul.u32.u64.low %v2198_v35, %v2193_v40  ;;  %v4733_v46 = vmul.u32.u64.high %v2198_v35, %v2193_v40, %v4732_v45  ;;  %v2083_v29 = vsel %vm2079_vm1, %v2063_v36, %v2066_v51 }
 0x42c   : > { %v2085_v47 = vsel %vm2081_vm2, %v2069_v52, %v2084_v41  ;;  %v4739_v48 = vmul.u32.u64.low %v2198_v35, %v2197_v42  ;;  %v4740_v50 = vmul.u32.u64.high %v2198_v35, %v2197_v42, %v4739_v48  ;;  %v2187_v53 = vsel %vm2185_vm4, %v2175_v21, 2102212464 }
 0x42d   : > { %v2086_v54 = vsel %vm2080_vm5, %v2083_v29, %v2085_v47  ;;  %v2105_v31 = vadd.s32 1, %v4717_v34  ;;  %vm2104_vm10 = vc.u32 %v4722_v39, %v4716_v33  ;;  %v2186_v43 = vsel %vm2182_vm6, %v2166_v44, %v2169_v16 }
 0x42e   : > { %v2188_v51 = vsel %vm2184_vm7, %v2172_v19, %v2187_v53  ;;  %v2102_v52 = vmul.u32 %v2095_v24, %v2086_v54  ;;  %v2208_v58 = vadd.s32 1, %v4733_v46  ;;  %vm2207_vm11 = vc.u32 %v4740_v50, %v4732_v45  ;;  %v1963_v54 = vpop.permute.xlu0 %1962 }
 0x42f   : > { %v2106_v55 = vsel %vm2104_vm10, %v2105_v31, %v4717_v34  ;;  %v2189_v56 = vsel %vm2183_vm8, %v2186_v43, %v2188_v51  ;;  %v2103_v23 = vadd.s32 %v4716_v33, %v4722_v39  ;;  %v2206_v27 = vadd.s32 %v4732_v45, %v4740_v50 }
 0x430   : > { %v2107_v38 = vadd.s32 %v2106_v55, %v2102_v52  ;;  %v2205_v59 = vmul.u32 %v2198_v35, %v2189_v56  ;;  %v2209_v60 = vsel %vm2207_vm11, %v2208_v58, %v4733_v46  ;;  %vm2152_vm0 = vcmp.lt.s32.totalorder %v4651_v20, 0 }
 0x431   : > { %vm4790_vm1 = vcmp.le.f32.partialorder %v2150_v57, 0.7853982  ;;  %vm2841_vm2 = vcmask 125952   ;;  %vm2139_vm6 = vweird.f32 %v4647_v18 }
 0x432   : > { %v2108_v61 = vadd.s32 536870912, %v2107_v38  ;;  %v2210_v62 = vadd.s32 %v2209_v60, %v2205_v59 }
 0x434   : > { %v4758_v63 = vshrl.u32 %v2108_v61, 30  ;;  %v2211_v0 = vadd.s32 536870912, %v2210_v62 }
 0x436   : > { %v2110_v1 = vshll.u32 %v4758_v63, 30  ;;  %v4761_v2 = vshrl.u32 %v2211_v0, 30  ;;  %v2133_v57 = vsub.s32 4, %v4758_v63 }
 0x438   : > { %v2111_v4 = vsub.s32 %v2107_v38, %v2110_v1  ;;  %v2213_v49 = vshll.u32 %v4761_v2, 30 }
 0x43a   : > { %v2113_v6 = vsub.s32 0, %v2111_v4  ;;  %v2214_v7 = vsub.s32 %v2210_v62, %v2213_v49  ;;  %v2236_v62 = vsub.s32 4, %v4761_v2 }
 0x43c   : > { %v3016_v9 = vmin.u32 %v2113_v6, %v2111_v4  ;;  %v2216_v10 = vsub.s32 0, %v2214_v7 }
 0x43e   : > { %v2115_v11 = vclz %v3016_v9  ;;  %v3020_v12 = vmin.u32 %v2216_v10, %v2214_v7 }
 0x440   : > { %v3017_v13 = vadd.s32 4294967294, %v2115_v11  ;;  %v2218_v15 = vclz %v3020_v12 }
 0x442   : > { %vm3018_vm12 = vcmp.lt.s32.totalorder %v3017_v13, 0  ;;  %v3021_v16 = vadd.s32 4294967294, %v2218_v15 }
 0x443   : > { %v2118_v19 = vsel %vm3018_vm12, 0, %v3017_v13 }
 0x444   : > { %vm3022_vm13 = vcmp.lt.s32.totalorder %v3021_v16, 0  ;;  %v2123_v21 = vsub.s32 4294967266, %v2118_v19  ;;  %v2119_v24 = vsub.s32 32, %v2118_v19  ;;  %v2120_v14 = vshll.u32 %v2111_v4, %v2118_v19 }
 0x445   : > { %v2221_v22 = vsel %vm3022_vm13, 0, %v3021_v16  ;;  %v2134_v4 = vsel %vm2049_vm14, %v2133_v57, %v4758_v63 }
 0x446   : > { %v2124_v25 = vadd.s32 127, %v2123_v21  ;;  %v2226_v17 = vsub.s32 4294967266, %v2221_v22  ;;  %v2121_v3 = vshrl.u32 %v2103_v23, %v2119_v24  ;;  %v2222_v28 = vsub.s32 32, %v2221_v22 }
 0x447   : > { %v2223_v36 = vshll.u32 %v2214_v7, %v2221_v22  ;;  %v2237_v7 = vsel %vm2152_vm0, %v2236_v62, %v4761_v2  ;;  %v2136_v9 = vsel %vm4769_vm15, 0, %v2134_v4 }
 0x448   : > { %v2125_v26 = vshll.u32 %v2124_v25, 23  ;;  %v2227_v32 = vadd.s32 127, %v2226_v17  ;;  %v2122_v34 = vor.u32 %v2121_v3, %v2120_v14  ;;  %v2224_v37 = vshrl.u32 %v2206_v27, %v2222_v28 }
 0x449   : > { %v2239_v11 = vsel %vm4790_vm1, 0, %v2237_v7  ;;  %v2140_v13 = vand.u32 3, %v2136_v9  ;;  %v2346_v15 = vadd.s32 3, %v2136_v9 }
 0x44a   : > { %v2126_v35 = vor.u32 4788187, %v2125_v26  ;;  %v2228_v40 = vshll.u32 %v2227_v32, 23  ;;  %v2129_v42 = vcvt.s32.f32 %v2122_v34  ;;  %v2225_v44 = vor.u32 %v2224_v37, %v2223_v36 }
 0x44b   : > { %v2243_v63 = vand.u32 3, %v2239_v11  ;;  %vm2142_vm4 = vcmp.eq.s32.totalorder %v2140_v13, 0  ;;  %vm2145_vm5 = vcmp.eq.s32.totalorder %v2140_v13, 2  ;;  %v2450_v2 = vadd.s32 3, %v2239_v11 }
 0x44c   : > { %v2127_v41 = vand.u32 2147483647, %v2126_v35  ;;  %v2229_v33 = vor.u32 4788187, %v2228_v40  ;;  %v2232_v29 = vcvt.s32.f32 %v2225_v44  ;;  %v2347_v23 = vand.u32 3, %v2346_v15 }
 0x44d   : > { %vm2141_vm7 = vcmp.lt.s32.totalorder %v2140_v13, 2  ;;  %vm2244_vm8 = vcmp.lt.s32.totalorder %v2243_v63, 2  ;;  %vm2245_vm10 = vcmp.eq.s32.totalorder %v2243_v63, 0  ;;  %vm2248_vm11 = vcmp.eq.s32.totalorder %v2243_v63, 2 }
 0x44e   : > { %v2130_v39 = vmul.f32 %v2129_v42, %v2127_v41  ;;  %v2230_v46 = vand.u32 2147483647, %v2229_v33  ;;  %v2451_v32 = vand.u32 3, %v2450_v2  ;;  %vm2349_vm12 = vcmp.eq.s32.totalorder %v2347_v23, 0 }
 0x44f   : > { %vm2352_vm13 = vcmp.eq.s32.totalorder %v2347_v23, 2 }
 0x450   : > { %v2131_v47 = vxor.u32 2147483648, %v2130_v39  ;;  %v2233_v48 = vmul.f32 %v2232_v29, %v2230_v46 }
 0x452   : > { %v2132_v50 = vsel %vm2049_vm14, %v2131_v47, %v2130_v39  ;;  %v2234_v53 = vxor.u32 2147483648, %v2233_v48  ;;  %vm2348_vm14 = vcmp.lt.s32.totalorder %v2347_v23, 2 }
 0x453   : > { %v2135_v43 = vsel %vm4769_vm15, %v4647_v18, %v2132_v50  ;;  %vm2453_vm15 = vcmp.eq.s32.totalorder %v2451_v32, 0 }
 0x454   : > { %v2235_v55 = vsel %vm2152_vm0, %v2234_v53, %v2233_v48  ;;  %3745 = vcosq.f32 %v2135_v43  ;;  %vm2456_vm0 = vcmp.eq.s32.totalorder %v2451_v32, 2 }
 0x455   : > { %3747 = vsinq.f32 %v2135_v43  ;;  %v2238_v59 = vsel %vm4790_vm1, %v4651_v20, %v2235_v55  ;;  %vm2242_vm1 = vweird.f32 %v4651_v20 }
 0x456   : > { %3749 = vcosq.f32 %v2238_v59 }
 0x457   : > { %3751 = vsinq.f32 %v2238_v59 }
 0x45e   : > { %v3746_v10 = vpop.eup %3745 }
 0x45f   : > { %v3748_v12 = vpop.eup %3747  ;;  %v2146_v21 = vxor.u32 2147483648, %v3746_v10 }
 0x460   : > { %v3750_v16 = vpop.eup %3749  ;;  %v2143_v19 = vxor.u32 2147483648, %v3748_v12 }
 0x461   : > { %v3752_v22 = vpop.eup %3751  ;;  %v2147_v17 = vsel %vm2145_vm5, %v2146_v21, %v3748_v12  ;;  %v2249_v3 = vxor.u32 2147483648, %v3750_v16  ;;  %v2354_v46 = vsel %vm2352_vm13, %v2146_v21, %v3748_v12  ;;  %vm2880_vm5 = vcmp.lt.s32.totalorder %v613_v5, 144 }
 0x462   : > { %v2144_v25 = vsel %vm2142_vm4, %v3746_v10, %v2143_v19  ;;  %v2246_v14 = vxor.u32 2147483648, %v3752_v22  ;;  %v2351_v39 = vsel %vm2349_vm12, %v3746_v10, %v2143_v19  ;;  %vm2452_vm4 = vcmp.lt.s32.totalorder %v2451_v32, 2 }
 0x463   : > { %v2148_v40 = vsel %vm2141_vm7, %v2144_v25, %v2147_v17  ;;  %v2250_v33 = vsel %vm2248_vm11, %v2249_v3, %v3752_v22  ;;  %v2355_v50 = vsel %vm2348_vm14, %v2351_v39, %v2354_v46  ;;  %vm2822_vm7 = vcmask 1041408  }
 0x464   : > { %v2247_v44 = vsel %vm2245_vm10, %v3750_v16, %v2246_v14  ;;  %v2149_v47 = vsel %vm2139_vm6, nan, %v2148_v40  ;;  %v2455_v53 = vsel %vm2453_vm15, %v3750_v16, %v2246_v14  ;;  %v2356_v55 = vsel %vm2139_vm6, nan, %v2355_v50 }
 0x465   : > { %v2251_v48 = vsel %vm2244_vm8, %v2247_v44, %v2250_v33  ;;  %v2463_v43 = vrot.slane %v2149_v47, 6  ;;  %v2513_v59 = vrot.slane %v2356_v55, 6  ;;  %v2489_v62 = vrot.slane %v2356_v55, 5 }
 0x466   : > { %vm2819_vm6 = vcmask 1040384   ;;  %vm2825_vm8 = vcmask 1042432   ;;  %vm2828_vm10 = vcmask 1043456   ;;  %vm2831_vm11 = vcmask 1044480  }
 0x467   : > { %vm2837_vm12 = vcmask 1046528   ;;  %vm2855_vm13 = vcmask 130052  }
 0x4f0   : > { %v2036_v31 = vpop.f32.mrb[48].mxu0 }
 0x4f1   : > { %v4786_v30 = vadd.f32 %v2036_v31, %v1963_v54  ;;  %v2038_v51 = vpop.f32.mrb[49].mxu0  ;;  %v1959_v31 = vld [vmem:[%s4972_s6 + $0x8] sm:$0x7] }
 0x4f2   : > { %v4796_v56 = vadd.f32 %v2038_v51, %v1963_v54  ;;  %v2458_v54 = vsel %vm2456_vm0, %v2249_v3, %v3752_v22  ;;  %v2252_v51 = vsel %vm2242_vm1, nan, %v2251_v48 }
 0x4f3   : > { %v2561_v58 = vmul.f32 %v4786_v30, %v4786_v30  ;;  %2840 = vst [vmem:[%s4784_s20] sm:$0xf] %v4786_v30  ;;  %v2464_v57 = vrot.slane %v2252_v51, 6  ;;  %v2538_v4 = vrot.slane %v2252_v51, 5 }
 0x4f4   : > { %v2562_v38 = vmul.f32 %v4796_v56, %v4796_v56  ;;  %2842 = vst.msk [vmem:[%s4784_s20 + $0x8] sm:$0xf] %vm2841_vm2, %v4796_v56  ;;  %v2042_v52 = vpop.f32.mrb[50].mxu0 }
 0x4f5   : > { %v2565_v60 = vrot.slane %v2561_v58, 1 }
 0x4f6   : > { %v2566_v61 = vrot.slane %v2562_v38, 1 }
 0x4f7   : > { %v2569_v0 = vadd.f32 %v2565_v60, %v2561_v58  ;;  %v2459_v58 = vsel %vm2452_vm4, %v2455_v53, %v2458_v54 }
 0x4f8   : > { %v2570_v1 = vadd.f32 %v2566_v61, %v2562_v38  ;;  %v2044_v38 = vpop.f32.mrb[51].mxu0  ;;  %v2460_v60 = vsel %vm2242_vm1, nan, %v2459_v58 }
 0x4f9   : > { %v2571_v49 = vadd.f32 1e-08, %v2569_v0  ;;  %v2514_v61 = vrot.slane %v2460_v60, 6  ;;  %v2490_v0 = vrot.slane %v2460_v60, 5 }
 0x4fa   : > { %v2572_v6 = vadd.f32 1e-08, %v2570_v1  ;;  %v2537_v1 = vrot.slane %v2149_v47, 5 }
 0x4fb   : > { %3753 = vrsqrt.f32 %v2571_v49 }
 0x4fc   : > { %3755 = vrsqrt.f32 %v2572_v6 }
 0x505   : > { %v3754_v24 = vpop.eup %3753 }
 0x506   : > { %v3756_v26 = vpop.eup %3755  ;;  %v2575_v27 = vmul.f32 %v3754_v24, %v4786_v30  ;;  %v2579_v28 = vrot.slane %v3754_v24, 7 }
 0x507   : > { %v2576_v34 = vmul.f32 %v3756_v26, %v4796_v56  ;;  %v2580_v35 = vrot.slane %v3756_v26, 7  ;;  %v3816_v26 = vmov 1966171168  }
 0x508   : > { %v2587_v36 = vrot.slane %v2575_v27, 4  ;;  %v2583_v37 = vmul.f32 %v2579_v28, %v4786_v30  ;;  %v2863_v27 = vunpack.c.l.s4 %v3816_v26 }
 0x509   : > { %v2588_v41 = vrot.slane %v2576_v34, 4  ;;  %v2584_v42 = vmul.f32 %v2580_v35, %v4796_v56 }
 0x50a   : > { %2589 = vrot.lane.b32.xlu1 %v2587_v36, %s3809_s9  ;;  %v2600_v29 = vrot.slane %v2583_v37, 5  ;;  %v2864_v35 = vunpack.c.0.s8 %v2863_v27 }
 0x50b   : > { %2591 = vrot.lane.b32.xlu0 %v2588_v41, %s3809_s9  ;;  %v2601_v45 = vrot.slane %v2584_v42, 5 }
 0x50c   : > { %v2867_v41 = vsub.s32 %v2864_v35, %v3920_v8 }
 0x50e   : > { %2602 = vrot.lane.b32.xlu1 %v2600_v29, %s3809_s9 }
 0x50f   : > { %2604 = vrot.lane.b32.xlu0 %v2601_v45, %s3809_s9 }
 0x512   : > { %1967 = vperm.xlu1 %3423, %v1959_v31  }
 0x513   : > { %2465 = vrot.lane.b32.xlu0 %v2463_v43, %s3802_s18 }
 0x516   : > { %2467 = vrot.lane.b32.xlu1 %v2464_v57, %s3802_s18 }
 0x517   : > { %2515 = vrot.lane.b32.xlu0 %v2513_v59, %s3802_s18 }
 0x51a   : > { %2517 = vrot.lane.b32.xlu1 %v2514_v61, %s3802_s18 }
 0x51b   : > { %2491 = vrot.lane.b32.xlu0 %v2489_v62, %s3802_s18 }
 0x51e   : > { %2493 = vrot.lane.b32.xlu1 %v2490_v0, %s3802_s18 }
 0x51f   : > { %2539 = vrot.lane.b32.xlu0 %v2537_v1, %s3802_s18 }
 0x522   : > { %2541 = vrot.lane.b32.xlu1 %v2538_v4, %s3802_s18 }
 0x57c   : > { %v2590_v49 = vpop.permute.xlu1 %2589 }
 0x57d   : > { %v2592_v6 = vpop.permute.xlu0 %2591  ;;  %v2613_v10 = vmul.f32 %v2590_v49, %v2356_v55  ;;  %v2596_v15 = vmul.f32 %v2590_v49, %v2149_v47 }
 0x57e   : > { %v2593_v7 = vsel %vm595_vm9, %v2590_v49, %v2592_v6 }
 0x57f   : > { %v2614_v16 = vmul.f32 %v2593_v7, %v2460_v60  ;;  %v2597_v2 = vmul.f32 %v2593_v7, %v2252_v51 }
 0x580   : > { %v2603_v9 = vpop.permute.xlu1 %2602 }
 0x581   : > { %v2609_v11 = vmul.f32 %v2603_v9, %v2356_v55  ;;  %v2615_v12 = vmul.f32 %v2603_v9, %v2149_v47  ;;  %v2605_v13 = vpop.permute.xlu0 %2604 }
 0x582   : > { %v2606_v63 = vsel %vm595_vm9, %v2603_v9, %v2605_v13 }
 0x583   : > { %v2617_v19 = vadd.f32 %v2615_v12, %v2613_v10  ;;  %v2610_v21 = vmul.f32 %v2606_v63, %v2460_v60  ;;  %v2616_v22 = vmul.f32 %v2606_v63, %v2252_v51  ;;  %v2611_v23 = vsub.f32 %v2596_v15, %v2609_v11 }
 0x585   : > { %v2618_v24 = vadd.f32 %v2616_v22, %v2614_v16  ;;  %v2671_v25 = vrot.slane %v2617_v19, 2  ;;  %v2612_v17 = vsub.f32 %v2597_v2, %v2610_v21  ;;  %v2623_v3 = vrot.slane %v2611_v23, 2  ;;  %v2466_v34 = vpop.permute.xlu0 %2465 }
 0x586   : > { %v2647_v32 = vrot.slane %v2617_v19, 1  ;;  %v2695_v40 = vrot.slane %v2611_v23, 1 }
 0x587   : > { %v2672_v14 = vrot.slane %v2618_v24, 2  ;;  %2673 = vrot.lane.b32.xlu0 %v2671_v25, %s3802_s18  ;;  %v2624_v28 = vrot.slane %v2612_v17, 2  ;;  %v2648_v36 = vrot.slane %v2618_v24, 1  ;;  %v2696_v33 = vrot.slane %v2612_v17, 1 }
 0x589   : > { %2675 = vrot.lane.b32.xlu1 %v2672_v14, %s3802_s18  ;;  %v2516_v39 = vpop.permute.xlu0 %2515 }
 0x58b   : > { %2625 = vrot.lane.b32.xlu0 %v2623_v3, %s3802_s18 }
 0x58d   : > { %2627 = vrot.lane.b32.xlu1 %v2624_v28, %s3802_s18  ;;  %v2492_v43 = vpop.permute.xlu0 %2491 }
 0x58f   : > { %2649 = vrot.lane.b32.xlu0 %v2647_v32, %s3802_s18 }
 0x591   : > { %2651 = vrot.lane.b32.xlu1 %v2648_v36, %s3802_s18  ;;  %v1968_v37 = vpop.permute.xlu1 %1967  ;;  %v2540_v62 = vpop.permute.xlu0 %2539 }
 0x592   : > { %v2043_v42 = vadd.f32 %v2042_v52, %v1968_v37  ;;  %v2045_v44 = vadd.f32 %v2044_v38, %v1968_v37 }
 0x593   : > { %2697 = vrot.lane.b32.xlu0 %v2695_v40, %s3802_s18 }
 0x594   : > { %v2861_v46 = vcombine.low %v2043_v42, %v2045_v44  ;;  %v2620_v15 = vmul.f32 0.5, %v2045_v44  ;;  %v2619_v63 = vmul.f32 0.5, %v2043_v42 }
 0x595   : > { %2699 = vrot.lane.b32.xlu1 %v2696_v33, %s3802_s18  ;;  %v2468_v29 = vpop.permute.xlu1 %2467 }
 0x596   : > { %v2868_v47 = vrot.slane %v2861_v46, %v2867_v41  ;;  %v2469_v48 = vsel %vm347_vm3, %v2466_v34, %v2468_v29  ;;  %v2473_v45 = vmul.f32 %v2468_v29, %v4796_v56  ;;  %v2717_v2 = vmul.f32 -1.0, %v2619_v63 }
 0x597   : > { %v2472_v50 = vmul.f32 %v2469_v48, %v4786_v30 }
 0x598   : > { %v2875_v53 = vrot.slane %v2868_v47, %v2867_v41  ;;  %v2477_v8 = vrot.slane %v2473_v45, 4 }
 0x599   : > { %v2476_v54 = vrot.slane %v2472_v50, 4  ;;  %v2518_v31 = vpop.permute.xlu1 %2517 }
 0x59a   : > { %v2876_v51 = vcombine.high %v2875_v53, %v2875_v53  ;;  %v2519_v52 = vsel %vm347_vm3, %v2516_v39, %v2518_v31  ;;  %v2523_v55 = vmul.f32 %v2518_v31, %v4796_v56  ;;  %2480 = vrot.lane.b32.xlu1 %v2477_v8, %s3809_s9 }
 0x59b   : > { %v2522_v58 = vmul.f32 %v2519_v52, %v4786_v30  ;;  %2478 = vrot.lane.b32.xlu0 %v2476_v54, %s3809_s9 }
 0x59c   : > { %3031 = vst.msk [vmem:[%s4784_s20 + $0x14] ss:$8 sm:$0x3] %vm2880_vm5, %v2876_v51  ;;  %v2527_v38 = vrot.slane %v2523_v55, 3 }
 0x59d   : > { %v2526_v57 = vrot.slane %v2522_v58, 3  ;;  %v2494_v59 = vpop.permute.xlu1 %2493 }
 0x59e   : > { %v2495_v5 = vsel %vm347_vm3, %v2492_v43, %v2494_v59  ;;  %v2499_v60 = vmul.f32 %v2494_v59, %v4796_v56  ;;  %2530 = vrot.lane.b32.xlu1 %v2527_v38, %s3809_s9 }
 0x59f   : > { %v2498_v61 = vmul.f32 %v2495_v5, %v4786_v30  ;;  %2528 = vrot.lane.b32.xlu0 %v2526_v57, %s3809_s9 }
 0x5a0   : > { %v2503_v0 = vrot.slane %v2499_v60, 5 }
 0x5a1   : > { %v2502_v1 = vrot.slane %v2498_v61, 5  ;;  %v2542_v4 = vpop.permute.xlu1 %2541 }
 0x5a2   : > { %v2543_v49 = vsel %vm347_vm3, %v2540_v62, %v2542_v4  ;;  %v2547_v6 = vmul.f32 %v2542_v4, %v4796_v56  ;;  %2506 = vrot.lane.b32.xlu1 %v2503_v0, %s3809_s9 }
 0x5a3   : > { %v2546_v7 = vmul.f32 %v2543_v49, %v4786_v30  ;;  %2504 = vrot.lane.b32.xlu0 %v2502_v1, %s3809_s9  ;;  %v2718_v30 = vmul.f32 -1.0, %v2620_v15 }
 0x5a4   : > { %v2551_v9 = vrot.slane %v2547_v6, 4 }
 0x5a5   : > { %v2550_v10 = vrot.slane %v2546_v7, 4 }
 0x5a6   : > { %2554 = vrot.lane.b32.xlu1 %v2551_v9, %s3809_s9 }
 0x5a7   : > { %2552 = vrot.lane.b32.xlu0 %v2550_v10, %s3809_s9 }
 0x5f9   : > { %v2674_v11 = vpop.permute.xlu0 %2673 }
 0x5fb   : > { %v2676_v12 = vpop.permute.xlu1 %2675 }
 0x5fc   : > { %v2677_v28 = vsel %vm347_vm3, %v2674_v11, %v2676_v12  ;;  %v2681_v32 = vmul.f32 %v2676_v12, %v2620_v15  ;;  %v2763_v47 = vmul.f32 %v2718_v30, %v2676_v12 }
 0x5fd   : > { %v2626_v13 = vpop.permute.xlu0 %2625  ;;  %v2680_v35 = vmul.f32 %v2677_v28, %v2619_v63  ;;  %v2762_v45 = vmul.f32 %v2717_v2, %v2677_v28 }
 0x5fe   : > { %v2685_v40 = vrot.slane %v2681_v32, 7  ;;  %v2767_v53 = vrot.slane %v2763_v47, 7 }
 0x5ff   : > { %v2628_v16 = vpop.permute.xlu1 %2627  ;;  %v2684_v42 = vrot.slane %v2680_v35, 7  ;;  %v2766_v8 = vrot.slane %v2762_v45, 7 }
 0x600   : > { %v2629_v56 = vsel %vm347_vm3, %v2626_v13, %v2628_v16  ;;  %v2633_v19 = vmul.f32 %v2628_v16, %v2620_v15  ;;  %v2748_v24 = vmul.f32 %v2718_v30, %v2628_v16 }
 0x601   : > { %v2632_v21 = vmul.f32 %v2629_v56, %v2619_v63  ;;  %v2650_v22 = vpop.permute.xlu0 %2649  ;;  %v2747_v25 = vmul.f32 %v2717_v2, %v2629_v56 }
 0x602   : > { %2638 = vrot.lane.b32.xlu1 %v2633_v19, %s3809_s9 }
 0x603   : > { %2636 = vrot.lane.b32.xlu0 %v2632_v21, %s3809_s9  ;;  %v2652_v23 = vpop.permute.xlu1 %2651 }
 0x604   : > { %v2653_v37 = vsel %vm347_vm3, %v2650_v22, %v2652_v23  ;;  %v2720_v41 = vmul.f32 %v2718_v30, %v2652_v23  ;;  %v2657_v33 = vmul.f32 %v2652_v23, %v2620_v15 }
 0x605   : > { %v2698_v17 = vpop.permute.xlu0 %2697  ;;  %v2719_v44 = vmul.f32 %v2717_v2, %v2653_v37  ;;  %v2656_v46 = vmul.f32 %v2653_v37, %v2619_v63 }
 0x606   : > { %2753 = vrot.lane.b32.xlu1 %v2748_v24, %s3809_s9  ;;  %v2724_v39 = vrot.slane %v2720_v41, 1  ;;  %v2661_v48 = vrot.slane %v2657_v33, 1 }
 0x607   : > { %2751 = vrot.lane.b32.xlu0 %v2747_v25, %s3809_s9  ;;  %v2700_v14 = vpop.permute.xlu1 %2699  ;;  %v2723_v29 = vrot.slane %v2719_v44, 1  ;;  %v2660_v50 = vrot.slane %v2656_v46, 1 }
 0x608   : > { %v2701_v3 = vsel %vm347_vm3, %v2698_v17, %v2700_v14  ;;  %v2705_v26 = vmul.f32 %v2700_v14, %v2620_v15  ;;  %v2735_v34 = vmul.f32 %v2718_v30, %v2700_v14 }
 0x609   : > { %v2704_v27 = vmul.f32 %v2701_v3, %v2619_v63  ;;  %v2734_v36 = vmul.f32 %v2717_v2, %v2701_v3 }
 0x60a   : > { %2710 = vrot.lane.b32.xlu1 %v2705_v26, %s3809_s9 }
 0x60b   : > { %2708 = vrot.lane.b32.xlu0 %v2704_v27, %s3809_s9 }
 0x60c   : > { %v2481_v54 = vpop.permute.xlu1 %2480 }
 0x60d   : > { %v2479_v31 = vpop.permute.xlu0 %2478 }
 0x60e   : > { %2740 = vrot.lane.b32.xlu1 %v2735_v34, %s3809_s9  ;;  %v2482_v4 = vsel %vm595_vm9, %v2479_v31, %v2481_v54  ;;  %v2485_v7 = vadd.f32 %v4647_v18, %v2479_v31 }
 0x60f   : > { %2738 = vrot.lane.b32.xlu0 %v2734_v36, %s3809_s9  ;;  %v2486_v12 = vadd.f32 %v4651_v20, %v2482_v4 }
 0x610   : > { %v2531_v43 = vpop.permute.xlu1 %2530 }
 0x611   : > { %v2529_v51 = vpop.permute.xlu0 %2528 }
 0x612   : > { %2688 = vrot.lane.b32.xlu1 %v2685_v40, %s3809_s9  ;;  %v2532_v49 = vsel %vm595_vm9, %v2529_v51, %v2531_v43  ;;  %v2535_v9 = vadd.f32 %v4647_v18, %v2529_v51 }
 0x613   : > { %2686 = vrot.lane.b32.xlu0 %v2684_v42, %s3809_s9  ;;  %v2536_v15 = vadd.f32 %v4651_v20, %v2532_v49 }
 0x614   : > { %v2507_v52 = vpop.permute.xlu1 %2506 }
 0x615   : > { %v2505_v55 = vpop.permute.xlu0 %2504 }
 0x616   : > { %2727 = vrot.lane.b32.xlu1 %v2724_v39, %s3809_s9  ;;  %v2508_v10 = vsel %vm595_vm9, %v2505_v55, %v2507_v52  ;;  %v2511_v63 = vsub.f32 %v2485_v7, %v2505_v55 }
 0x617   : > { %2725 = vrot.lane.b32.xlu0 %v2723_v29, %s3809_s9  ;;  %v2512_v19 = vsub.f32 %v2486_v12, %v2508_v10 }
 0x618   : > { %v2555_v58 = vpop.permute.xlu1 %2554 }
 0x619   : > { %v2553_v38 = vpop.permute.xlu0 %2552 }
 0x61a   : > { %2664 = vrot.lane.b32.xlu1 %v2661_v48, %s3809_s9  ;;  %v2556_v13 = vsel %vm595_vm9, %v2553_v38, %v2555_v58  ;;  %v2559_v16 = vadd.f32 %v2553_v38, %v2535_v9 }
 0x61b   : > { %2662 = vrot.lane.b32.xlu0 %v2660_v50, %s3809_s9  ;;  %v2560_v30 = vadd.f32 %v2556_v13, %v2536_v15 }
 0x61e   : > { %2770 = vrot.lane.b32.xlu1 %v2767_v53, %s3809_s9 }
 0x61f   : > { %2768 = vrot.lane.b32.xlu0 %v2766_v8, %s3809_s9 }
 0x674   : > { %v2639_v57 = vpop.permute.xlu1 %2638 }
 0x675   : > { %v2637_v59 = vpop.permute.xlu0 %2636 }
 0x676   : > { %v2640_v56 = vsel %vm595_vm9, %v2637_v59, %v2639_v57  ;;  %v2643_v2 = vadd.f32 %v2637_v59, %v2511_v63 }
 0x677   : > { %v2644_v24 = vadd.f32 %v2640_v56, %v2512_v19 }
 0x678   : > { %v2754_v5 = vpop.permute.xlu1 %2753 }
 0x679   : > { %v2752_v60 = vpop.permute.xlu0 %2751 }
 0x67a   : > { %v2755_v20 = vsel %vm595_vm9, %v2752_v60, %v2754_v5  ;;  %v2758_v27 = vadd.f32 %v2752_v60, %v2511_v63 }
 0x67b   : > { %v2759_v39 = vadd.f32 %v2755_v20, %v2512_v19 }
 0x67c   : > { %v2711_v61 = vpop.permute.xlu1 %2710 }
 0x67d   : > { %v4908_v62 = vpop.permute.xlu0 %2708 }
 0x67e   : > { %v2712_v28 = vsel %vm595_vm9, %v4908_v62, %v2711_v61 }
 0x680   : > { %v2741_v0 = vpop.permute.xlu1 %2740 }
 0x681   : > { %v4910_v1 = vpop.permute.xlu0 %2738 }
 0x682   : > { %v2742_v35 = vsel %vm595_vm9, %v4910_v1, %v2741_v0 }
 0x684   : > { %v2689_v6 = vpop.permute.xlu1 %2688 }
 0x685   : > { %v2687_v11 = vpop.permute.xlu0 %2686 }
 0x686   : > { %v2690_v21 = vsel %vm595_vm9, %v2687_v11, %v2689_v6  ;;  %v2693_v18 = vadd.f32 %v2687_v11, %v2559_v16 }
 0x687   : > { %v2694_v17 = vadd.f32 %v2690_v21, %v2560_v30 }
 0x688   : > { %v2728_v22 = vpop.permute.xlu1 %2727  ;;  %v2745_v32 = vadd.f32 %v4910_v1, %v2693_v18  ;;  %v2715_v36 = vadd.f32 %v4908_v62, %v2693_v18 }
 0x689   : > { %v2726_v23 = vpop.permute.xlu0 %2725  ;;  %v2716_v41 = vadd.f32 %v2712_v28, %v2694_v17  ;;  %v2746_v42 = vadd.f32 %v2742_v35, %v2694_v17 }
 0x68a   : > { %v2729_v25 = vsel %vm595_vm9, %v2726_v23, %v2728_v22  ;;  %v2732_v14 = vsub.f32 %v2643_v2, %v2726_v23  ;;  %v2791_v48 = vrot.slane %v2745_v32, 6  ;;  %v2760_v45 = vsub.f32 %v2758_v27, %v2726_v23 }
 0x68b   : > { %v2733_v3 = vsub.f32 %v2644_v24, %v2729_v25  ;;  %v2761_v54 = vsub.f32 %v2759_v39, %v2729_v25  ;;  %v2792_v52 = vrot.slane %v2746_v42, 6 }
 0x68c   : > { %v2665_v26 = vpop.permute.xlu1 %2664  ;;  %v2785_v44 = vrot.slane %v2732_v14, 6  ;;  %v2797_v60 = vrot.slane %v2760_v45, 4 }
 0x68d   : > { %v2663_v34 = vpop.permute.xlu0 %2662  ;;  %v2786_v46 = vrot.slane %v2733_v3, 6  ;;  %v2798_v49 = vrot.slane %v2761_v54, 4 }
 0x68e   : > { %v2666_v37 = vsel %vm595_vm9, %v2663_v34, %v2665_v26  ;;  %v2669_v40 = vsub.f32 %v2643_v2, %v2663_v34  ;;  %v2779_v55 = vsub.f32 %v2758_v27, %v2663_v34 }
 0x68f   : > { %v2670_v33 = vsub.f32 %v2644_v24, %v2666_v37  ;;  %v2780_v38 = vsub.f32 %v2759_v39, %v2666_v37 }
 0x690   : > { %v2820_v29 = vsel %vm2819_vm6, %v2669_v40, %v2715_v36  ;;  %v2771_v47 = vpop.permute.xlu1 %2770  ;;  %v2809_v7 = vrot.slane %v2779_v55, 2 }
 0x691   : > { %v2821_v50 = vsel %vm2819_vm6, %v2670_v33, %v2716_v41  ;;  %v2823_v53 = vsel %vm2822_vm7, %v2820_v29, %v2785_v44  ;;  %v2769_v8 = vpop.permute.xlu0 %2768  ;;  %v2810_v11 = vrot.slane %v2780_v38, 2 }
 0x692   : > { %v2824_v31 = vsel %vm2822_vm7, %v2821_v50, %v2786_v46  ;;  %v2772_v43 = vsel %vm595_vm9, %v2769_v8, %v2771_v47  ;;  %v2775_v51 = vadd.f32 %v2769_v8, %v2559_v16  ;;  %v2826_v57 = vsel %vm2825_vm8, %v2823_v53, %v2791_v48 }
 0x693   : > { %v2776_v58 = vadd.f32 %v2772_v43, %v2560_v30  ;;  %v2827_v61 = vsel %vm2825_vm8, %v2824_v31, %v2792_v52  ;;  %vm2834_vm9 = vcmask 1045504   ;;  %v2829_v9 = vsel %vm2828_vm10, %v2826_v57, %v2797_v60 }
 0x694   : > { %v2777_v59 = vadd.f32 %v2775_v51, %v4910_v1  ;;  %v2781_v5 = vadd.f32 %v2775_v51, %v4908_v62  ;;  %v2830_v13 = vsel %vm2828_vm10, %v2827_v61, %v2798_v49 }
 0x695   : > { %v2778_v0 = vadd.f32 %v2776_v58, %v2742_v35  ;;  %v2782_v4 = vadd.f32 %v2776_v58, %v2712_v28 }
 0x696   : > { %v2803_v6 = vrot.slane %v2777_v59, 4  ;;  %v2815_v12 = vrot.slane %v2781_v5, 2 }
 0x697   : > { %v2804_v10 = vrot.slane %v2778_v0, 4  ;;  %v2816_v1 = vrot.slane %v2782_v4, 2 }
 0x698   : > { %v2832_v62 = vsel %vm2831_vm11, %v2829_v9, %v2803_v6 }
 0x699   : > { %v2833_v15 = vsel %vm2831_vm11, %v2830_v13, %v2804_v10  ;;  %v2835_v63 = vsel %vm2834_vm9, %v2832_v62, %v2809_v7 }
 0x69a   : > { %v2838_v16 = vsel %vm2837_vm12, %v2835_v63, %v2815_v12  ;;  %v2836_v56 = vsel %vm2834_vm9, %v2833_v15, %v2810_v11 }
 0x69b   : > { %v2845_v19 = vrot.slane %v2838_v16, 4  ;;  %v2839_v21 = vsel %vm2837_vm12, %v2836_v56, %v2816_v1 }
 0x69c   : > { %v2846_v22 = vrot.slane %v2839_v21, 4 }
 0x69d   : > { %2847 = vrot.lane.b32.xlu0 %v2845_v19, %s3802_s18 }
 0x69e   : > { %2849 = vrot.lane.b32.xlu1 %v2846_v22, %s3802_s18 }
 0x70f   : > { %v2848_v30 = vpop.permute.xlu0 %2847 }
 0x710   : > { %v2850_v2 = vpop.permute.xlu1 %2849 }
 0x711   : > { %v2851_v18 = vsel %vm347_vm3, %v2848_v30, %v2850_v2  ;;  %2856 = vst.msk [vmem:[%s4784_s20 + $0x8] sm:$0xf0] %vm2855_vm13, %v2850_v2 }
 0x712   : > { %2858 = vst.msk [vmem:[%s4784_s20 + $0x18] sm:$0xf] %vm2841_vm2, %v2850_v2  ;;  %2854 = vst [vmem:[%s4784_s20 + $0x10] ss:$-12 sps:$4 sm:$0xff] %v2851_v18  }
 0x713 PF: > { %s17_s28 = sadd.s32 1, %s3797_s28   ;;  %s4978_s24 = smov %s3789_s26 }
 0x714   : > { %p14_p7 = scmp.ge.s32.totalorder %s17_s28, 6   ;;  %s4979_s25 = smov %s3793_s27 }
 0x715   : > { %s4980_s26 = smov %s4983_s29  ;;  %s4981_s27 = smov %s4987_s30 }
 0x716   :  { %16 = sbr.rel (!%p14_p7) target bundleno = 3 (0x3), region = 79 }

</bundles_post_ra>
